<compile_context>
chip_gen: v6e
topology: v6e:2x2x1
jax: 0.10.0
libtpu: 0.0.40
codegen_flags: <defaults>
</compile_context>

<pallas_src>
import functools

import jax
import jax.numpy as jnp
from jax.experimental import pallas as pl
from jax.experimental.pallas import tpu as pltpu

EXPANSION = 4
BN_EPS = 1e-5
LANES = 128
COMPUTE_DTYPE = jnp.bfloat16          # MXU-native operand dtype (f32 accumulate)
_TM_CANDIDATES = (2048, 1024, 512, 256, 128)
_HALO_LEFT = 8                        # left halo width -> sublane-aligned interior store


# ------------------------------ small helpers -------------------------------

def _round_up(v, m):
    return (v + m - 1) // m * m


@functools.lru_cache(maxsize=None)
def _vmem_caps():
    """(vmem_limit_bytes, tile-planning budget).

    The planning budget sits ~15-25% below the scoped limit so in-kernel f32
    accumulators and Mosaic internal scratch never push a "fitting" tile into
    spills:  v7x (64 MiB physical) -> 48 MiB limit / 40 MiB budget;
    v5e/v6e (128 MiB) -> 96 MiB limit / 80 MiB budget.
    """
    try:
        cap = pltpu.get_tpu_info().vmem_capacity_bytes
    except Exception:  # pragma: no cover - conservative fallback
        cap = 64 << 20
    limit = int(min(cap * 3 // 4, 96 << 20))
    budget = int(min(cap * 5 // 8, 80 << 20))
    return limit, budget


def _choose_tile_m(m, per_row_stream, per_row_out, per_row_acc, resident, budget):
    """M tile for the fused matmul kernel.

    Preference order (perf review #1/#8/#10): fits the VMEM budget *including*
    the f32 accumulator rows; divides M exactly (no pad, no out[:M] HBM copy);
    yields >= 4 grid blocks (2 per v7x TensorCore) so the software pipeline and
    both cores stay busy.  Floor is 128 (MXU-row friendly, unmasked stores).
    """
    if m <= _TM_CANDIDATES[-1]:
        return max(_round_up(m, 8), 8)

    def fits(t):
        need = 2 * t * (per_row_stream + per_row_out) + t * per_row_acc + resident
        return need <= budget

    for t in _TM_CANDIDATES:
        if fits(t) and m % t == 0 and m // t >= 4:
            return t
    for t in _TM_CANDIDATES:
        if fits(t) and m % t == 0:
            return t
    for t in _TM_CANDIDATES:
        if fits(t) and _round_up(m, t) // t >= 4:
            return t
    for t in _TM_CANDIDATES:
        if fits(t):
            return t
    return _TM_CANDIDATES[-1]


# ------------------------------ Pallas kernels -------------------------------

def _mm_bn_kernel(x_ref, w_ref, b_ref, o_ref, *, relu):
    acc = jnp.dot(x_ref[...], w_ref[...], preferred_element_type=jnp.float32)
    acc = acc + b_ref[...]
    if relu:
        acc = jnp.maximum(acc, 0.0)
    o_ref[...] = acc.astype(o_ref.dtype)


def _mm_bn_add_kernel(x_ref, w_ref, b_ref, r_ref, o_ref, *, relu):
    # conv3 + bn3 + identity shortcut (residual streamed in bf16, added in f32).
    acc = jnp.dot(x_ref[...], w_ref[...], preferred_element_type=jnp.float32)
    acc = acc + b_ref[...] + r_ref[...].astype(jnp.float32)
    if relu:
        acc = jnp.maximum(acc, 0.0)
    o_ref[...] = acc.astype(o_ref.dtype)


def _mm_bn_proj_kernel(x_ref, w_ref, b_ref, r_ref, rw_ref, o_ref, *, relu):
    # conv3 + bn3 + (1x1 projection shortcut + bn_sc) + relu, fully fused.
    # b_ref already holds the *sum* of the two folded BN biases.
    acc = jnp.dot(x_ref[...], w_ref[...], preferred_element_type=jnp.float32)
    acc = acc + jnp.dot(r_ref[...], rw_ref[...], preferred_element_type=jnp.float32)
    acc = acc + b_ref[...]
    if relu:
        acc = jnp.maximum(acc, 0.0)
    o_ref[...] = acc.astype(o_ref.dtype)


def _conv1_conv3x3_kernel(x_ref, w1_ref, b1_ref, w2_ref, b2_ref, o_ref, ypad_ref,
                          *, stride, H, W, Ho, Wo):
    """Fused conv1(1x1)+bn1+relu and conv2(3x3)+bn2+relu for one image.

    x_ref:  (1, H, W, C)       input image (lane-padded channels, bf16)
    w1_ref: (C, P)             folded 1x1 weight
    w2_ref: (9, P, P)          folded 3x3 tap weights
    b*_ref: (1, P) float32     folded biases
    o_ref:  (1, Ho*Wo, P)      output
    ypad_ref: (H+2, W+_HALO_LEFT+1, P) VMEM slab holding zero-padded conv1 out.
    """
    C = x_ref.shape[-1]
    P = w1_ref.shape[-1]

    # Re-zero the slab every step (keeps the kernel correct when the
    # 'parallel' batch axis is split across v7x TensorCores, each of which
    # gets its own scratch).  Borders of the slab stay zero = spatial padding.
    ypad_ref[...] = jnp.zeros_like(ypad_ref)

    # conv1 (1x1) + bn1 + relu for the whole image, f32 accumulation on MXU.
    xi = x_ref[0].reshape(H * W, C)
    y1 = jnp.dot(xi, w1_ref[...], preferred_element_type=jnp.float32)
    y1 = jnp.maximum(y1 + b1_ref[...], 0.0)

    # Write into the slab interior.  The interior starts at column _HALO_LEFT
    # so the store is sublane-aligned; no XLA jnp.pad / y1 HBM round trip.
    ypad_ref[pl.ds(1, H), pl.ds(_HALO_LEFT, W), :] = (
        y1.reshape(H, W, P).astype(ypad_ref.dtype))

    # conv2 (3x3, stride, pad=1) + bn2 + relu: accumulate the 9 shifted tap
    # matmuls straight from the VMEM slab (no materialized im2col).
    # TODO(synk): per perf review, the kw shifts could be realized with
    # pltpu.roll (XLU slot) instead of offset sublane slices to cut the
    # per-tap relayout copies; needs a bundle-dump before/after to verify.
    acc = jnp.zeros((Ho * Wo, P), jnp.float32)
    for kh in range(3):
        for kw in range(3):
            col0 = kw + _HALO_LEFT - 1
            if stride == 1:
                patch = ypad_ref[pl.ds(kh, Ho), pl.ds(col0, Wo), :]
            else:
                patch = ypad_ref[pl.ds(kh, Ho, stride), pl.ds(col0, Wo, stride), :]
            acc = acc + jnp.dot(patch.reshape(Ho * Wo, P), w2_ref[kh * 3 + kw],
                                preferred_element_type=jnp.float32)
    acc = jnp.maximum(acc + b2_ref[...], 0.0)
    o_ref[0] = acc.astype(o_ref.dtype)


# ------------------------------ kernel wrappers ------------------------------

def fused_matmul_bn(x, w, bias, residual=None, res_w=None, relu=True,
                    out_dtype=COMPUTE_DTYPE):
    """out = maybe_relu(x @ w + bias [+ residual | + residual @ res_w]).

    BN scales are pre-folded into `w` / `res_w`; `bias` is the (already summed)
    folded BN bias of shape (1, N), float32.  Output defaults to bf16 (halves
    the final activation HBM writeback vs. f32).
    """
    M, K = x.shape
    Kw, N = w.shape
    assert K == Kw
    limit, budget = _vmem_caps()

    streams = [x] + ([residual] if residual is not None else [])
    per_row_stream = sum(int(a.shape[-1]) * a.dtype.itemsize for a in streams)
    per_row_out = N * jnp.dtype(out_dtype).itemsize
    # f32 matmul accumulator(s) + epilogue temporaries live in VMEM too.
    per_row_acc = (3 if res_w is not None else 2) * N * 4
    # Grid-invariant operands are still double-buffer *allocated* by the
    # pipeline (their constant index maps only elide the re-copies).
    resident = 2 * w.size * w.dtype.itemsize + 2 * bias.size * bias.dtype.itemsize
    if res_w is not None:
        resident += 2 * res_w.size * res_w.dtype.itemsize
    tm = _choose_tile_m(M, per_row_stream, per_row_out, per_row_acc, resident,
                        budget)

    Mp = _round_up(M, tm)
    if Mp != M:
        x = jnp.pad(x, ((0, Mp - M), (0, 0)))
        if residual is not None:
            residual = jnp.pad(residual, ((0, Mp - M), (0, 0)))
    grid = (Mp // tm,)

    x_spec = pl.BlockSpec((tm, K), lambda i: (i, 0))
    w_spec = pl.BlockSpec((K, N), lambda i: (0, 0))
    b_spec = pl.BlockSpec((1, N), lambda i: (0, 0))
    o_spec = pl.BlockSpec((tm, N), lambda i: (i, 0))

    flops = 2 * Mp * K * N
    bytes_accessed = (sum(a.size * a.dtype.itemsize for a in streams)
                      + w.size * w.dtype.itemsize
                      + Mp * N * jnp.dtype(out_dtype).itemsize)

    if residual is None:
        ins = (x, w, bias)
        in_specs = [x_spec, w_spec, b_spec]
        kernel = functools.partial(_mm_bn_kernel, relu=relu)
    elif res_w is None:
        ins = (x, w, bias, residual)
        in_specs = [x_spec, w_spec, b_spec, pl.BlockSpec((tm, N), lambda i: (i, 0))]
        kernel = functools.partial(_mm_bn_add_kernel, relu=relu)
    else:
        Kr = residual.shape[1]
        ins = (x, w, bias, residual, res_w)
        in_specs = [x_spec, w_spec, b_spec,
                    pl.BlockSpec((tm, Kr), lambda i: (i, 0)),
                    pl.BlockSpec((Kr, N), lambda i: (0, 0))]
        kernel = functools.partial(_mm_bn_proj_kernel, relu=relu)
        flops += 2 * Mp * Kr * N
        bytes_accessed += res_w.size * res_w.dtype.itemsize

    out = pl.pallas_call(
        kernel,
        out_shape=jax.ShapeDtypeStruct((Mp, N), out_dtype),
        grid_spec=pltpu.PrefetchScalarGridSpec(
            num_scalar_prefetch=0, grid=grid,
            in_specs=in_specs, out_specs=o_spec),
        compiler_params=pltpu.CompilerParams(
            dimension_semantics=("parallel",), vmem_limit_bytes=limit),
        cost_estimate=pl.CostEstimate(flops=int(flops), transcendentals=0,
                                      bytes_accessed=int(bytes_accessed)),
    )(*ins)
    return out[:M] if Mp != M else out


def conv1_conv3x3_bn(x, w1, b1, w2_taps, b2, *, stride, out_dtype):
    """Fused conv1(1x1)+bn1+relu + conv2(3x3,stride,pad=1)+bn2+relu per image."""
    Nb, H, W, Cin = x.shape
    P = w1.shape[-1]
    Ho = (H - 1) // stride + 1
    Wo = (W - 1) // stride + 1
    limit, _ = _vmem_caps()

    kernel = functools.partial(_conv1_conv3x3_kernel, stride=stride,
                               H=H, W=W, Ho=Ho, Wo=Wo)
    flops = 2 * Nb * (H * W * Cin * P + 9 * Ho * Wo * P * P)
    bytes_accessed = (x.size * x.dtype.itemsize
                      + w1.size * w1.dtype.itemsize
                      + w2_taps.size * w2_taps.dtype.itemsize
                      + Nb * Ho * Wo * P * jnp.dtype(out_dtype).itemsize)

    out = pl.pallas_call(
        kernel,
        out_shape=jax.ShapeDtypeStruct((Nb, Ho * Wo, P), out_dtype),
        grid_spec=pltpu.PrefetchScalarGridSpec(
            num_scalar_prefetch=0,
            grid=(Nb,),
            in_specs=[
                pl.BlockSpec((1, H, W, Cin), lambda n: (n, 0, 0, 0)),
                pl.BlockSpec((Cin, P), lambda n: (0, 0)),
                pl.BlockSpec((1, P), lambda n: (0, 0)),
                pl.BlockSpec((9, P, P), lambda n: (0, 0, 0)),
                pl.BlockSpec((1, P), lambda n: (0, 0)),
            ],
            out_specs=pl.BlockSpec((1, Ho * Wo, P), lambda n: (n, 0, 0)),
            scratch_shapes=[pltpu.VMEM((H + 2, W + _HALO_LEFT + 1, P), x.dtype)]),
        compiler_params=pltpu.CompilerParams(
            dimension_semantics=("parallel",), vmem_limit_bytes=limit),
        cost_estimate=pl.CostEstimate(flops=int(flops), transcendentals=0,
                                      bytes_accessed=int(bytes_accessed)),
    )(x, w1, b1, w2_taps, b2)
    return out, Ho, Wo


# ------------------------------- JAX glue ------------------------------------

def _bn_fold(gamma, beta, mean, var):
    scale = gamma / jnp.sqrt(var + BN_EPS)
    bias = beta - mean * scale
    return scale, bias


def _fold_1x1(w_oihw, bn, cin_p, cout_p, dtype):
    """OIHW 1x1 conv weight + BN -> lane-padded (cin_p, cout_p) matrix + bias."""
    cout, cin = w_oihw.shape[:2]
    scale, bias = _bn_fold(*bn)
    wmat = w_oihw.reshape(cout, cin).T * scale[None, :]                 # (cin, cout)
    wmat = jnp.pad(wmat, ((0, cin_p - cin), (0, cout_p - cout))).astype(dtype)
    b = jnp.pad(bias, (0, cout_p - cout)).reshape(1, cout_p).astype(jnp.float32)
    return wmat, b


def _fold_3x3(w_oihw, bn, cin_p, cout_p, dtype):
    """OIHW 3x3 conv weight + BN -> lane-padded (9, cin_p, cout_p) taps + bias."""
    cout, cin = w_oihw.shape[:2]
    scale, bias = _bn_fold(*bn)
    w = jnp.transpose(w_oihw, (2, 3, 1, 0)) * scale[None, None, None, :]  # (3,3,i,o)
    w = jnp.pad(w, ((0, 0), (0, 0), (0, cin_p - cin), (0, cout_p - cout)))
    w = w.reshape(9, cin_p, cout_p).astype(dtype)
    b = jnp.pad(bias, (0, cout_p - cout)).reshape(1, cout_p).astype(jnp.float32)
    return w, b


def init_bottleneck_params(key, in_planes, planes):
    """Deterministic synthetic parameters (PyTorch weight shapes, OIHW)."""
    def conv_w(k, cout, cin, ks):
        return 0.1 * jax.random.normal(k, (cout, cin, ks, ks), jnp.float32)

    def bn_p(k, c):
        k1, k2, k3, k4 = jax.random.split(k, 4)
        gamma = 1.0 + 0.1 * jax.random.normal(k1, (c,), jnp.float32)
        beta = 0.1 * jax.random.normal(k2, (c,), jnp.float32)
        mean = 0.1 * jax.random.normal(k3, (c,), jnp.float32)
        var = 1.0 + 0.1 * jnp.abs(jax.random.normal(k4, (c,), jnp.float32))
        return (gamma, beta, mean, var)

    cout = EXPANSION * planes
    ks = jax.random.split(key, 8)
    return {
        "planes": planes,
        "w1": conv_w(ks[0], planes, in_planes, 1),
        "bn1": bn_p(ks[1], planes),
        "w2": conv_w(ks[2], planes, planes, 3),
        "bn2": bn_p(ks[3], planes),
        "w3": conv_w(ks[4], cout, planes, 1),
        "bn3": bn_p(ks[5], cout),
        "wsc": conv_w(ks[6], cout, in_planes, 1),
        "bnsc": bn_p(ks[7], cout),
    }


def bottleneck_forward(x_nchw, params, stride=1, compute_dtype=COMPUTE_DTYPE):
    """Pallas-backed Bottleneck forward.  Input/output are NCHW (PyTorch)."""
    N, Cin, H, W = x_nchw.shape
    P = params["planes"]
    Cout = EXPANSION * P
    Cin_p, P_p, Cout_p = (_round_up(c, LANES) for c in (Cin, P, Cout))

    # NCHW -> NHWC; lane-pad channels once so every kernel stays 128-lane dense.
    x_nhwc = jnp.transpose(x_nchw, (0, 2, 3, 1))
    x_c = jnp.pad(x_nhwc, ((0, 0), (0, 0), (0, 0), (0, Cin_p - Cin)))
    x_c = x_c.astype(compute_dtype)

    # conv1 (1x1) + bn1 + relu + conv2 (3x3) + bn2 + relu, fused in one kernel
    # (halo is built in VMEM — no XLA pad / intermediate activation HBM pass).
    w1, b1 = _fold_1x1(params["w1"], params["bn1"], Cin_p, P_p, compute_dtype)
    w2, b2 = _fold_3x3(params["w2"], params["bn2"], P_p, P_p, compute_dtype)
    y2, Ho, Wo = conv1_conv3x3_bn(x_c, w1, b1, w2, b2, stride=stride,
                                  out_dtype=compute_dtype)
    y2 = y2.reshape(N * Ho * Wo, P_p)

    # conv3 (1x1) + bn3 + shortcut + final relu, all fused into one kernel.
    # Final output stays bf16 (review #2); residual streams in bf16 (review #3).
    w3, b3 = _fold_1x1(params["w3"], params["bn3"], P_p, Cout_p, compute_dtype)
    if stride != 1 or Cin != Cout:
        wsc, bsc = _fold_1x1(params["wsc"], params["bnsc"], Cin_p, Cout_p,
                             compute_dtype)
        if stride == 1:
            xs = x_c.reshape(N * H * W, Cin_p)          # pure reshape, no gather
        else:
            # TODO(synk): for stride=2 this subsample is still an XLA strided
            # slice; emitting it from the conv1/conv2 kernel (or a strided
            # in-kernel read) would remove this extra HBM pass (review #10).
            xs = x_c[:, ::stride, ::stride, :].reshape(N * Ho * Wo, Cin_p)
        y3 = fused_matmul_bn(y2, w3, b3 + bsc, residual=xs, res_w=wsc,
                             relu=True, out_dtype=compute_dtype)
    else:
        # Identity shortcut: stride == 1 and Cin == Cout (so Cin_p == Cout_p).
        xs = x_c.reshape(N * H * W, Cout_p)
        y3 = fused_matmul_bn(y2, w3, b3, residual=xs, relu=True,
                             out_dtype=compute_dtype)

    y3 = y3.reshape(N, Ho, Wo, Cout_p)[..., :Cout].astype(jnp.float32)
    return jnp.transpose(y3, (0, 3, 1, 2))                       # -> NCHW


# --------------------------- pure-JAX reference ------------------------------

def bottleneck_reference(x_nchw, params, stride=1):
    def conv(x, w, s):
        ks = w.shape[2]
        pad = (ks - 1) // 2
        return jax.lax.conv_general_dilated(
            x, jnp.transpose(w, (2, 3, 1, 0)), (s, s),
            padding=[(pad, pad), (pad, pad)],
            dimension_numbers=("NHWC", "HWIO", "NHWC"))

    def bn(x, p):
        gamma, beta, mean, var = p
        return (x - mean) / jnp.sqrt(var + BN_EPS) * gamma + beta

    Cout = params["w3"].shape[0]
    x = jnp.transpose(x_nchw, (0, 2, 3, 1))
    Cin = x.shape[-1]
    out = jax.nn.relu(bn(conv(x, params["w1"], 1), params["bn1"]))
    out = jax.nn.relu(bn(conv(out, params["w2"], stride), params["bn2"]))
    out = bn(conv(out, params["w3"], 1), params["bn3"])
    if stride != 1 or Cin != Cout:
        sc = bn(conv(x, params["wsc"], stride), params["bnsc"])
    else:
        sc = x
    out = jax.nn.relu(out + sc)
    return jnp.transpose(out, (0, 3, 1, 2))


# ---------------------------------- main --------------------------------------

if __name__ == "__main__":
    key = jax.random.PRNGKey(0)
    k_x, k_p = jax.random.split(key)

    N, in_planes, planes, H, W, stride = 2, 4, 4, 16, 16, 1
    x = jax.random.normal(k_x, (N, in_planes, H, W), jnp.float32)
    params = init_bottleneck_params(k_p, in_planes, planes)

    out = jax.block_until_ready(bottleneck_forward(x, params, stride=stride))
    ref = jax.block_until_ready(bottleneck_reference(x, params, stride=stride))

    Ho = (H - 1) // stride + 1
    Wo = (W - 1) // stride + 1
    assert out.shape == (N, EXPANSION * planes, Ho, Wo)
    max_err = float(jnp.max(jnp.abs(out - ref)))
    # bf16 matmul operands, bf16 inter-kernel activations and bf16 final output
    # (f32 accumulation everywhere) => expected error band ~1e-2 vs. the pure
    # f32 reference; 5e-2 rtol/atol documents that budget.
    assert jnp.allclose(out, ref, rtol=5e-2, atol=5e-2), max_err

    print("KERNEL_OK")
</pallas_src>

<mosaic_0001>
module attributes {stable_mosaic.version = 11 : i64} {
  func.func @_conv1_conv3x3_kernel(%arg0: i32, %arg1: memref<1x16x16x128xbf16, #tpu.memory_space<vmem>>, %arg2: memref<128x128xbf16, #tpu.memory_space<vmem>>, %arg3: memref<1x128xf32, #tpu.memory_space<vmem>>, %arg4: memref<9x128x128xbf16, #tpu.memory_space<vmem>>, %arg5: memref<1x128xf32, #tpu.memory_space<vmem>>, %arg6: memref<1x256x128xbf16, #tpu.memory_space<vmem>>, %arg7: memref<18x25x128xbf16, #tpu.memory_space<vmem>>) attributes {dimension_semantics = [#tpu.dimension_semantics<parallel>], iteration_bounds = array<i64: 2>, scalar_prefetch = 0 : i64, scratch_operands = 1 : i64, tpu.core_type = #tpu.core_type<tc>, window_params = [{transform_indices = @transform_0, window_bounds = array<i64: 1, 16, 16, 128>}, {pipeline_mode = #tpu.pipeline_mode<synchronous>, transform_indices = @transform_1, window_bounds = array<i64: 128, 128>}, {pipeline_mode = #tpu.pipeline_mode<synchronous>, transform_indices = @transform_2, window_bounds = array<i64: 1, 128>}, {pipeline_mode = #tpu.pipeline_mode<synchronous>, transform_indices = @transform_3, window_bounds = array<i64: 9, 128, 128>}, {pipeline_mode = #tpu.pipeline_mode<synchronous>, transform_indices = @transform_4, window_bounds = array<i64: 1, 128>}, {transform_indices = @transform_5, window_bounds = array<i64: 1, 256, 128>}]} {
    %cst = arith.constant 0.000000e+00 : bf16
    %0 = vector.broadcast %cst : bf16 to vector<18x25x128xbf16>
    %c0 = arith.constant 0 : index
    %c0_0 = arith.constant 0 : index
    %c0_1 = arith.constant 0 : index
    %1 = vector.load %arg7[%c0, %c0_0, %c0_1] : memref<18x25x128xbf16, #tpu.memory_space<vmem>>, vector<18x25x128xbf16>
    tpu.vector_store %arg7[%c0, %c0_0, %c0_1], %0 {strides = array<i32>} : memref<18x25x128xbf16, #tpu.memory_space<vmem>>, vector<18x25x128xbf16>,
    %c0_2 = arith.constant 0 : index
    %c0_3 = arith.constant 0 : index
    %c0_4 = arith.constant 0 : index
    %c0_5 = arith.constant 0 : index
    %2 = vector.load %arg1[%c0_2, %c0_3, %c0_4, %c0_5] : memref<1x16x16x128xbf16, #tpu.memory_space<vmem>>, vector<1x16x16x128xbf16>
    %3 = vector.shape_cast %2 : vector<1x16x16x128xbf16> to vector<16x16x128xbf16>
    %4 = vector.shape_cast %3 : vector<16x16x128xbf16> to vector<256x128xbf16>
    %c0_6 = arith.constant 0 : index
    %c0_7 = arith.constant 0 : index
    %5 = vector.load %arg2[%c0_6, %c0_7] : memref<128x128xbf16, #tpu.memory_space<vmem>>, vector<128x128xbf16>
    %cst_8 = arith.constant dense<0.000000e+00> : vector<256x128xf32>
    %6 = tpu.matmul %4, %5, %cst_8 {dimension_numbers = #tpu.dot_dimension_numbers<[1], [0], [0], [1], [0, 0, 1, 1], [], []>} : vector<256x128xbf16>, vector<128x128xbf16>, vector<256x128xf32> -> vector<256x128xf32>
    %c0_9 = arith.constant 0 : index
    %c0_10 = arith.constant 0 : index
    %7 = vector.load %arg3[%c0_9, %c0_10] : memref<1x128xf32, #tpu.memory_space<vmem>>, vector<1x128xf32>
    %8 = vector.broadcast %7 : vector<1x128xf32> to vector<256x128xf32>
    %9 = arith.addf %6, %8 : vector<256x128xf32>
    %cst_11 = arith.constant 0.000000e+00 : f32
    %10 = vector.broadcast %cst_11 : f32 to vector<256x128xf32>
    %11 = arith.maximumf %9, %10 : vector<256x128xf32>
    %12 = vector.shape_cast %11 : vector<256x128xf32> to vector<16x16x128xf32>
    %13 = arith.truncf %12 : vector<16x16x128xf32> to vector<16x16x128xbf16>
    %c1 = arith.constant 1 : index
    %c8 = arith.constant 8 : index
    %c0_12 = arith.constant 0 : index
    %14 = vector.load %arg7[%c1, %c8, %c0_12] : memref<18x25x128xbf16, #tpu.memory_space<vmem>>, vector<16x16x128xbf16>
    tpu.vector_store %arg7[%c1, %c8, %c0_12], %13 {strides = array<i32>} : memref<18x25x128xbf16, #tpu.memory_space<vmem>>, vector<16x16x128xbf16>,
    %cst_13 = arith.constant 0.000000e+00 : f32
    %15 = vector.broadcast %cst_13 : f32 to vector<256x128xf32>
    %c0_14 = arith.constant 0 : index
    %c7 = arith.constant 7 : index
    %c0_15 = arith.constant 0 : index
    %16 = vector.load %arg7[%c0_14, %c7, %c0_15] : memref<18x25x128xbf16, #tpu.memory_space<vmem>>, vector<16x16x128xbf16>
    %17 = vector.shape_cast %16 : vector<16x16x128xbf16> to vector<256x128xbf16>
    %c0_16 = arith.constant 0 : index
    %c0_17 = arith.constant 0 : index
    %c0_18 = arith.constant 0 : index
    %18 = vector.load %arg4[%c0_16, %c0_17, %c0_18] : memref<9x128x128xbf16, #tpu.memory_space<vmem>>, vector<1x128x128xbf16>
    %19 = vector.shape_cast %18 : vector<1x128x128xbf16> to vector<128x128xbf16>
    %cst_19 = arith.constant dense<0.000000e+00> : vector<256x128xf32>
    %20 = tpu.matmul %17, %19, %cst_19 {dimension_numbers = #tpu.dot_dimension_numbers<[1], [0], [0], [1], [0, 0, 1, 1], [], []>} : vector<256x128xbf16>, vector<128x128xbf16>, vector<256x128xf32> -> vector<256x128xf32>
    %21 = arith.addf %15, %20 : vector<256x128xf32>
    %c0_20 = arith.constant 0 : index
    %c8_21 = arith.constant 8 : index
    %c0_22 = arith.constant 0 : index
    %22 = vector.load %arg7[%c0_20, %c8_21, %c0_22] : memref<18x25x128xbf16, #tpu.memory_space<vmem>>, vector<16x16x128xbf16>
    %23 = vector.shape_cast %22 : vector<16x16x128xbf16> to vector<256x128xbf16>
    %c1_23 = arith.constant 1 : index
    %c0_24 = arith.constant 0 : index
    %c0_25 = arith.constant 0 : index
    %24 = vector.load %arg4[%c1_23, %c0_24, %c0_25] : memref<9x128x128xbf16, #tpu.memory_space<vmem>>, vector<1x128x128xbf16>
    %25 = vector.shape_cast %24 : vector<1x128x128xbf16> to vector<128x128xbf16>
    %cst_26 = arith.constant dense<0.000000e+00> : vector<256x128xf32>
    %26 = tpu.matmul %23, %25, %cst_26 {dimension_numbers = #tpu.dot_dimension_numbers<[1], [0], [0], [1], [0, 0, 1, 1], [], []>} : vector<256x128xbf16>, vector<128x128xbf16>, vector<256x128xf32> -> vector<256x128xf32>
    %27 = arith.addf %21, %26 : vector<256x128xf32>
    %c0_27 = arith.constant 0 : index
    %c9 = arith.constant 9 : index
    %c0_28 = arith.constant 0 : index
    %28 = vector.load %arg7[%c0_27, %c9, %c0_28] : memref<18x25x128xbf16, #tpu.memory_space<vmem>>, vector<16x16x128xbf16>
    %29 = vector.shape_cast %28 : vector<16x16x128xbf16> to vector<256x128xbf16>
    %c2 = arith.constant 2 : index
    %c0_29 = arith.constant 0 : index
    %c0_30 = arith.constant 0 : index
    %30 = vector.load %arg4[%c2, %c0_29, %c0_30] : memref<9x128x128xbf16, #tpu.memory_space<vmem>>, vector<1x128x128xbf16>
    %31 = vector.shape_cast %30 : vector<1x128x128xbf16> to vector<128x128xbf16>
    %cst_31 = arith.constant dense<0.000000e+00> : vector<256x128xf32>
    %32 = tpu.matmul %29, %31, %cst_31 {dimension_numbers = #tpu.dot_dimension_numbers<[1], [0], [0], [1], [0, 0, 1, 1], [], []>} : vector<256x128xbf16>, vector<128x128xbf16>, vector<256x128xf32> -> vector<256x128xf32>
    %33 = arith.addf %27, %32 : vector<256x128xf32>
    %c1_32 = arith.constant 1 : index
    %c7_33 = arith.constant 7 : index
    %c0_34 = arith.constant 0 : index
    %34 = vector.load %arg7[%c1_32, %c7_33, %c0_34] : memref<18x25x128xbf16, #tpu.memory_space<vmem>>, vector<16x16x128xbf16>
    %35 = vector.shape_cast %34 : vector<16x16x128xbf16> to vector<256x128xbf16>
    %c3 = arith.constant 3 : index
    %c0_35 = arith.constant 0 : index
    %c0_36 = arith.constant 0 : index
    %36 = vector.load %arg4[%c3, %c0_35, %c0_36] : memref<9x128x128xbf16, #tpu.memory_space<vmem>>, vector<1x128x128xbf16>
    %37 = vector.shape_cast %36 : vector<1x128x128xbf16> to vector<128x128xbf16>
    %cst_37 = arith.constant dense<0.000000e+00> : vector<256x128xf32>
    %38 = tpu.matmul %35, %37, %cst_37 {dimension_numbers = #tpu.dot_dimension_numbers<[1], [0], [0], [1], [0, 0, 1, 1], [], []>} : vector<256x128xbf16>, vector<128x128xbf16>, vector<256x128xf32> -> vector<256x128xf32>
    %39 = arith.addf %33, %38 : vector<256x128xf32>
    %c1_38 = arith.constant 1 : index
    %c8_39 = arith.constant 8 : index
    %c0_40 = arith.constant 0 : index
    %40 = vector.load %arg7[%c1_38, %c8_39, %c0_40] : memref<18x25x128xbf16, #tpu.memory_space<vmem>>, vector<16x16x128xbf16>
    %41 = vector.shape_cast %40 : vector<16x16x128xbf16> to vector<256x128xbf16>
    %c4 = arith.constant 4 : index
    %c0_41 = arith.constant 0 : index
    %c0_42 = arith.constant 0 : index
    %42 = vector.load %arg4[%c4, %c0_41, %c0_42] : memref<9x128x128xbf16, #tpu.memory_space<vmem>>, vector<1x128x128xbf16>
    %43 = vector.shape_cast %42 : vector<1x128x128xbf16> to vector<128x128xbf16>
    %cst_43 = arith.constant dense<0.000000e+00> : vector<256x128xf32>
    %44 = tpu.matmul %41, %43, %cst_43 {dimension_numbers = #tpu.dot_dimension_numbers<[1], [0], [0], [1], [0, 0, 1, 1], [], []>} : vector<256x128xbf16>, vector<128x128xbf16>, vector<256x128xf32> -> vector<256x128xf32>
    %45 = arith.addf %39, %44 : vector<256x128xf32>
    %c1_44 = arith.constant 1 : index
    %c9_45 = arith.constant 9 : index
    %c0_46 = arith.constant 0 : index
    %46 = vector.load %arg7[%c1_44, %c9_45, %c0_46] : memref<18x25x128xbf16, #tpu.memory_space<vmem>>, vector<16x16x128xbf16>
    %47 = vector.shape_cast %46 : vector<16x16x128xbf16> to vector<256x128xbf16>
    %c5 = arith.constant 5 : index
    %c0_47 = arith.constant 0 : index
    %c0_48 = arith.constant 0 : index
    %48 = vector.load %arg4[%c5, %c0_47, %c0_48] : memref<9x128x128xbf16, #tpu.memory_space<vmem>>, vector<1x128x128xbf16>
    %49 = vector.shape_cast %48 : vector<1x128x128xbf16> to vector<128x128xbf16>
    %cst_49 = arith.constant dense<0.000000e+00> : vector<256x128xf32>
    %50 = tpu.matmul %47, %49, %cst_49 {dimension_numbers = #tpu.dot_dimension_numbers<[1], [0], [0], [1], [0, 0, 1, 1], [], []>} : vector<256x128xbf16>, vector<128x128xbf16>, vector<256x128xf32> -> vector<256x128xf32>
    %51 = arith.addf %45, %50 : vector<256x128xf32>
    %c2_50 = arith.constant 2 : index
    %c7_51 = arith.constant 7 : index
    %c0_52 = arith.constant 0 : index
    %52 = vector.load %arg7[%c2_50, %c7_51, %c0_52] : memref<18x25x128xbf16, #tpu.memory_space<vmem>>, vector<16x16x128xbf16>
    %53 = vector.shape_cast %52 : vector<16x16x128xbf16> to vector<256x128xbf16>
    %c6 = arith.constant 6 : index
    %c0_53 = arith.constant 0 : index
    %c0_54 = arith.constant 0 : index
    %54 = vector.load %arg4[%c6, %c0_53, %c0_54] : memref<9x128x128xbf16, #tpu.memory_space<vmem>>, vector<1x128x128xbf16>
    %55 = vector.shape_cast %54 : vector<1x128x128xbf16> to vector<128x128xbf16>
    %cst_55 = arith.constant dense<0.000000e+00> : vector<256x128xf32>
    %56 = tpu.matmul %53, %55, %cst_55 {dimension_numbers = #tpu.dot_dimension_numbers<[1], [0], [0], [1], [0, 0, 1, 1], [], []>} : vector<256x128xbf16>, vector<128x128xbf16>, vector<256x128xf32> -> vector<256x128xf32>
    %57 = arith.addf %51, %56 : vector<256x128xf32>
    %c2_56 = arith.constant 2 : index
    %c8_57 = arith.constant 8 : index
    %c0_58 = arith.constant 0 : index
    %58 = vector.load %arg7[%c2_56, %c8_57, %c0_58] : memref<18x25x128xbf16, #tpu.memory_space<vmem>>, vector<16x16x128xbf16>
    %59 = vector.shape_cast %58 : vector<16x16x128xbf16> to vector<256x128xbf16>
    %c7_59 = arith.constant 7 : index
    %c0_60 = arith.constant 0 : index
    %c0_61 = arith.constant 0 : index
    %60 = vector.load %arg4[%c7_59, %c0_60, %c0_61] : memref<9x128x128xbf16, #tpu.memory_space<vmem>>, vector<1x128x128xbf16>
    %61 = vector.shape_cast %60 : vector<1x128x128xbf16> to vector<128x128xbf16>
    %cst_62 = arith.constant dense<0.000000e+00> : vector<256x128xf32>
    %62 = tpu.matmul %59, %61, %cst_62 {dimension_numbers = #tpu.dot_dimension_numbers<[1], [0], [0], [1], [0, 0, 1, 1], [], []>} : vector<256x128xbf16>, vector<128x128xbf16>, vector<256x128xf32> -> vector<256x128xf32>
    %63 = arith.addf %57, %62 : vector<256x128xf32>
    %c2_63 = arith.constant 2 : index
    %c9_64 = arith.constant 9 : index
    %c0_65 = arith.constant 0 : index
    %64 = vector.load %arg7[%c2_63, %c9_64, %c0_65] : memref<18x25x128xbf16, #tpu.memory_space<vmem>>, vector<16x16x128xbf16>
    %65 = vector.shape_cast %64 : vector<16x16x128xbf16> to vector<256x128xbf16>
    %c8_66 = arith.constant 8 : index
    %c0_67 = arith.constant 0 : index
    %c0_68 = arith.constant 0 : index
    %66 = vector.load %arg4[%c8_66, %c0_67, %c0_68] : memref<9x128x128xbf16, #tpu.memory_space<vmem>>, vector<1x128x128xbf16>
    %67 = vector.shape_cast %66 : vector<1x128x128xbf16> to vector<128x128xbf16>
    %cst_69 = arith.constant dense<0.000000e+00> : vector<256x128xf32>
    %68 = tpu.matmul %65, %67, %cst_69 {dimension_numbers = #tpu.dot_dimension_numbers<[1], [0], [0], [1], [0, 0, 1, 1], [], []>} : vector<256x128xbf16>, vector<128x128xbf16>, vector<256x128xf32> -> vector<256x128xf32>
    %69 = arith.addf %63, %68 : vector<256x128xf32>
    %c0_70 = arith.constant 0 : index
    %c0_71 = arith.constant 0 : index
    %70 = vector.load %arg5[%c0_70, %c0_71] : memref<1x128xf32, #tpu.memory_space<vmem>>, vector<1x128xf32>
    %71 = vector.broadcast %70 : vector<1x128xf32> to vector<256x128xf32>
    %72 = arith.addf %69, %71 : vector<256x128xf32>
    %cst_72 = arith.constant 0.000000e+00 : f32
    %73 = vector.broadcast %cst_72 : f32 to vector<256x128xf32>
    %74 = arith.maximumf %72, %73 : vector<256x128xf32>
    %75 = arith.truncf %74 : vector<256x128xf32> to vector<256x128xbf16>
    %c0_73 = arith.constant 0 : index
    %c0_74 = arith.constant 0 : index
    %c0_75 = arith.constant 0 : index
    %76 = vector.load %arg6[%c0_73, %c0_74, %c0_75] : memref<1x256x128xbf16, #tpu.memory_space<vmem>>, vector<1x256x128xbf16>
    %77 = vector.shape_cast %76 : vector<1x256x128xbf16> to vector<256x128xbf16>
    %78 = vector.shape_cast %75 : vector<256x128xbf16> to vector<1x256x128xbf16>
    tpu.vector_store %arg6[%c0_73, %c0_74, %c0_75], %78 {strides = array<i32>} : memref<1x256x128xbf16, #tpu.memory_space<vmem>>, vector<1x256x128xbf16>,
    return
  }
  func.func @transform_0(%arg0: i32) -> (i32, i32, i32, i32) {
    %c0_i32 = arith.constant 0 : i32
    %c0_i32_0 = arith.constant 0 : i32
    %c0_i32_1 = arith.constant 0 : i32
    %c0_i32_2 = arith.constant 0 : i32
    return %arg0, %c0_i32, %c0_i32_0, %c0_i32_1 : i32, i32, i32, i32
  }
  func.func @transform_1(%arg0: i32) -> (i32, i32) {
    %c0_i32 = arith.constant 0 : i32
    %c0_i32_0 = arith.constant 0 : i32
    %c0_i32_1 = arith.constant 0 : i32
    return %c0_i32, %c0_i32_0 : i32, i32
  }
  func.func @transform_2(%arg0: i32) -> (i32, i32) {
    %c0_i32 = arith.constant 0 : i32
    %c0_i32_0 = arith.constant 0 : i32
    %c0_i32_1 = arith.constant 0 : i32
    return %c0_i32, %c0_i32_0 : i32, i32
  }
  func.func @transform_3(%arg0: i32) -> (i32, i32, i32) {
    %c0_i32 = arith.constant 0 : i32
    %c0_i32_0 = arith.constant 0 : i32
    %c0_i32_1 = arith.constant 0 : i32
    %c0_i32_2 = arith.constant 0 : i32
    return %c0_i32, %c0_i32_0, %c0_i32_1 : i32, i32, i32
  }
  func.func @transform_4(%arg0: i32) -> (i32, i32) {
    %c0_i32 = arith.constant 0 : i32
    %c0_i32_0 = arith.constant 0 : i32
    %c0_i32_1 = arith.constant 0 : i32
    return %c0_i32, %c0_i32_0 : i32, i32
  }
  func.func @transform_5(%arg0: i32) -> (i32, i32, i32) {
    %c0_i32 = arith.constant 0 : i32
    %c0_i32_0 = arith.constant 0 : i32
    %c0_i32_1 = arith.constant 0 : i32
    return %arg0, %c0_i32, %c0_i32_0 : i32, i32, i32
  }
}

</mosaic_0001>

<bundles_post_ra>
// kernel: tpu_custom_call.1
= control target key start
LH: loop header
LB: loop body
LE: loop exit
PB: predicated region body
PF: predicated region fallthrough
CT: control target
= control target key end

     0   :  { %10 = vsyncpa [#allocation4], 0  ;;  %s10490_s0 = inlined_call_operand.hbm [shape: bf16[2,16,16,128], index: 0, kind: input, shape index: {}]   ;;  %s10491_s1 = inlined_call_operand.hbm [shape: bf16[128,128], index: 1, kind: input, shape index: {}]   ;;  %s10492_s2 = inlined_call_operand.vmem [shape: f32[1,128], index: 2, kind: input, shape index: {}]   ;;  %s10493_s3 = inlined_call_operand.hbm [shape: bf16[9,128,128], index: 3, kind: input, shape index: {}]   ;;  %s10494_s4 = inlined_call_operand.vmem [shape: f32[1,128], index: 4, kind: input, shape index: {}]   ;;  %s10495_s5 = inlined_call_operand.hbm [shape: bf16[2,256,128], index: 5, kind: output, shape index: {}]  }
   0x1   :  { %12 = vsyncpa [#allocation4 + $0x1], 0 }
   0x2   :  { %13 = vsyncpa [#allocation7], 0 }
   0x3   :  { %14 = vsyncpa [#allocation5], 0 }
   0x4   :  { %16 = vsyncpa [#allocation5 + $0x1], 0  ;;  %s8374_s18 = smov 0   ;;  %s8376_s19 = smov 0  }
   0x5   :  { %s8378_s20 = smov 0   ;;  %s8380_s21 = smov 0  }
   0x6 LB: > { %s8395_s22 = sadd.s32 4294967295, %s8333_s21   ;;  %s6705_s23 = sadd.s32 4294967294, %s8333_s21   ;;  %s8333_s21 = sphi %s8380_s21, %s10677_s21   ;;  %s8329_s20 = sphi %s8378_s20, %s10676_s20   ;;  %s8325_s19 = sphi %s8376_s19, %s10675_s19   ;;  %s8321_s18 = sphi %s8374_s18, %s10674_s18  }
   0x7   : > { %p42_p0 = scmp.ne.s32.totalorder %s8325_s19, %s8321_s18  ;;  %p10496_p1 = scmp.eq.s32.totalorder %s8395_s22, 0 }
   0x8   : > { %p150_p2 = scmp.eq.s32.totalorder %s8395_s22, 1  ;;  %p156_p3 = scmp.eq.s32.totalorder %s6705_s23, 1 }
   0x9   : > { %p8404_p4 = por %p10496_p1, %p42_p0  ;;  %p6706_p5 = scmp.ge.s32.totalorder %s8333_s21, 1 }
   0xa   : > { %p8409_p6 = por %p156_p3, %p42_p0  ;;  %p163_p7 = scmp.lt.s32.totalorder %s8333_s21, 3 }
   0xb   : > { %s10506_s24 = scalar_select %p8404_p4, 1, 0 }
   0xc   : > { %s10507_s25 = scalar_select %p8409_p6, 1, 0 }
   0xd   : > { %p8414_p8 = pnand %p6706_p5, %p163_p7  ;;  %s8335_s27 = smov [#allocation6]  }
   0xe   : > { %s175_s28 = sshll.u32 %s8335_s27, 4  ;;  %s8336_s30 = smov [#allocation8]   ;;  %s176_s28 = int_to_ptr.vmem [resolvable:$true] %s175_s28 }
   0xf   : > { %s10508_s26 = scalar_select %p8414_p8, 1, 0 }
  0x10   : > { %p7970_p9 = pneg %p8414_p8  ;;  %s191_s6 = sshll.u32 %s8336_s30, 4  ;;  %s192_s6 = int_to_ptr.vmem [resolvable:$true] %s191_s6 }
  0x11   : > { %s8196_s7 = scalar_lea.vmem %s176_s28, 1024  ;;  %p8204_p5 = scmp.lt.s32.totalorder %s176_s28, %s176_s28 }
  0x12   : > { %p8423_p11 = pnand %p7970_p9, %p10496_p1  ;;  %p8197_p13 = scmp.ne.s32.totalorder %s176_s28, %s8196_s7 }
  0x13   : > { %p8205_p7 = scmp.lt.s32.totalorder %s8196_s7, %s8196_s7 }
  0x14   : > { %p8187_p12 = pneg %p8423_p11 }
  0x15   : > { %p8206_p10 = por %p8205_p7, %p8204_p5 }
  0x16   : > { %p8199_p0 = pnand %p8197_p13, %p8187_p12 }
  0x18   : > { %p8200_p3 = pneg %p8199_p0 }
  0x1a   : > { %p8207_p9 = pnand %p8206_p10, %p8200_p3 }
  0x1c   : > { %8210 = shalt.err (!%p8207_p9)
}
  0x1d   : > { %s10497_s8 = smov 64   ;;  %s8338_s9 = smov 4  }
  0x1e   : > { %7973 = dma.hbm_to_vmem [thread:$0]  (!%p8423_p11), %s10491_s1, 1024, %s176_s28, [#allocation7], %s10497_s8, %s10497_s8, %s8338_s9  }
  0x1f   : > { %s8222_s12 = scalar_lea.vmem %s192_s6, 9216  ;;  %p8230_p10 = scmp.lt.s32.totalorder %s192_s6, %s192_s6 }
  0x20   : > { %p8223_p13 = scmp.ne.s32.totalorder %s192_s6, %s8222_s12  ;;  %p8231_p3 = scmp.lt.s32.totalorder %s8222_s12, %s8222_s12 }
  0x22   : > { %p8225_p0 = pnand %p8223_p13, %p8187_p12  ;;  %p8232_p7 = por %p8231_p3, %p8230_p10 }
  0x24   : > { %p8226_p5 = pneg %p8225_p0 }
  0x26   : > { %p8233_p9 = pnand %p8232_p7, %p8226_p5 }
  0x28   : > { %8236 = shalt.err (!%p8233_p9)
}
  0x29   : > { %7976 = dma.hbm_to_vmem [thread:$0]  (!%p8423_p11), %s10493_s3, 9216, %s192_s6, [#allocation7], %s10497_s8, %s10497_s8, %s8338_s9  }
  0x2a   : > { %s8452_s15 = sadd.s32 1, %s8333_s21   ;;  %s29_s16 = sadd.s32 1, %s8329_s20 }
  0x2b   : > { %s26_s17 = ssub.s32 %s8333_s21, %s8452_s15  ;;  %p36_p12 = scmp.ne.s32.totalorder %s8329_s20, %s8325_s19 }
  0x2c   : > { %p27_p13 = scmp.eq.s32.totalorder %s26_s17, 0  ;;  %p37_p0 = scmp.eq.s32.totalorder %s8333_s21, 0 }
  0x2d   : > { %p8462_p5 = por %p150_p2, %p36_p12  ;;  %p7987_p10 = scmp.lt.s32.totalorder %s8333_s21, 2 }
  0x2e   : > { %s8468_s27 = scalar_select %p27_p13, %s8329_s20, %s29_s16  }
  0x2f   : > { %s10510_s23 = scalar_select %p8462_p5, 1, 0 }
  0x30   : > { %p38_p3 = por %p37_p0, %p36_p12  ;;  %s208_s28 = sand.u32 1, %s8329_s20  }
  0x31   : > { %s6710_s29 = sshll.u32 %s208_s28, 7  ;;  %s7077_s30 = sshll.u32 %s8333_s21, 11 }
  0x32   : > { %s8475_s10 = scalar_lea.hbm %s10490_s0, %s7077_s30  ;;  %s212_s11 = scalar_lea.vmem [#allocation3], %s6710_s29 }
  0x33   : > { %s219_s12 = sshll.u32 %s212_s11, 4  ;;  %p8479_p2 = pnand %p7987_p10, %p38_p3  ;;  %s8477_s12 = int_to_ptr.vmem [resolvable:$true] %s219_s12 }
  0x34   : > { %s8483_s14 = scalar_lea.sflag [#allocation4], %s208_s28  ;;  %s8237_s16 = scalar_lea.hbm %s8475_s10, 2048 }
  0x35   : > { %p8238_p11 = scmp.ne.s32.totalorder %s8475_s10, %s8237_s16  ;;  %p8239_p7 = pneg %p8479_p2 }
  0x36   : > { %s8242_s29 = scalar_lea.hbm %s10490_s0, 4096  ;;  %p8243_p13 = scmp.lt.s32.totalorder %s8475_s10, %s10490_s0 }
  0x37   : > { %p8240_p9 = pnand %p8239_p7, %p8238_p11  ;;  %p8244_p0 = scmp.lt.s32.totalorder %s8242_s29, %s8237_s16 }
  0x39   : > { %p8241_p12 = pneg %p8240_p9  ;;  %p8245_p10 = por %p8244_p0, %p8243_p13 }
  0x3b   : > { %p8246_p3 = pnand %p8245_p10, %p8241_p12 }
  0x3d   : > { %8249 = shalt.err (!%p8246_p3)
}
  0x3e   : > { %s8250_s28 = scalar_lea.vmem %s8477_s12, 2048  ;;  %s8339_s11 = smov [#allocation3]  }
  0x3f   : > { %p8251_p1 = scmp.ne.s32.totalorder %s8477_s12, %s8250_s28  ;;  %s8255_s8 = sshll.u32 %s8339_s11, 4  ;;  %s8256_s8 = int_to_ptr.vmem [resolvable:$false] %s8255_s8 }
  0x40   : > { %s8257_s17 = scalar_lea.vmem %s8256_s8, 4096  ;;  %p8258_p9 = scmp.lt.s32.totalorder %s8477_s12, %s8256_s8 }
  0x41   : > { %p8253_p6 = pnand %p8251_p1, %p8239_p7  ;;  %p8259_p5 = scmp.lt.s32.totalorder %s8257_s17, %s8250_s28 }
  0x43   : > { %p8254_p11 = pneg %p8253_p6  ;;  %p8260_p4 = por %p8259_p5, %p8258_p9 }
  0x45   : > { %p8261_p8 = pnand %p8260_p4, %p8254_p11 }
  0x47   : > { %8264 = shalt.err (!%p8261_p8)
}
  0x48   : > { %s10512_s16 = smov 64   ;;  %p10513_p1 = scmp.ne.s32.totalorder %s10508_s26, 0 }
  0x49   : > { %7980 = dma.hbm_to_vmem [thread:$0]  (!%p8479_p2), %s8475_s10, 2048, %s8477_s12, %s8483_s14, %s10512_s16, %s10512_s16, %s8338_s9  }
  0x4a   : > { %231 = sbr.rel (%p10513_p1) target bundleno = 962 (0x3c2), region = 40 }
  0x4f   : > { %s8510_s30 = sand.u32 1, %s8325_s19   ;;  %p10514_p4 = scmp.ne.s32.totalorder %s10506_s24, 0 }
  0x50   : > { %s6714_s8 = sshll.u32 %s8510_s30, 7  ;;  %s234_s29 = scalar_lea.sflag [#allocation4], %s8510_s30 }
  0x51   : > { %s8516_s13 = scalar_lea.vmem [#allocation3], %s6714_s8 }
  0x52   : > { %8308 = dma.done.wait (%p10514_p4), %s234_s29, 2048  }
  0x53   : > { %8310 = vsyncadd (%p10514_p4), %s234_s29, 4294965248  ;;  %p10515_p6 = scmp.eq.s32.totalorder %s8395_s22, 0 }
  0x55   : > { %8312 = dma.done.wait (%p10515_p6), [#allocation7], 10240   ;;  %p10516_p8 = pmov %p10515_p6 }
  0x56   : > { %v8340_v0 = vmov 0   ;;  %v8030_v1 = vld [vmem:[#allocation6 + $0x38] sm:$0xff]   ;;  %v8031_v2 = vld [vmem:[#allocation6 + $0x30] sm:$0xff]   ;;  %v8032_v3 = vld [vmem:[#allocation6 + $0x28] sm:$0xff]   ;;  %vm985_vm0 = vsmask.f32 4368 }
  0x57   : > { %8314 = vsyncadd (%p10516_p8), [#allocation7], 4294957056  ;;  %289 = vst [vmem:[#allocation2 + $0x24] sm:$0xf] %v8340_v0  ;;  %7478 = vmatprep.subr.bf16.mxu0 %v8030_v1  ;;  %v8033_v4 = vld [vmem:[#allocation6 + $0x20] sm:$0xff]   ;;  %v8034_v6 = vld [vmem:[#allocation6 + $0x18] sm:$0xff]  }
  0x58   : > { %273 = vst [vmem:[#allocation2] sm:$0xf] %v8340_v0  ;;  %274 = vst [vmem:[#allocation2 + $0x4] sm:$0xf] %v8340_v0  ;;  %7479 = vmatpush3.bf16.msra.mxu0 %v8030_v1  ;;  %v8038_v5 = vld [vmem:[%s8516_s13] sm:$0xff]   ;;  %v8035_v7 = vld [vmem:[#allocation6 + $0x10] sm:$0xff]  }
  0x59   : > { %275 = vst [vmem:[#allocation2 + $0x8] sm:$0xf] %v8340_v0  ;;  %282 = vst [vmem:[#allocation2 + $0x10] sm:$0xf] %v8340_v0  ;;  %7480 = vmatprep.subr.bf16.mxu0 %v8031_v2  ;;  %7494 = vmatprep.mubr.bf16.mxu0 %v8038_v5  ;;  %v8036_v8 = vld [vmem:[#allocation6 + $0x8] sm:$0xff]   ;;  %v8037_v9 = vld [vmem:[#allocation6] sm:$0xff]  }
  0x5a   : > { %283 = vst [vmem:[#allocation2 + $0x14] sm:$0xf] %v8340_v0  ;;  %284 = vst [vmem:[#allocation2 + $0x18] sm:$0xf] %v8340_v0  ;;  %v8054_v10 = vld [vmem:[#allocation8 + $0x78] sm:$0xff]   ;;  %v8055_v11 = vld [vmem:[#allocation8 + $0x70] sm:$0xff]  }
  0x5b   : > { %288 = vst [vmem:[#allocation2 + $0x20] sm:$0xf] %v8340_v0  ;;  %290 = vst [vmem:[#allocation2 + $0x28] sm:$0xf] %v8340_v0  ;;  %7526 = vmatprep.subr.bf16.mxu1 %v8054_v10  ;;  %v8056_v12 = vld [vmem:[#allocation8 + $0x68] sm:$0xff]   ;;  %v8057_v13 = vld [vmem:[#allocation8 + $0x38] sm:$0xff]  }
  0x5c   : > { %294 = vst [vmem:[#allocation2 + $0x30] sm:$0xf] %v8340_v0  ;;  %295 = vst [vmem:[#allocation2 + $0x34] sm:$0xf] %v8340_v0  ;;  %7481 = vmatpush3.bf16.msra.mxu0 %v8031_v2  ;;  %7527 = vmatpush3.bf16.msra.mxu1 %v8054_v10  ;;  %v8039_v14 = vld [vmem:[%s8516_s13 + $0x8] sm:$0xff]   ;;  %v8040_v15 = vld [vmem:[%s8516_s13 + $0x10] sm:$0xff]  }
  0x5d   : > { %296 = vst [vmem:[#allocation2 + $0x38] sm:$0xf] %v8340_v0  ;;  %300 = vst [vmem:[#allocation2 + $0x40] sm:$0xf] %v8340_v0  ;;  %7482 = vmatprep.subr.bf16.mxu0 %v8032_v3  ;;  %7528 = vmatprep.subr.bf16.mxu1 %v8055_v11  ;;  %v8041_v16 = vld [vmem:[%s8516_s13 + $0x18] sm:$0xff]   ;;  %v8042_v17 = vld [vmem:[%s8516_s13 + $0x20] sm:$0xff]  }
  0x5e   : > { %301 = vst [vmem:[#allocation2 + $0x44] sm:$0xf] %v8340_v0  ;;  %302 = vst [vmem:[#allocation2 + $0x48] sm:$0xf] %v8340_v0  ;;  %v8043_v18 = vld [vmem:[%s8516_s13 + $0x28] sm:$0xff]   ;;  %v8044_v19 = vld [vmem:[%s8516_s13 + $0x30] sm:$0xff]  }
  0x5f   : > { %306 = vst [vmem:[#allocation2 + $0x50] sm:$0xf] %v8340_v0  ;;  %307 = vst [vmem:[#allocation2 + $0x54] sm:$0xf] %v8340_v0  ;;  %v8045_v20 = vld [vmem:[%s8516_s13 + $0x38] sm:$0xff]   ;;  %v8046_v21 = vld [vmem:[%s8516_s13 + $0x40] sm:$0xff]  }
  0x60   : > { %308 = vst [vmem:[#allocation2 + $0x58] sm:$0xf] %v8340_v0  ;;  %312 = vst [vmem:[#allocation2 + $0x60] sm:$0xf] %v8340_v0  ;;  %7483 = vmatpush3.bf16.msra.mxu0 %v8032_v3  ;;  %7529 = vmatpush3.bf16.msra.mxu1 %v8055_v11  ;;  %v8047_v22 = vld [vmem:[%s8516_s13 + $0x48] sm:$0xff]   ;;  %v8048_v23 = vld [vmem:[%s8516_s13 + $0x50] sm:$0xff]  }
  0x61   : > { %313 = vst [vmem:[#allocation2 + $0x64] sm:$0xf] %v8340_v0  ;;  %314 = vst [vmem:[#allocation2 + $0x68] sm:$0xf] %v8340_v0  ;;  %7484 = vmatprep.subr.bf16.mxu0 %v8033_v4  ;;  %7530 = vmatprep.subr.bf16.mxu1 %v8056_v12  ;;  %v8049_v24 = vld [vmem:[%s8516_s13 + $0x58] sm:$0xff]   ;;  %v8050_v25 = vld [vmem:[%s8516_s13 + $0x60] sm:$0xff]  }
  0x62   : > { %318 = vst [vmem:[#allocation2 + $0x70] sm:$0xf] %v8340_v0  ;;  %319 = vst [vmem:[#allocation2 + $0x74] sm:$0xf] %v8340_v0  ;;  %v8051_v26 = vld [vmem:[%s8516_s13 + $0x68] sm:$0xff]   ;;  %v8052_v27 = vld [vmem:[%s8516_s13 + $0x70] sm:$0xff]  }
  0x63   : > { %320 = vst [vmem:[#allocation2 + $0x78] sm:$0xf] %v8340_v0  ;;  %324 = vst [vmem:[#allocation2 + $0x80] sm:$0xf] %v8340_v0  ;;  %v8053_v28 = vld [vmem:[%s8516_s13 + $0x78] sm:$0xff]   ;;  %v8059_v29 = vld [vmem:[#allocation8 + $0x30] sm:$0xff]  }
  0x64   : > { %325 = vst [vmem:[#allocation2 + $0x84] sm:$0xf] %v8340_v0  ;;  %326 = vst [vmem:[#allocation2 + $0x88] sm:$0xf] %v8340_v0  ;;  %7485 = vmatpush3.bf16.msra.mxu0 %v8033_v4  ;;  %7531 = vmatpush3.bf16.msra.mxu1 %v8056_v12  ;;  %v8058_v30 = vld [vmem:[#allocation8 + $0x60] sm:$0xff]   ;;  %v8061_v31 = vld [vmem:[#allocation8 + $0x28] sm:$0xff]  }
  0x65   : > { %330 = vst [vmem:[#allocation2 + $0x90] sm:$0xf] %v8340_v0  ;;  %331 = vst [vmem:[#allocation2 + $0x94] sm:$0xf] %v8340_v0  ;;  %7486 = vmatprep.subr.bf16.mxu0 %v8034_v6  ;;  %7532 = vmatprep.subr.bf16.mxu1 %v8058_v30  ;;  %v8060_v32 = vld [vmem:[#allocation8 + $0x58] sm:$0xff]   ;;  %v8063_v33 = vld [vmem:[#allocation8 + $0x20] sm:$0xff]  }
  0x66   : > { %332 = vst [vmem:[#allocation2 + $0x98] sm:$0xf] %v8340_v0  ;;  %336 = vst [vmem:[#allocation2 + $0xa0] sm:$0xf] %v8340_v0  ;;  %v8062_v34 = vld [vmem:[#allocation8 + $0x50] sm:$0xff]   ;;  %v8065_v35 = vld [vmem:[#allocation8 + $0x18] sm:$0xff]  }
  0x67   : > { %337 = vst [vmem:[#allocation2 + $0xa4] sm:$0xf] %v8340_v0  ;;  %338 = vst [vmem:[#allocation2 + $0xa8] sm:$0xf] %v8340_v0  ;;  %v8064_v36 = vld [vmem:[#allocation8 + $0x48] sm:$0xff]   ;;  %v8067_v37 = vld [vmem:[#allocation8 + $0x10] sm:$0xff]  }
  0x68   : > { %342 = vst [vmem:[#allocation2 + $0xb0] sm:$0xf] %v8340_v0  ;;  %343 = vst [vmem:[#allocation2 + $0xb4] sm:$0xf] %v8340_v0  ;;  %7487 = vmatpush3.bf16.msra.mxu0 %v8034_v6  ;;  %7533 = vmatpush3.bf16.msra.mxu1 %v8058_v30  ;;  %v8066_v38 = vld [vmem:[#allocation8 + $0x40] sm:$0xff]   ;;  %v8069_v44 = vld [vmem:[#allocation8 + $0x8] sm:$0xff]  }
  0x69   : > { %344 = vst [vmem:[#allocation2 + $0xb8] sm:$0xf] %v8340_v0  ;;  %348 = vst [vmem:[#allocation2 + $0xc0] sm:$0xf] %v8340_v0  ;;  %7488 = vmatprep.subr.bf16.mxu0 %v8035_v7  ;;  %7534 = vmatprep.subr.bf16.mxu1 %v8060_v32  ;;  %v938_v39 = vld [vmem:[#allocation2 + $0x4] sm:$0xf] }
  0x6a   : > { %349 = vst [vmem:[#allocation2 + $0xc4] sm:$0xf] %v8340_v0  ;;  %350 = vst [vmem:[#allocation2 + $0xc8] sm:$0xf] %v8340_v0  ;;  %v939_v40 = vld [vmem:[#allocation2 + $0x8] sm:$0xf] }
  0x6b   : > { %354 = vst [vmem:[#allocation2 + $0xd0] sm:$0xf] %v8340_v0  ;;  %355 = vst [vmem:[#allocation2 + $0xd4] sm:$0xf] %v8340_v0  ;;  %v993_v41 = vshrl.u32 %v938_v39, 16  ;;  %v1002_v42 = vshrl.u32 %v939_v40, 16  ;;  %v6791_v43 = vcombine.low %v938_v39, %v939_v40 }
  0x6c   : > { %356 = vst [vmem:[#allocation2 + $0xd8] sm:$0xf] %v8340_v0  ;;  %360 = vst [vmem:[#allocation2 + $0xe0] sm:$0xf] %v8340_v0  ;;  %7489 = vmatpush3.bf16.msra.mxu0 %v8035_v7  ;;  %7535 = vmatpush3.bf16.msra.mxu1 %v8060_v32  ;;  %v996_v46 = vshll.u32 %v938_v39, 16  ;;  %v1005_v48 = vshll.u32 %v939_v40, 16 }
  0x6d   : > { %361 = vst [vmem:[#allocation2 + $0xe4] sm:$0xf] %v8340_v0  ;;  %362 = vst [vmem:[#allocation2 + $0xe8] sm:$0xf] %v8340_v0  ;;  %7490 = vmatprep.subr.bf16.mxu0 %v8036_v8  ;;  %7536 = vmatprep.subr.bf16.mxu1 %v8062_v34  ;;  %v995_v45 = vrot.slane %v993_v41, 7  ;;  %v1004_v47 = vrot.slane %v1002_v42, 7 }
  0x6e   : > { %366 = vst [vmem:[#allocation2 + $0xf0] sm:$0xf] %v8340_v0  ;;  %367 = vst [vmem:[#allocation2 + $0xf4] sm:$0xf] %v8340_v0  ;;  %7542 = vmatprep.mubr.bf16.mxu1 %v6791_v43  ;;  %v937_v49 = vld [vmem:[#allocation2] sm:$0x8] }
  0x6f   : > { %368 = vst [vmem:[#allocation2 + $0xf8] sm:$0xf] %v8340_v0  ;;  %372 = vst [vmem:[#allocation2 + $0x100] sm:$0xf] %v8340_v0  ;;  %v998_v50 = vor.u32 %v996_v46, %v995_v45  ;;  %v1000_v51 = vrot.slane %v995_v45, 4  ;;  %v1007_v52 = vor.u32 %v1005_v48, %v1004_v47  ;;  %v988_v53 = vshrl.u32 %v937_v49, 16 }
  0x70   : > { %373 = vst [vmem:[#allocation2 + $0x104] sm:$0xf] %v8340_v0  ;;  %374 = vst [vmem:[#allocation2 + $0x108] sm:$0xf] %v8340_v0  ;;  %7491 = vmatpush3.bf16.msra.mxu0 %v8036_v8  ;;  %7537 = vmatpush3.bf16.msra.mxu1 %v8062_v34  ;;  %v8073_v54 = vld [vmem:[#allocation8] sm:$0xff]   ;;  %v8550_v59 = vld [vmem:[#allocation8 + $0xb8] sm:$0xff]  }
  0x71   : > { %378 = vst [vmem:[#allocation2 + $0x110] sm:$0xf] %v8340_v0  ;;  %379 = vst [vmem:[#allocation2 + $0x114] sm:$0xf] %v8340_v0  ;;  %7492 = vmatprep.subr.bf16.mxu0 %v8037_v9  ;;  %7538 = vmatprep.subr.bf16.mxu1 %v8064_v36  ;;  %vm277_vm1 = vsmask.f32 256 }
  0x72   : > { %380 = vst [vmem:[#allocation2 + $0x118] sm:$0xf] %v8340_v0  ;;  %v6775_v55 = vrot.slane %v988_v53, 11  ;;  %vm8542_vm2 = vmor %vm277_vm1, %vm985_vm0  ;;  %vm276_vm3 = vcmask 1040384   ;;  %v10519_v61 = vmov 0  ;;  %v8559_v0 = vld [vmem:[#allocation8 + $0xf8] sm:$0xff]  }
  0x73   : > { %v1008_v58 = vsel %vm8542_vm2, %v1000_v51, %v1007_v52  ;;  %vm8553_vm4 = vmand %vm276_vm3, %vm277_vm1  ;;  %v285_v62 = vld [vmem:[#allocation2 + $0x1c] sm:$0x1]  ;;  %v291_v1 = vld [vmem:[#allocation2 + $0x2c] sm:$0x1]  ;;  %vm1998_vm5 = vsmask.f32 3328 }
  0x74   : > { %7493 = vmatpush3.bf16.msra.mxu0 %v8037_v9  ;;  %7539 = vmatpush3.bf16.msra.mxu1 %v8064_v36  ;;  %v999_v57 = vsel %vm8542_vm2, %v6775_v55, %v998_v50  ;;  %v10520_v61 = vsel %vm8553_vm4, 4294967295, %v10519_v61  ;;  %v286_v63 = vsel %vm8553_vm4, 0, %v285_v62  ;;  %v292_v2 = vsel %vm8553_vm4, 0, %v291_v1  ;;  %v279_v3 = vld [vmem:[#allocation2 + $0xc] sm:$0x1]  ;;  %s10362_s12 = scalar_lea.vmem [#allocation9], %s6714_s8 }
  0x75   : > { %7574 = vmatprep.subr.bf16.mxu0 %v8057_v13  ;;  %7540 = vmatprep.subr.bf16.mxu1 %v8066_v38  ;;  %v6815_v60 = vcombine.low %v999_v57, %v1008_v58  ;;  %10521 = vst [vmem:[#allocation13_spill] sm:$0xff] %v10520_v61  ;;  %287 = vst [vmem:[#allocation2 + $0x1c] sm:$0x1] %v286_v63  ;;  %v280_v4 = vsel %vm8553_vm4, 0, %v279_v3  ;;  %v303_v5 = vld [vmem:[#allocation2 + $0x4c] sm:$0x1] }
  0x76   : > { %293 = vst [vmem:[#allocation2 + $0x2c] sm:$0x1] %v292_v2  ;;  %281 = vst [vmem:[#allocation2 + $0xc] sm:$0x1] %v280_v4  ;;  %v304_v6 = vsel %vm8553_vm4, 0, %v303_v5  ;;  %s7142_s14 = sshll.u32 %s8395_s22, 11 }
  0x77   : > { %7495 = vmatmul.mubr.bf16.vlgmr.msra.gmra.mxu0 %v8039_v14  ;;  %v297_v7 = vld [vmem:[#allocation2 + $0x3c] sm:$0x1]  ;;  %305 = vst [vmem:[#allocation2 + $0x4c] sm:$0x1] %v304_v6  ;;  %v940_v9 = vld [vmem:[#allocation2 + $0x10] sm:$0x8]  ;;  %s10443_s11 = scalar_lea.hbm %s10495_s5, %s7142_s14 }
  0x78   : > { %7498 = vmatprep.mubr.bf16.mxu0 %v8040_v15  ;;  %7575 = vmatpush3.bf16.msra.mxu0 %v8057_v13  ;;  %v298_v8 = vsel %vm8553_vm4, 0, %v297_v7  ;;  %v943_v10 = vld [vmem:[#allocation2 + $0x20] sm:$0x8]  ;;  %v1010_v12 = vshrl.u32 %v940_v9, 16  ;;  %v946_v14 = vld [vmem:[#allocation2 + $0x30] sm:$0x8] }
  0x79   : > { %7576 = vmatprep.subr.bf16.mxu0 %v8059_v29  ;;  %7541 = vmatpush3.bf16.msra.mxu1 %v8066_v38  ;;  %299 = vst [vmem:[#allocation2 + $0x3c] sm:$0x1] %v298_v8  ;;  %v949_v11 = vld [vmem:[#allocation2 + $0x40] sm:$0x8]  ;;  %v1032_v13 = vshrl.u32 %v943_v10, 16  ;;  %v1054_v34 = vshrl.u32 %v946_v14, 16 }
  0x7a   : > { %7622 = vmatprep.subr.bf16.mxu1 %v8550_v59  ;;  %v955_v15 = vld [vmem:[#allocation2 + $0x60] sm:$0x8]  ;;  %v8574_v32 = vrot.slane %v1010_v12, 11  ;;  %v970_v38 = vld [vmem:[#allocation2 + $0xb0] sm:$0x8]  ;;  %s6613_s6 = sshll.u32 %s10362_s12, 4  ;;  %s10445_s6 = int_to_ptr.vmem [resolvable:$true] %s6613_s6 }
  0x7b   : > { %v973_v39 = vld [vmem:[#allocation2 + $0xc0] sm:$0x8]  ;;  %vm1999_vm6 = vsmask.f32 7440  ;;  %v8582_v48 = vrot.slane %v1054_v34, 11  ;;  %v1230_v50 = vshrl.u32 %v970_v38, 16 }
  0x7c   : > { %7577 = vmatpush3.bf16.msra.mxu0 %v8059_v29  ;;  %v1252_v51 = vshrl.u32 %v973_v39, 16  ;;  %v1955_v53 = vld [vmem:[#allocation2 + $0x1c] sm:$0x1]  ;;  %v979_v55 = vld [vmem:[#allocation2 + $0xe0] sm:$0x8]  ;;  %vm8630_vm7 = vmor %vm1998_vm5, %vm1999_vm6  ;;  %s6600_s17 = scalar_lea.sflag [#allocation5], %s8510_s30 }
  0x7d   : > { %7578 = vmatprep.subr.bf16.mxu0 %v8061_v31  ;;  %v1952_v52 = vld [vmem:[#allocation2 + $0xc] sm:$0x1]  ;;  %v2707_v57 = vld [vmem:[#allocation2 + $0x10] sm:$0x8]  ;;  %v8597_v2 = vld [vmem:[%s10492_s2] ss:$0 sm:$0xff] }
  0x7e   : > { %v982_v1 = vld [vmem:[#allocation2 + $0xf0] sm:$0x8]  ;;  %v2021_v6 = vshll.u32 %v1952_v52, 16  ;;  %v2710_v7 = vld [vmem:[#allocation2 + $0x20] sm:$0x8]  ;;  %v1296_v10 = vshrl.u32 %v979_v55, 16 }
  0x7f   : > { %7499 = vmatmul.mubr.bf16.gmra.mxu0 %v8041_v16  ;;  %v315_v16 = vld [vmem:[#allocation2 + $0x6c] sm:$0x1]  ;;  %v8604_v14 = vrot.slane %v1230_v50, 11  ;;  %v2722_v50 = vld [vmem:[#allocation2 + $0x60] sm:$0x8]  ;;  %s8265_s16 = scalar_lea.vmem %s10445_s6, 2048 }
  0x80   : > { %7502 = vmatprep.mubr.bf16.mxu0 %v8042_v17  ;;  %7579 = vmatpush3.bf16.msra.mxu0 %v8061_v31  ;;  %v1076_v17 = vshrl.u32 %v949_v11, 16  ;;  %v327_v8 = vld [vmem:[#allocation2 + $0x8c] sm:$0x1]  ;;  %v2756_v11 = vshrl.u32 %v2707_v57, 16  ;;  %p8266_p5 = scmp.ne.s32.totalorder %s10445_s6, %s8265_s16  ;;  %p10671_p2 = scmp.ne.s32.totalorder %s10510_s23, 0 }
  0x81   : > { %7580 = vmatprep.subr.bf16.mxu0 %v8063_v33  ;;  %v1958_v12 = vld [vmem:[#allocation2 + $0x2c] sm:$0x1]  ;;  %s8341_s22 = smov [#allocation9]  }
  0x82   : > { %v8578_v36 = vrot.slane %v1076_v17, 11  ;;  %v2045_v17 = vshll.u32 %v1955_v53, 16  ;;  %v8621_v34 = vrot.slane %v2756_v11, 11  ;;  %p8267_p7 = pnand %p8266_p5, %p10671_p2  ;;  %s8269_s8 = sshll.u32 %s8341_s22, 4  ;;  %s8270_s8 = int_to_ptr.vmem [resolvable:$false] %s8269_s8 }
  0x83   : > { %s8271_s29 = scalar_lea.vmem %s8270_s8, 4096  ;;  %p8272_p13 = scmp.lt.s32.totalorder %s10445_s6, %s8270_s8 }
  0x84   : > { %7581 = vmatpush3.bf16.msra.mxu0 %v8063_v33  ;;  %v8576_v33 = vrot.slane %v1032_v13, 11  ;;  %v328_v13 = vsel %vm8553_vm4, 0, %v327_v8  ;;  %v8625_v38 = vrot.slane %v2045_v17, 5  ;;  %v2725_v8 = vld [vmem:[#allocation2 + $0x70] sm:$0x8]  ;;  %p8268_p12 = pneg %p8267_p7  ;;  %p8273_p0 = scmp.lt.s32.totalorder %s8271_s29, %s8265_s16 }
  0x85   : > { %7582 = vmatprep.subr.bf16.mxu0 %v8065_v35  ;;  %329 = vst [vmem:[#allocation2 + $0x8c] sm:$0x1] %v328_v13 }
  0x86   : > { %p8274_p10 = por %p8273_p0, %p8272_p13 }
  0x87   : > { %7503 = vmatmul.mubr.bf16.gmra.mxu0 %v8043_v18  ;;  %v1950_v18 = vld [vmem:[#allocation2 + $0x4] sm:$0xf] }
  0x88   : > { %7506 = vmatprep.mubr.bf16.mxu0 %v8044_v19  ;;  %7583 = vmatpush3.bf16.msra.mxu0 %v8065_v35  ;;  %v1951_v19 = vld [vmem:[#allocation2 + $0x8] sm:$0xf]  ;;  %v2005_v29 = vshll.u32 %v1950_v18, 16  ;;  %v1120_v35 = vshrl.u32 %v955_v15, 16  ;;  %v8606_v15 = vrot.slane %v1252_v51, 11  ;;  %p8275_p3 = pnand %p8274_p10, %p8268_p12 }
  0x89   : > { %7584 = vmatprep.subr.bf16.mxu0 %v8067_v37  ;;  %v2011_v30 = vshll.u32 %v1951_v19, 16  ;;  %v2015_v31 = vshrl.u32 %v1951_v19, 16  ;;  %v2778_v19 = vshrl.u32 %v2710_v7, 16 }
  0x8a   : > { %v2007_v45 = vrot.slane %v2005_v29, 5  ;;  %v8584_v49 = vrot.slane %v1120_v35, 11 }
  0x8b   : > { %v8580_v46 = vrot.slane %v2011_v30, 5  ;;  %v2017_v47 = vrot.slane %v2015_v31, 4  ;;  %v8619_v31 = vrot.slane %v1296_v10, 11  ;;  %v8644_v55 = vrot.slane %v2778_v19, 11 }
  0x8c   : > { %7585 = vmatpush3.bf16.msra.mxu0 %v8067_v37 }
  0x8d   : > { %7586 = vmatprep.subr.bf16.mxu0 %v8069_v44  ;;  %v2018_v5 = vor.u32 %v2017_v47, %v8580_v46  ;;  %v2719_v47 = vld [vmem:[#allocation2 + $0x50] sm:$0x8] }
  0x8e   : > { %v2844_v13 = vshrl.u32 %v2719_v47, 16 }
  0x8f   : > { %7507 = vmatmul.mubr.bf16.gmra.mxu0 %v8045_v20  ;;  %v316_v20 = vsel %vm8553_vm4, 0, %v315_v16  ;;  %v1318_v16 = vshrl.u32 %v982_v1, 16 }
  0x90   : > { %7510 = vmatprep.mubr.bf16.mxu0 %v8046_v21  ;;  %7587 = vmatpush3.bf16.msra.mxu0 %v8069_v44  ;;  %v952_v21 = vld [vmem:[#allocation2 + $0x50] sm:$0x8]  ;;  %317 = vst [vmem:[#allocation2 + $0x6c] sm:$0x1] %v316_v20  ;;  %v8657_v47 = vrot.slane %v2844_v13, 11 }
  0x91   : > { %7588 = vmatprep.subr.bf16.mxu0 %v8073_v54  ;;  %v1098_v37 = vshrl.u32 %v952_v21, 16  ;;  %v2713_v20 = vld [vmem:[#allocation2 + $0x30] sm:$0x8]  ;;  %v2716_v21 = vld [vmem:[#allocation2 + $0x40] sm:$0x8] }
  0x92   : > { %v2800_v39 = vshrl.u32 %v2713_v20, 16 }
  0x93   : > { %v8586_v58 = vrot.slane %v1098_v37, 11  ;;  %v8623_v37 = vrot.slane %v1318_v16, 11  ;;  %v2866_v16 = vshrl.u32 %v2722_v50, 16 }
  0x94   : > { %7589 = vmatpush3.bf16.msra.mxu0 %v8073_v54  ;;  %v976_v54 = vld [vmem:[#allocation2 + $0xd0] sm:$0x8]  ;;  %v8647_v11 = vrot.slane %v2800_v39, 11 }
  0x95   : > { %7670 = vmatprep.subr.bf16.mxu0 %v8559_v0  ;;  %v1274_v9 = vshrl.u32 %v976_v54, 16  ;;  %v8659_v50 = vrot.slane %v2866_v16, 11  ;;  %v333_v16 = vld [vmem:[#allocation2 + $0x9c] sm:$0x1] }
  0x97   : > { %7511 = vmatmul.mubr.bf16.gmra.mxu0 %v8047_v22  ;;  %v961_v22 = vld [vmem:[#allocation2 + $0x80] sm:$0x8]  ;;  %v8617_v30 = vrot.slane %v1274_v9, 11  ;;  %v1970_v1 = vld [vmem:[#allocation2 + $0x6c] sm:$0x1] }
  0x98   : > { %7514 = vmatprep.mubr.bf16.mxu0 %v8048_v23  ;;  %v309_v23 = vld [vmem:[#allocation2 + $0x5c] sm:$0x1]  ;;  %v1164_v41 = vshrl.u32 %v961_v22, 16  ;;  %v2728_v9 = vld [vmem:[#allocation2 + $0x80] sm:$0x8] }
  0x9a   : > { %v8590_v62 = vrot.slane %v1164_v41, 11  ;;  %v2822_v41 = vshrl.u32 %v2716_v21, 16 }
  0x9f   : > { %7515 = vmatmul.mubr.bf16.gmra.mxu0 %v8049_v24  ;;  %v958_v24 = vld [vmem:[#allocation2 + $0x70] sm:$0x8] }
  0xa0   : > { %7518 = vmatprep.mubr.bf16.mxu0 %v8050_v25  ;;  %v967_v25 = vld [vmem:[#allocation2 + $0xa0] sm:$0x8]  ;;  %v1142_v40 = vshrl.u32 %v958_v24, 16 }
  0xa1   : > { %v1208_v43 = vshrl.u32 %v967_v25, 16  ;;  %v8612_v25 = vrot.slane %v2018_v5, 4 }
  0xa3   : > { %v8592_v63 = vrot.slane %v1208_v43, 11 }
  0xa7   : > { %7519 = vmatmul.mubr.bf16.gmra.mxu0 %v8051_v26  ;;  %v310_v26 = vsel %vm8553_vm4, 0, %v309_v23 }
  0xa8   : > { %7522 = vmatprep.mubr.bf16.mxu0 %v8052_v27  ;;  %v964_v27 = vld [vmem:[#allocation2 + $0x90] sm:$0x8]  ;;  %311 = vst [vmem:[#allocation2 + $0x5c] sm:$0x1] %v310_v26  ;;  %v8614_v26 = vrot.slane %v2021_v6, 5 }
  0xa9   : > { %v1186_v42 = vshrl.u32 %v964_v27, 16  ;;  %v2069_v27 = vshll.u32 %v1958_v12, 16  ;;  %v8649_v12 = vrot.slane %v2822_v41, 11 }
  0xaa   : > { %v2024_v53 = vsel %vm8630_vm7, %v8612_v25, %v8614_v26 }
  0xab   : > { %v8599_v3 = vrot.slane %v1186_v42, 11  ;;  %v8642_v54 = vrot.slane %v2069_v27, 5 }
  0xaf   : > { %7523 = vmatmul.mubr.bf16.gmra.mxu0 %v8053_v28  ;;  %v2002_v28 = vshrl.u32 %v1950_v18, 16  ;;  %v321_v18 = vld [vmem:[#allocation2 + $0x7c] sm:$0x1] }
  0xb0   : > { %7590 = vmatprep.mubr.bf16.mxu0 %v6815_v60  ;;  %v8588_v60 = vrot.slane %v1142_v40, 11  ;;  %v322_v22 = vsel %vm8553_vm4, 0, %v321_v18  ;;  %v1964_v40 = vld [vmem:[#allocation2 + $0x4c] sm:$0x1]  ;;  %v1967_v57 = vld [vmem:[#allocation2 + $0x5c] sm:$0x1] }
  0xb1   : > { %v2004_v44 = vrot.slane %v2002_v28, 4  ;;  %v1961_v28 = vld [vmem:[#allocation2 + $0x3c] sm:$0x1]  ;;  %323 = vst [vmem:[#allocation2 + $0x7c] sm:$0x1] %v322_v22  ;;  %v2117_v7 = vshll.u32 %v1964_v40, 16 }
  0xb2   : > { %v1976_v22 = vld [vmem:[#allocation2 + $0x8c] sm:$0x1]  ;;  %v2141_v27 = vshll.u32 %v1967_v57, 16 }
  0xb3   : > { %v2008_v4 = vor.u32 %v2007_v45, %v2004_v44  ;;  %v10522_v44 = vmov 0  ;;  %v2093_v45 = vshll.u32 %v1961_v28, 16  ;;  %v2165_v28 = vshll.u32 %v1970_v1, 16 }
  0xb4   : > { %v10523_v44 = vsel %vm8630_vm7, 4294967295, %v10522_v44 }
  0xb5   : > { %v8610_v24 = vrot.slane %v2008_v4, 4  ;;  %10524 = vst [vmem:[#allocation14_spill] sm:$0xff] %v10523_v44  ;;  %v8652_v20 = vrot.slane %v2093_v45, 5 }
  0xb7   : > { %v2014_v52 = vsel %vm8630_vm7, %v8610_v24, %v8580_v46 }
  0xb8   : > { %v1973_v21 = vld [vmem:[#allocation2 + $0x7c] sm:$0x1] }
  0xb9   : > { %v2189_v45 = vshll.u32 %v1973_v21, 16  ;;  %v334_v21 = vsel %vm8553_vm4, 0, %v333_v16 }
  0xba   : > { %335 = vst [vmem:[#allocation2 + $0x9c] sm:$0x1] %v334_v21 }
 0x137   : > { %v7496_v23 = vpop.f32.mrf.mxu0 }
 0x138   : > { %v626_v29 = vadd.f32 %v7496_v23, %v8597_v2 }
 0x139   : > { %v617_v35 = vpop.f32.mrf.mxu0 }
 0x13a   : > { %v746_v42 = vmax.f32 %v626_v29, 0.0  ;;  %v618_v43 = vadd.f32 %v8597_v2, %v617_v35  ;;  %v2888_v29 = vshrl.u32 %v2725_v8, 16  ;;  %v2910_v35 = vshrl.u32 %v2728_v9, 16 }
 0x13b   : > { %v7497_v51 = vpop.f32.mrf.mxu0  ;;  %v8664_v9 = vrot.slane %v2141_v27, 5 }
 0x13c   : > { %v7080_v4 = vpack.c.bf16 %v746_v42, %v746_v42  ;;  %v744_v5 = vmax.f32 %v618_v43, 0.0  ;;  %v629_v6 = vadd.f32 %v7497_v51, %v8597_v2  ;;  %v8655_v42 = vrot.slane %v2117_v7, 5 }
 0x13d   : > { %v620_v10 = vpop.f32.mrf.mxu0  ;;  %v2213_v51 = vshll.u32 %v1976_v22, 16  ;;  %v8666_v7 = vrot.slane %v2165_v28, 5  ;;  %v8670_v13 = vrot.slane %v2910_v35, 11  ;;  %v8679_v28 = vrot.slane %v2189_v45, 5 }
 0x13e   : > { %907 = vst [vmem:[#allocation2 + $0x24] sm:$0xf] %v7080_v4  ;;  %v7078_v17 = vpack.c.bf16 %v744_v5, %v744_v5  ;;  %v747_v18 = vmax.f32 %v629_v6, 0.0  ;;  %v621_v19 = vadd.f32 %v8597_v2, %v620_v10  ;;  %v339_v4 = vld [vmem:[#allocation2 + $0xac] sm:$0x1]  ;;  %v8668_v10 = vrot.slane %v2888_v29, 11 }
 0x13f   : > { %v7500_v23 = vpop.f32.mrf.mxu0  ;;  %v340_v6 = vsel %vm8553_vm4, 0, %v339_v4  ;;  %10525 = vst [vmem:[#allocation15_spill] sm:$0xff] %v8666_v7  ;;  %10527 = vst [vmem:[#allocation17_spill] sm:$0xff] %v8670_v13  ;;  %v8681_v29 = vrot.slane %v2213_v51, 5  ;;  %v8696_v45 = vcombine.low %v2014_v52, %v2024_v53 }
 0x140   : > { %905 = vst [vmem:[#allocation2 + $0x14] sm:$0xf] %v7078_v17  ;;  %v7081_v39 = vpack.c.bf16 %v747_v18, %v747_v18  ;;  %v745_v40 = vmax.f32 %v621_v19, 0.0  ;;  %v642_v41 = vadd.f32 %v7500_v23, %v8597_v2  ;;  %10526 = vst [vmem:[#allocation16_spill] sm:$0xff] %v8668_v10 }
 0x141   : > { %v633_v43 = vpop.f32.mrf.mxu0  ;;  %341 = vst [vmem:[#allocation2 + $0xac] sm:$0x1] %v340_v6  ;;  %10528 = vst [vmem:[#allocation18_spill] sm:$0xff] %v8679_v28 }
 0x142   : > { %908 = vst [vmem:[#allocation2 + $0x28] sm:$0xf] %v7081_v39  ;;  %v7079_v57 = vpack.c.bf16 %v745_v40, %v745_v40  ;;  %v750_v1 = vmax.f32 %v642_v41, 0.0  ;;  %v634_v5 = vadd.f32 %v8597_v2, %v633_v43  ;;  %10529 = vst [vmem:[#allocation19_spill] sm:$0xff] %v8681_v29 }
 0x143   : > { %v7501_v8 = vpop.f32.mrf.mxu0 }
 0x144   : > { %906 = vst [vmem:[#allocation2 + $0x18] sm:$0xf] %v7079_v57  ;;  %v7084_v17 = vpack.c.bf16 %v750_v1, %v750_v1  ;;  %v748_v18 = vmax.f32 %v634_v5, 0.0  ;;  %v645_v19 = vadd.f32 %v7501_v8, %v8597_v2 }
 0x145   : > { %v636_v22 = vpop.f32.mrf.mxu0  ;;  %v8675_v23 = vld [vmem:[#allocation2 + $0x24] sm:$0xf] }
 0x146   : > { %v8677_v27 = vld [vmem:[#allocation2 + $0x24] sm:$0xf]  ;;  %911 = vst [vmem:[#allocation2 + $0x44] sm:$0xf] %v7084_v17  ;;  %v7082_v35 = vpack.c.bf16 %v748_v18, %v748_v18  ;;  %v751_v39 = vmax.f32 %v645_v19, 0.0  ;;  %v637_v40 = vadd.f32 %v8597_v2, %v636_v22  ;;  %v1037_v41 = vshrl.u32 %v8675_v23, 16 }
 0x147   : > { %v7504_v43 = vpop.f32.mrf.mxu0  ;;  %v941_v4 = vld [vmem:[#allocation2 + $0x14] sm:$0xf]  ;;  %v1040_v57 = vshll.u32 %v8675_v23, 16 }
 0x148   : > { %v8698_v51 = vld [vmem:[#allocation2 + $0x14] sm:$0xf]  ;;  %909 = vst [vmem:[#allocation2 + $0x34] sm:$0xf] %v7082_v35  ;;  %v7085_v5 = vpack.c.bf16 %v751_v39, %v751_v39  ;;  %v749_v6 = vmax.f32 %v637_v40, 0.0  ;;  %v658_v8 = vadd.f32 %v7504_v43, %v8597_v2  ;;  %v1015_v16 = vshrl.u32 %v941_v4, 16 }
 0x149   : > { %v649_v17 = vpop.f32.mrf.mxu0  ;;  %v1018_v18 = vshll.u32 %v941_v4, 16  ;;  %v945_v25 = vld [vmem:[#allocation2 + $0x28] sm:$0xf]  ;;  %v1039_v26 = vrot.slane %v1037_v41, 7 }
 0x14a   : > { %912 = vst [vmem:[#allocation2 + $0x48] sm:$0xf] %v7085_v5  ;;  %v7083_v24 = vpack.c.bf16 %v749_v6, %v749_v6  ;;  %v754_v52 = vmax.f32 %v658_v8, 0.0  ;;  %v650_v53 = vadd.f32 %v8597_v2, %v649_v17  ;;  %v1017_v21 = vrot.slane %v1015_v16, 7  ;;  %v8074_v17 = vld [vmem:[#allocation8 + $0xb0] sm:$0xff]  }
 0x14b   : > { %v7505_v22 = vpop.f32.mrf.mxu0  ;;  %v942_v35 = vld [vmem:[#allocation2 + $0x18] sm:$0xf]  ;;  %v1046_v39 = vshrl.u32 %v945_v25, 16  ;;  %v1049_v40 = vshll.u32 %v945_v25, 16  ;;  %v6793_v43 = vcombine.low %v8675_v23, %v945_v25  ;;  %v1042_v1 = vor.u32 %v1040_v57, %v1039_v26 }
 0x14c   : > { %910 = vst [vmem:[#allocation2 + $0x38] sm:$0xf] %v7083_v24  ;;  %v7088_v61 = vpack.c.bf16 %v754_v52, %v754_v52  ;;  %v752_v41 = vmax.f32 %v650_v53, 0.0  ;;  %v661_v19 = vadd.f32 %v7505_v22, %v8597_v2  ;;  %v1020_v29 = vor.u32 %v1018_v18, %v1017_v21 }
 0x14d   : > { %v652_v46 = vpop.f32.mrf.mxu0  ;;  %v1022_v5 = vrot.slane %v1017_v21, 4  ;;  %v1024_v6 = vshrl.u32 %v942_v35, 16  ;;  %v1027_v8 = vshll.u32 %v942_v35, 16  ;;  %v6792_v13 = vcombine.low %v941_v4, %v942_v35  ;;  %v8708_v23 = vld [vmem:[#allocation2 + $0x44] sm:$0xf]  ;;  %v8077_v35 = vld [vmem:[#allocation8 + $0xa8] sm:$0xff]  }
 0x14e   : > { %915 = vst [vmem:[#allocation2 + $0x64] sm:$0xf] %v7088_v61  ;;  %v7086_v16 = vpack.c.bf16 %v752_v41, %v752_v41  ;;  %v755_v28 = vmax.f32 %v661_v19, 0.0  ;;  %v653_v10 = vadd.f32 %v8597_v2, %v652_v46  ;;  %v1048_v7 = vrot.slane %v1046_v39, 7 }
 0x14f   : > { %v1026_v57 = vrot.slane %v1024_v6, 7  ;;  %7543 = vmatmul.mubr.bf16.vlgmr.msra.gmra.mxu1 %v6792_v13  ;;  %v7508_v25 = vpop.f32.mrf.mxu0  ;;  %v1021_v18 = vsel %vm8542_vm2, %v8574_v32, %v1020_v29  ;;  %v947_v24 = vld [vmem:[#allocation2 + $0x34] sm:$0xf]  ;;  %v1043_v4 = vsel %vm8542_vm2, %v8576_v33, %v1042_v1  ;;  %v1044_v61 = vrot.slane %v1039_v26, 4 }
 0x150   : > { %913 = vst [vmem:[#allocation2 + $0x54] sm:$0xf] %v7086_v16  ;;  %v7089_v19 = vpack.c.bf16 %v755_v28, %v755_v28  ;;  %v753_v52 = vmax.f32 %v653_v10, 0.0  ;;  %7623 = vmatpush3.bf16.msra.mxu1 %v8550_v59  ;;  %v674_v46 = vadd.f32 %v7508_v25, %v8597_v2  ;;  %7546 = vmatprep.mubr.bf16.mxu1 %v6793_v43  ;;  %v1059_v13 = vshrl.u32 %v947_v24, 16 }
 0x151   : > { %v1029_v53 = vor.u32 %v1027_v8, %v1026_v57  ;;  %v665_v21 = vpop.f32.mrf.mxu0  ;;  %7624 = vmatprep.subr.bf16.mxu1 %v8074_v17  ;;  %v1062_v22 = vshll.u32 %v947_v24, 16  ;;  %v1051_v32 = vor.u32 %v1049_v40, %v1048_v7  ;;  %v1081_v29 = vshrl.u32 %v8708_v23, 16  ;;  %v8724_v41 = vld [vmem:[#allocation2 + $0x48] sm:$0xf] }
 0x152   : > { %916 = vst [vmem:[#allocation2 + $0x68] sm:$0xf] %v7089_v19  ;;  %v7087_v33 = vpack.c.bf16 %v753_v52, %v753_v52  ;;  %v758_v1 = vmax.f32 %v674_v46, 0.0  ;;  %v666_v28 = vadd.f32 %v8597_v2, %v665_v21  ;;  %v1061_v10 = vrot.slane %v1059_v13, 7 }
 0x153   : > { %v7509_v26 = vpop.f32.mrf.mxu0  ;;  %v1030_v59 = vsel %vm8542_vm2, %v1022_v5, %v1029_v53  ;;  %v948_v39 = vld [vmem:[#allocation2 + $0x38] sm:$0xf]  ;;  %v1052_v43 = vsel %vm8542_vm2, %v1044_v61, %v1051_v32  ;;  %v8726_v7 = vrot.slane %v1081_v29, 7  ;;  %v1084_v40 = vshll.u32 %v8708_v23, 16  ;;  %v8080_v61 = vld [vmem:[#allocation8 + $0xa0] sm:$0xff]   ;;  %v8090_v29 = vld [vmem:[#allocation8 + $0xf0] sm:$0xff]  }
 0x154   : > { %914 = vst [vmem:[#allocation2 + $0x58] sm:$0xf] %v7087_v33  ;;  %v7092_v6 = vpack.c.bf16 %v758_v1, %v758_v1  ;;  %v756_v8 = vmax.f32 %v666_v28, 0.0  ;;  %v677_v16 = vadd.f32 %v7509_v26, %v8597_v2  ;;  %v6816_v57 = vcombine.low %v1021_v18, %v1030_v59  ;;  %7625 = vmatpush3.bf16.msra.mxu1 %v8074_v17 }
 0x155   : > { %v668_v25 = vpop.f32.mrf.mxu0  ;;  %v1068_v19 = vshrl.u32 %v948_v39, 16  ;;  %v1071_v5 = vshll.u32 %v948_v39, 16  ;;  %v6794_v52 = vcombine.low %v947_v24, %v948_v39  ;;  %v6817_v46 = vcombine.low %v1043_v4, %v1052_v43  ;;  %7626 = vmatprep.subr.bf16.mxu1 %v8077_v35 }
 0x156   : > { %919 = vst [vmem:[#allocation2 + $0x84] sm:$0xf] %v7092_v6  ;;  %v7090_v13 = vpack.c.bf16 %v756_v8, %v756_v8  ;;  %v759_v53 = vmax.f32 %v677_v16, 0.0  ;;  %v669_v21 = vadd.f32 %v8597_v2, %v668_v25  ;;  %7591 = vmatmul.mubr.bf16.vlgmr.msra.gmra.mxu0 %v6816_v57  ;;  %v1090_v32 = vshrl.u32 %v8724_v41, 16  ;;  %v8092_v16 = vld [vmem:[#allocation8 + $0xe8] sm:$0xff]  }
 0x157   : > { %v1070_v33 = vrot.slane %v1068_v19, 7  ;;  %7547 = vmatmul.mubr.bf16.gmra.mxu1 %v6794_v52  ;;  %7594 = vmatprep.mubr.bf16.mxu0 %v6817_v46  ;;  %v7512_v17 = vpop.f32.mrf.mxu0  ;;  %v1093_v18 = vshll.u32 %v8724_v41, 16  ;;  %v6795_v24 = vcombine.low %v8708_v23, %v8724_v41  ;;  %v1064_v4 = vor.u32 %v1062_v22, %v1061_v10  ;;  %v8735_v1 = vld [vmem:[#allocation2 + $0x54] sm:$0xf]  ;;  %v8083_v41 = vld [vmem:[#allocation8 + $0x98] sm:$0xff]  }
 0x158   : > { %917 = vst [vmem:[#allocation2 + $0x74] sm:$0xf] %v7090_v13  ;;  %v7093_v28 = vpack.c.bf16 %v759_v53, %v759_v53  ;;  %v757_v26 = vmax.f32 %v669_v21, 0.0  ;;  %v690_v59 = vadd.f32 %v7512_v17, %v8597_v2  ;;  %v1092_v39 = vrot.slane %v1090_v32, 7  ;;  %7627 = vmatpush3.bf16.msra.mxu1 %v8077_v35  ;;  %7671 = vmatpush3.bf16.msra.mxu0 %v8559_v0 }
 0x159   : > { %7550 = vmatprep.mubr.bf16.mxu1 %v6795_v24  ;;  %v681_v43 = vpop.f32.mrf.mxu0  ;;  %v1065_v6 = vsel %vm8542_vm2, %v8582_v48, %v1064_v4  ;;  %v1066_v8 = vrot.slane %v1061_v10, 4  ;;  %v1073_v23 = vor.u32 %v1071_v5, %v1070_v33  ;;  %v1103_v22 = vshrl.u32 %v8735_v1, 16  ;;  %7628 = vmatprep.subr.bf16.mxu1 %v8080_v61  ;;  %v8752_v33 = vld [vmem:[#allocation2 + $0x64] sm:$0xf]  ;;  %v8754_v17 = vld [vmem:[#allocation2 + $0x68] sm:$0xf] }
 0x15a   : > { %920 = vst [vmem:[#allocation2 + $0x88] sm:$0xf] %v7093_v28  ;;  %v7091_v57 = vpack.c.bf16 %v757_v26, %v757_v26  ;;  %v762_v25 = vmax.f32 %v690_v59, 0.0  ;;  %v682_v35 = vadd.f32 %v8597_v2, %v681_v43  ;;  %v1106_v0 = vshll.u32 %v8735_v1, 16  ;;  %7672 = vmatprep.subr.bf16.mxu0 %v8090_v29  ;;  %v8095_v59 = vld [vmem:[#allocation8 + $0xe0] sm:$0xff]  }
 0x15b   : > { %v7513_v19 = vpop.f32.mrf.mxu0  ;;  %v1074_v52 = vsel %vm8542_vm2, %v1066_v8, %v1073_v23  ;;  %v954_v48 = vld [vmem:[#allocation2 + $0x58] sm:$0xf]  ;;  %v8747_v10 = vrot.slane %v1103_v22, 7  ;;  %v1086_v5 = vor.u32 %v1084_v40, %v8726_v7  ;;  %v1088_v46 = vrot.slane %v8726_v7, 4  ;;  %v8086_v40 = vld [vmem:[#allocation8 + $0x90] sm:$0xff]  }
 0x15c   : > { %918 = vst [vmem:[#allocation2 + $0x78] sm:$0xf] %v7091_v57  ;;  %v7096_v13 = vpack.c.bf16 %v762_v25, %v762_v25  ;;  %v760_v53 = vmax.f32 %v682_v35, 0.0  ;;  %v693_v21 = vadd.f32 %v7513_v19, %v8597_v2  ;;  %v6818_v32 = vcombine.low %v1065_v6, %v1074_v52  ;;  %7629 = vmatpush3.bf16.msra.mxu1 %v8080_v61 }
 0x15d   : > { %7673 = vmatpush3.bf16.msra.mxu0 %v8090_v29  ;;  %v684_v24 = vpop.f32.mrf.mxu0  ;;  %v1112_v4 = vshrl.u32 %v954_v48, 16  ;;  %v1115_v28 = vshll.u32 %v954_v48, 16  ;;  %v6796_v26 = vcombine.low %v8735_v1, %v954_v48  ;;  %v1087_v7 = vsel %vm8542_vm2, %v8578_v36, %v1086_v5  ;;  %7630 = vmatprep.subr.bf16.mxu1 %v8083_v41 }
 0x15e   : > { %7674 = vmatprep.subr.bf16.mxu0 %v8092_v16  ;;  %923 = vst [vmem:[#allocation2 + $0xa4] sm:$0xf] %v7096_v13  ;;  %v7094_v43 = vpack.c.bf16 %v760_v53, %v760_v53  ;;  %v763_v6 = vmax.f32 %v693_v21, 0.0  ;;  %v685_v8 = vadd.f32 %v8597_v2, %v684_v24  ;;  %7595 = vmatmul.mubr.bf16.gmra.mxu0 %v6818_v32  ;;  %v1125_v1 = vshrl.u32 %v8752_v33, 16  ;;  %v8091_v53 = vld [vmem:[#allocation8 + $0x88] sm:$0xff]  }
 0x15f   : > { %v1095_v61 = vor.u32 %v1093_v18, %v1092_v39  ;;  %v1114_v29 = vrot.slane %v1112_v4, 7  ;;  %7551 = vmatmul.mubr.bf16.gmra.mxu1 %v6796_v26  ;;  %v7516_v23 = vpop.f32.mrf.mxu0  ;;  %v1128_v22 = vshll.u32 %v8752_v33, 16  ;;  %v1134_v36 = vshrl.u32 %v8754_v17, 16  ;;  %v8767_v52 = vld [vmem:[#allocation2 + $0x74] sm:$0xf] }
 0x160   : > { %921 = vst [vmem:[#allocation2 + $0x94] sm:$0xf] %v7094_v43  ;;  %v7097_v57 = vpack.c.bf16 %v763_v6, %v763_v6  ;;  %v761_v25 = vmax.f32 %v685_v8, 0.0  ;;  %v706_v19 = vadd.f32 %v7516_v23, %v8597_v2  ;;  %7631 = vmatpush3.bf16.msra.mxu1 %v8083_v41  ;;  %v8769_v39 = vrot.slane %v1125_v1, 7  ;;  %v8097_v41 = vld [vmem:[#allocation8 + $0xd8] sm:$0xff]   ;;  %v8096_v1 = vld [vmem:[#allocation8 + $0x80] sm:$0xff]  }
 0x161   : > { %v1096_v35 = vsel %vm8542_vm2, %v1088_v46, %v1095_v61  ;;  %7675 = vmatpush3.bf16.msra.mxu0 %v8092_v16  ;;  %v1136_v48 = vrot.slane %v1134_v36, 7  ;;  %v1137_v5 = vshll.u32 %v8754_v17, 16  ;;  %v697_v13 = vpop.f32.mrf.mxu0  ;;  %7632 = vmatprep.subr.bf16.mxu1 %v8086_v40  ;;  %v6797_v46 = vcombine.low %v8752_v33, %v8754_v17 }
 0x162   : > { %v6819_v18 = vcombine.low %v1087_v7, %v1096_v35  ;;  %7676 = vmatprep.subr.bf16.mxu0 %v8095_v59  ;;  %924 = vst [vmem:[#allocation2 + $0xa8] sm:$0xf] %v7097_v57  ;;  %v7095_v21 = vpack.c.bf16 %v761_v25, %v761_v25  ;;  %v766_v32 = vmax.f32 %v706_v19, 0.0  ;;  %v698_v24 = vadd.f32 %v8597_v2, %v697_v13  ;;  %v8791_v35 = vld [vmem:[#allocation2 + $0x84] sm:$0xf] }
 0x163   : > { %v7517_v16 = vpop.f32.mrf.mxu0  ;;  %v1108_v4 = vor.u32 %v1106_v0, %v8747_v10  ;;  %v1110_v26 = vrot.slane %v8747_v10, 4  ;;  %v1117_v7 = vor.u32 %v1115_v28, %v1114_v29  ;;  %v8777_v43 = vld [vmem:[#allocation2 + $0x78] sm:$0xf]  ;;  %v1147_v6 = vshrl.u32 %v8767_v52, 16  ;;  %7554 = vmatprep.mubr.bf16.mxu1 %v6797_v46 }
 0x164   : > { %7598 = vmatprep.mubr.bf16.mxu0 %v6819_v18  ;;  %922 = vst [vmem:[#allocation2 + $0x98] sm:$0xf] %v7095_v21  ;;  %v7100_v8 = vpack.c.bf16 %v766_v32, %v766_v32  ;;  %v764_v61 = vmax.f32 %v698_v24, 0.0  ;;  %v709_v33 = vadd.f32 %v7517_v16, %v8597_v2  ;;  %v1150_v17 = vshll.u32 %v8767_v52, 16  ;;  %7633 = vmatpush3.bf16.msra.mxu1 %v8086_v40  ;;  %v8099_v32 = vld [vmem:[#allocation8 + $0xd0] sm:$0xff]  }
 0x165   : > { %v700_v23 = vpop.f32.mrf.mxu0  ;;  %v1109_v0 = vsel %vm8542_vm2, %v8586_v58, %v1108_v4  ;;  %v1118_v10 = vsel %vm8542_vm2, %v1110_v26, %v1117_v7  ;;  %v8787_v28 = vrot.slane %v1147_v6, 7  ;;  %v1156_v29 = vshrl.u32 %v8777_v43, 16  ;;  %7634 = vmatprep.subr.bf16.mxu1 %v8091_v53  ;;  %7677 = vmatpush3.bf16.msra.mxu0 %v8095_v59  ;;  %v8797_v59 = vld [vmem:[#allocation2 + $0x88] sm:$0xf] }
 0x166   : > { %927 = vst [vmem:[#allocation2 + $0xc4] sm:$0xf] %v7100_v8  ;;  %v7098_v36 = vpack.c.bf16 %v764_v61, %v764_v61  ;;  %v767_v57 = vmax.f32 %v709_v33, 0.0  ;;  %v701_v40 = vadd.f32 %v8597_v2, %v700_v23  ;;  %v6820_v25 = vcombine.low %v1109_v0, %v1118_v10  ;;  %7678 = vmatprep.subr.bf16.mxu0 %v8097_v41  ;;  %v8100_v10 = vld [vmem:[#allocation8 + $0xc8] sm:$0xff]  }
 0x167   : > { %v1158_v58 = vrot.slane %v1156_v29, 7  ;;  %v1159_v19 = vshll.u32 %v8777_v43, 16  ;;  %v6798_v18 = vcombine.low %v8767_v52, %v8777_v43  ;;  %v1130_v13 = vor.u32 %v1128_v22, %v8769_v39  ;;  %v7520_v21 = vpop.f32.mrf.mxu0 }
 0x168   : > { %925 = vst [vmem:[#allocation2 + $0xb4] sm:$0xf] %v7098_v36  ;;  %v7101_v46 = vpack.c.bf16 %v767_v57, %v767_v57  ;;  %v765_v24 = vmax.f32 %v701_v40, 0.0  ;;  %7599 = vmatmul.mubr.bf16.gmra.mxu0 %v6820_v25  ;;  %v1132_v16 = vrot.slane %v8769_v39, 4  ;;  %v1139_v4 = vor.u32 %v1137_v5, %v1136_v48  ;;  %7635 = vmatpush3.bf16.msra.mxu1 %v8091_v53  ;;  %v8810_v53 = vld [vmem:[#allocation2 + $0x94] sm:$0xf] }
 0x169   : > { %7555 = vmatmul.mubr.bf16.gmra.mxu1 %v6798_v18  ;;  %v1131_v26 = vsel %vm8542_vm2, %v8584_v49, %v1130_v13  ;;  %v722_v52 = vadd.f32 %v7520_v21, %v8597_v2  ;;  %v1169_v22 = vshrl.u32 %v8791_v35, 16  ;;  %v1172_v7 = vshll.u32 %v8791_v35, 16  ;;  %v713_v43 = vpop.f32.mrf.mxu0  ;;  %7636 = vmatprep.subr.bf16.mxu1 %v8096_v1  ;;  %v8812_v49 = vld [vmem:[#allocation8 + $0x138] sm:$0xff]  }
 0x16a   : > { %928 = vst [vmem:[#allocation2 + $0xc8] sm:$0xf] %v7101_v46  ;;  %v7099_v6 = vpack.c.bf16 %v765_v24, %v765_v24  ;;  %v1140_v39 = vsel %vm8542_vm2, %v1132_v16, %v1139_v4  ;;  %v1178_v48 = vshrl.u32 %v8797_v59, 16  ;;  %v1181_v5 = vshll.u32 %v8797_v59, 16  ;;  %7679 = vmatpush3.bf16.msra.mxu0 %v8097_v41 }
 0x16b   : > { %v6821_v8 = vcombine.low %v1131_v26, %v1140_v39  ;;  %v770_v61 = vmax.f32 %v722_v52, 0.0  ;;  %v1171_v33 = vrot.slane %v1169_v22, 7  ;;  %v6799_v23 = vcombine.low %v8791_v35, %v8797_v59  ;;  %v7521_v0 = vpop.f32.mrf.mxu0  ;;  %7680 = vmatprep.subr.bf16.mxu0 %v8099_v32  ;;  %v8819_v41 = vld [vmem:[#allocation2 + $0x98] sm:$0xf] }
 0x16c   : > { %926 = vst [vmem:[#allocation2 + $0xb8] sm:$0xf] %v7099_v6  ;;  %v1180_v29 = vrot.slane %v1178_v48, 7  ;;  %v714_v36 = vadd.f32 %v8597_v2, %v713_v43  ;;  %v725_v57 = vadd.f32 %v7521_v0, %v8597_v2  ;;  %v1152_v40 = vor.u32 %v1150_v17, %v8787_v28  ;;  %7637 = vmatpush3.bf16.msra.mxu1 %v8096_v1  ;;  %v8102_v43 = vld [vmem:[#allocation8 + $0xc0] sm:$0xff]  }
 0x16d   : > { %7602 = vmatprep.mubr.bf16.mxu0 %v6821_v8  ;;  %v7104_v25 = vpack.c.bf16 %v770_v61, %v770_v61  ;;  %7558 = vmatprep.mubr.bf16.mxu1 %v6799_v23  ;;  %v716_v18 = vpop.f32.mrf.mxu0  ;;  %v1154_v35 = vrot.slane %v8787_v28, 4  ;;  %v1161_v13 = vor.u32 %v1159_v19, %v1158_v58  ;;  %v1191_v21 = vshrl.u32 %v8810_v53, 16 }
 0x16e   : > { %v768_v59 = vmax.f32 %v714_v36, 0.0  ;;  %v771_v46 = vmax.f32 %v725_v57, 0.0  ;;  %v717_v24 = vadd.f32 %v8597_v2, %v716_v18  ;;  %v1153_v17 = vsel %vm8542_vm2, %v8588_v60, %v1152_v40  ;;  %7681 = vmatpush3.bf16.msra.mxu0 %v8099_v32  ;;  %7718 = vmatprep.subr.bf16.mxu1 %v8812_v49  ;;  %v8834_v60 = vld [vmem:[#allocation2 + $0xa4] sm:$0xf]  ;;  %v8836_v32 = vld [vmem:[#allocation2 + $0xa8] sm:$0xf] }
 0x16f   : > { %931 = vst [vmem:[#allocation2 + $0xe4] sm:$0xf] %v7104_v25  ;;  %v1162_v1 = vsel %vm8542_vm2, %v1154_v35, %v1161_v13  ;;  %v8830_v16 = vrot.slane %v1191_v21, 7  ;;  %v1194_v28 = vshll.u32 %v8810_v53, 16  ;;  %v1200_v58 = vshrl.u32 %v8819_v41, 16  ;;  %v7524_v19 = vpop.f32.mrf.mxu0  ;;  %7682 = vmatprep.subr.bf16.mxu0 %v8100_v10 }
 0x170   : > { %v7102_v4 = vpack.c.bf16 %v768_v59, %v768_v59  ;;  %v7105_v26 = vpack.c.bf16 %v771_v46, %v771_v46  ;;  %v769_v52 = vmax.f32 %v717_v24, 0.0  ;;  %v6822_v22 = vcombine.low %v1153_v17, %v1162_v1  ;;  %v971_v35 = vld [vmem:[#allocation2 + $0xb4] sm:$0xf] }
 0x171   : > { %v1202_v6 = vrot.slane %v1200_v58, 7  ;;  %v1203_v39 = vshll.u32 %v8819_v41, 16  ;;  %v6800_v48 = vcombine.low %v8810_v53, %v8819_v41  ;;  %v1174_v8 = vor.u32 %v1172_v7, %v1171_v33  ;;  %v729_v61 = vpop.f32.mrf.mxu0 }
 0x172   : > { %929 = vst [vmem:[#allocation2 + $0xd4] sm:$0xf] %v7102_v4  ;;  %932 = vst [vmem:[#allocation2 + $0xe8] sm:$0xf] %v7105_v26  ;;  %v7103_v23 = vpack.c.bf16 %v769_v52, %v769_v52  ;;  %7603 = vmatmul.mubr.bf16.gmra.mxu0 %v6822_v22  ;;  %v1176_v0 = vrot.slane %v1171_v33, 4  ;;  %v1183_v36 = vor.u32 %v1181_v5, %v1180_v29  ;;  %v1213_v25 = vshrl.u32 %v8834_v60, 16 }
 0x173   : > { %v738_v57 = vadd.f32 %v7524_v19, %v8597_v2  ;;  %7559 = vmatmul.mubr.bf16.gmra.mxu1 %v6800_v48  ;;  %v1175_v40 = vsel %vm8542_vm2, %v8590_v62, %v1174_v8  ;;  %v1216_v18 = vshll.u32 %v8834_v60, 16  ;;  %v1222_v7 = vshrl.u32 %v8836_v32, 16  ;;  %v7525_v53 = vpop.f32.mrf.mxu0  ;;  %7683 = vmatpush3.bf16.msra.mxu0 %v8100_v10  ;;  %v8853_v62 = vld [vmem:[#allocation8 + $0x178] sm:$0xff]  }
 0x174   : > { %930 = vst [vmem:[#allocation2 + $0xd8] sm:$0xf] %v7103_v23  ;;  %v1184_v33 = vsel %vm8542_vm2, %v1176_v0, %v1183_v36  ;;  %v1225_v29 = vshll.u32 %v8836_v32, 16  ;;  %v6801_v41 = vcombine.low %v8834_v60, %v8836_v32  ;;  %7684 = vmatprep.subr.bf16.mxu0 %v8102_v43  ;;  %v1215_v21 = vrot.slane %v1213_v25, 7  ;;  %v972_v19 = vld [vmem:[#allocation2 + $0xb8] sm:$0xf] }
 0x175   : > { %v774_v5 = vmax.f32 %v738_v57, 0.0  ;;  %v6823_v13 = vcombine.low %v1175_v40, %v1184_v33  ;;  %v1224_v59 = vrot.slane %v1222_v7, 7  ;;  %v730_v46 = vadd.f32 %v8597_v2, %v729_v61  ;;  %v732_v10 = vpop.f32.mrf.mxu0 }
 0x176   : > { %7562 = vmatprep.mubr.bf16.mxu1 %v6801_v41  ;;  %v741_v17 = vadd.f32 %v7525_v53, %v8597_v2  ;;  %v733_v1 = vadd.f32 %v8597_v2, %v732_v10  ;;  %v1196_v58 = vor.u32 %v1194_v28, %v8830_v16  ;;  %v1198_v26 = vrot.slane %v8830_v16, 4  ;;  %v974_v16 = vld [vmem:[#allocation2 + $0xc4] sm:$0xf] }
 0x177   : > { %v7108_v24 = vpack.c.bf16 %v774_v5, %v774_v5  ;;  %7606 = vmatprep.mubr.bf16.mxu0 %v6823_v13  ;;  %v772_v4 = vmax.f32 %v730_v46, 0.0  ;;  %v1205_v52 = vor.u32 %v1203_v39, %v1202_v6  ;;  %v1235_v22 = vshrl.u32 %v971_v35, 16  ;;  %7685 = vmatpush3.bf16.msra.mxu0 %v8102_v43  ;;  %v975_v6 = vld [vmem:[#allocation2 + $0xc8] sm:$0xf] }
 0x178   : > { %v775_v60 = vmax.f32 %v741_v17, 0.0  ;;  %v773_v32 = vmax.f32 %v733_v1, 0.0  ;;  %v1197_v48 = vsel %vm8542_vm2, %v8599_v3, %v1196_v58  ;;  %v1238_v8 = vshll.u32 %v971_v35, 16  ;;  %7766 = vmatprep.subr.bf16.mxu0 %v8853_v62 }
 0x179   : > { %935 = vst [vmem:[#allocation2 + $0x104] sm:$0xf] %v7108_v24  ;;  %v7106_v2 = vpack.c.bf16 %v772_v4, %v772_v4  ;;  %v1206_v28 = vsel %vm8542_vm2, %v1198_v26, %v1205_v52  ;;  %v1237_v61 = vrot.slane %v1235_v22, 7  ;;  %v1244_v23 = vshrl.u32 %v972_v19, 16  ;;  %v977_v41 = vld [vmem:[#allocation2 + $0xd4] sm:$0xf] }
 0x17a   : > { %v7109_v39 = vpack.c.bf16 %v775_v60, %v775_v60  ;;  %v7107_v43 = vpack.c.bf16 %v773_v32, %v773_v32  ;;  %v6824_v0 = vcombine.low %v1197_v48, %v1206_v28  ;;  %v1247_v36 = vshll.u32 %v972_v19, 16  ;;  %v980_v4 = vld [vmem:[#allocation2 + $0xe4] sm:$0xf]  ;;  %v981_v60 = vld [vmem:[#allocation2 + $0xe8] sm:$0xf] }
 0x17b   : > { %933 = vst [vmem:[#allocation2 + $0xf4] sm:$0xf] %v7106_v2  ;;  %v1246_v57 = vrot.slane %v1244_v23, 7  ;;  %v6802_v40 = vcombine.low %v971_v35, %v972_v19  ;;  %v1218_v25 = vor.u32 %v1216_v18, %v1215_v21  ;;  %v1220_v3 = vrot.slane %v1215_v21, 4  ;;  %v978_v17 = vld [vmem:[#allocation2 + $0xd8] sm:$0xf] }
 0x17c   : > { %936 = vst [vmem:[#allocation2 + $0x108] sm:$0xf] %v7109_v39  ;;  %934 = vst [vmem:[#allocation2 + $0xf8] sm:$0xf] %v7107_v43  ;;  %7607 = vmatmul.mubr.bf16.gmra.mxu0 %v6824_v0  ;;  %v1227_v7 = vor.u32 %v1225_v29, %v1224_v59  ;;  %v1257_v53 = vshrl.u32 %v974_v16, 16  ;;  %v1260_v33 = vshll.u32 %v974_v16, 16  ;;  %v6803_v10 = vcombine.low %v974_v16, %v975_v6 }
 0x17d   : > { %v1266_v5 = vshrl.u32 %v975_v6, 16  ;;  %7563 = vmatmul.mubr.bf16.gmra.mxu1 %v6802_v40  ;;  %v1219_v13 = vsel %vm8542_vm2, %v8592_v63, %v1218_v25  ;;  %v1269_v46 = vshll.u32 %v975_v6, 16  ;;  %v1240_v24 = vor.u32 %v1238_v8, %v1237_v61 }
 0x17e   : > { %v1228_v18 = vsel %vm8542_vm2, %v1220_v3, %v1227_v7  ;;  %v1259_v35 = vrot.slane %v1257_v53, 7  ;;  %v1242_v1 = vrot.slane %v1237_v61, 4  ;;  %7566 = vmatprep.mubr.bf16.mxu1 %v6803_v10  ;;  %v1249_v58 = vor.u32 %v1247_v36, %v1246_v57 }
 0x17f   : > { %v1268_v21 = vrot.slane %v1266_v5, 7  ;;  %v6825_v29 = vcombine.low %v1219_v13, %v1228_v18  ;;  %v1241_v59 = vsel %vm8542_vm2, %v8604_v14, %v1240_v24  ;;  %v1279_v19 = vshrl.u32 %v977_v41, 16 }
 0x180   : > { %v1282_v63 = vshll.u32 %v977_v41, 16  ;;  %v1288_v26 = vshrl.u32 %v978_v17, 16  ;;  %v1291_v52 = vshll.u32 %v978_v17, 16  ;;  %v6804_v22 = vcombine.low %v977_v41, %v978_v17 }
 0x181   : > { %7610 = vmatprep.mubr.bf16.mxu0 %v6825_v29  ;;  %v1250_v32 = vsel %vm8542_vm2, %v1242_v1, %v1249_v58  ;;  %v1281_v48 = vrot.slane %v1279_v19, 7  ;;  %v1262_v8 = vor.u32 %v1260_v33, %v1259_v35  ;;  %v1264_v2 = vrot.slane %v1259_v35, 4  ;;  %v1954_v35 = vld [vmem:[#allocation2 + $0x18] sm:$0xf]  ;;  %v2708_v58 = vld [vmem:[#allocation2 + $0x14] sm:$0xf] }
 0x182   : > { %v6826_v28 = vcombine.low %v1241_v59, %v1250_v32  ;;  %v1290_v61 = vrot.slane %v1288_v26, 7  ;;  %v1271_v23 = vor.u32 %v1269_v46, %v1268_v21  ;;  %v1301_v16 = vshrl.u32 %v980_v4, 16  ;;  %v983_v14 = vld [vmem:[#allocation2 + $0xf4] sm:$0xf] }
 0x183   : > { %v1263_v6 = vsel %vm8542_vm2, %v8606_v15, %v1262_v8  ;;  %v1304_v39 = vshll.u32 %v980_v4, 16  ;;  %v1310_v43 = vshrl.u32 %v981_v60, 16  ;;  %v1313_v0 = vshll.u32 %v981_v60, 16  ;;  %v984_v36 = vld [vmem:[#allocation2 + $0xf8] sm:$0xf] }
 0x184   : > { %7611 = vmatmul.mubr.bf16.gmra.mxu0 %v6826_v28  ;;  %v1272_v57 = vsel %vm8542_vm2, %v1264_v2, %v1271_v23  ;;  %v1303_v40 = vrot.slane %v1301_v16, 7  ;;  %v6805_v25 = vcombine.low %v980_v4, %v981_v60  ;;  %v1284_v3 = vor.u32 %v1282_v63, %v1281_v48 }
 0x185   : > { %7567 = vmatmul.mubr.bf16.gmra.mxu1 %v6804_v22  ;;  %v6827_v7 = vcombine.low %v1263_v6, %v1272_v57  ;;  %v1312_v53 = vrot.slane %v1310_v43, 7  ;;  %v1286_v33 = vrot.slane %v1281_v48, 4  ;;  %v1293_v5 = vor.u32 %v1291_v52, %v1290_v61  ;;  %v2709_v61 = vld [vmem:[#allocation2 + $0x18] sm:$0xf] }
 0x186   : > { %7570 = vmatprep.mubr.bf16.mxu1 %v6805_v25  ;;  %v1285_v15 = vsel %vm8542_vm2, %v8617_v30, %v1284_v3  ;;  %v1323_v41 = vshrl.u32 %v983_v14, 16  ;;  %v1326_v13 = vshll.u32 %v983_v14, 16  ;;  %v1332_v46 = vshrl.u32 %v984_v36, 16 }
 0x187   : > { %7614 = vmatprep.mubr.bf16.mxu0 %v6827_v7  ;;  %v1294_v10 = vsel %vm8542_vm2, %v1286_v33, %v1293_v5  ;;  %v1335_v24 = vshll.u32 %v984_v36, 16  ;;  %v6806_v17 = vcombine.low %v983_v14, %v984_v36  ;;  %v1306_v18 = vor.u32 %v1304_v39, %v1303_v40  ;;  %v1957_v36 = vld [vmem:[#allocation2 + $0x28] sm:$0xf] }
 0x188   : > { %v6828_v21 = vcombine.low %v1285_v15, %v1294_v10  ;;  %v1325_v1 = vrot.slane %v1323_v41, 7  ;;  %v1334_v29 = vrot.slane %v1332_v46, 7  ;;  %v1308_v59 = vrot.slane %v1303_v40, 4 }
 0x189   : > { %v1307_v30 = vsel %vm8542_vm2, %v8619_v31, %v1306_v18  ;;  %v1315_v19 = vor.u32 %v1313_v0, %v1312_v53  ;;  %v10530_v4 = vshrl.u32 %v8698_v51, 16  ;;  %v10531_v26 = vshll.u32 %v8698_v51, 16 }
 0x18a   : > { %v1328_v22 = vor.u32 %v1326_v13, %v1325_v1  ;;  %v1330_v60 = vrot.slane %v1325_v1, 4  ;;  %v1337_v32 = vor.u32 %v1335_v24, %v1334_v29  ;;  %v2035_v48 = vshll.u32 %v1954_v35, 16  ;;  %v2712_v24 = vld [vmem:[#allocation2 + $0x28] sm:$0xf] }
 0x18b   : > { %v2028_v63 = vrot.slane %v10530_v4, 4  ;;  %v2031_v52 = vrot.slane %v10531_v26, 5  ;;  %v1316_v8 = vsel %vm8542_vm2, %v1308_v59, %v1315_v19  ;;  %v2039_v28 = vshrl.u32 %v1954_v35, 16  ;;  %v1959_v4 = vld [vmem:[#allocation2 + $0x34] sm:$0xf] }
 0x18c   : > { %v2761_v23 = vshrl.u32 %v2708_v58, 16  ;;  %7615 = vmatmul.mubr.bf16.gmra.mxu0 %v6828_v21  ;;  %v6829_v31 = vcombine.low %v1307_v30, %v1316_v8  ;;  %v1329_v16 = vsel %vm8542_vm2, %v8623_v37, %v1328_v22  ;;  %v1338_v51 = vsel %vm8542_vm2, %v1330_v60, %v1337_v32  ;;  %v2711_v37 = vld [vmem:[#allocation2 + $0x24] sm:$0xf]  ;;  %v8103_v60 = vld [vmem:[#allocation8 + $0x130] sm:$0xff]  }
 0x18d   : > { %v2032_v2 = vor.u32 %v2031_v52, %v2028_v63  ;;  %v2037_v14 = vrot.slane %v2035_v48, 5  ;;  %7571 = vmatmul.mubr.bf16.gmra.mxu1 %v6806_v17  ;;  %v6830_v6 = vcombine.low %v1329_v16, %v1338_v51  ;;  %v2041_v43 = vrot.slane %v2039_v28, 4 }
 0x18e   : > { %v2763_v0 = vrot.slane %v2761_v23, 7  ;;  %7618 = vmatprep.mubr.bf16.mxu0 %v6829_v31  ;;  %7638 = vmatprep.mubr.bf16.mxu1 %v8696_v45  ;;  %v2764_v57 = vshll.u32 %v2708_v58, 16  ;;  %v2770_v40 = vshrl.u32 %v2709_v61, 16  ;;  %v2773_v25 = vshll.u32 %v2709_v61, 16  ;;  %v2714_v31 = vld [vmem:[#allocation2 + $0x34] sm:$0xf] }
 0x18f   : > { %v2033_v39 = vrot.slane %v2032_v2, 4  ;;  %v10532_v3 = vshrl.u32 %v8677_v27, 16  ;;  %v2042_v33 = vor.u32 %v2041_v43, %v2037_v14  ;;  %v2053_v15 = vshll.u32 %v8677_v27, 16 }
 0x190   : > { %v2768_v5 = vrot.slane %v2763_v0, 4  ;;  %v2766_v41 = vor.u32 %v2764_v57, %v2763_v0  ;;  %v2772_v13 = vrot.slane %v2770_v40, 7  ;;  %v2059_v46 = vshll.u32 %v1957_v36, 16  ;;  %v8104_v40 = vld [vmem:[#allocation8 + $0x128] sm:$0xff]  }
 0x191   : > { %v2052_v7 = vrot.slane %v10532_v3, 4  ;;  %v2038_v53 = vsel %vm8630_vm7, %v2033_v39, %v2037_v14  ;;  %v2063_v10 = vshrl.u32 %v1957_v36, 16  ;;  %v2043_v45 = vrot.slane %v2042_v33, 4  ;;  %v2715_v39 = vld [vmem:[#allocation2 + $0x38] sm:$0xf] }
 0x192   : > { %v2055_v17 = vrot.slane %v2053_v15, 5  ;;  %v2783_v18 = vshrl.u32 %v2711_v37, 16  ;;  %v2786_v35 = vshll.u32 %v2711_v37, 16  ;;  %v2767_v21 = vsel %vm8542_vm2, %v8621_v34, %v2766_v41  ;;  %v1960_v34 = vld [vmem:[#allocation2 + $0x38] sm:$0xf] }
 0x193   : > { %v2775_v1 = vor.u32 %v2773_v25, %v2772_v13  ;;  %v2061_v29 = vrot.slane %v2059_v46, 5  ;;  %v2065_v59 = vrot.slane %v2063_v10, 4  ;;  %v2048_v27 = vsel %vm8630_vm7, %v2043_v45, %v8625_v38  ;;  %v1962_v37 = vld [vmem:[#allocation2 + $0x44] sm:$0xf]  ;;  %v1963_v15 = vld [vmem:[#allocation2 + $0x48] sm:$0xf] }
 0x194   : > { %v2056_v58 = vor.u32 %v2055_v17, %v2052_v7  ;;  %v2785_v30 = vrot.slane %v2783_v18, 7  ;;  %v2792_v19 = vshrl.u32 %v2712_v24, 16  ;;  %7619 = vmatmul.mubr.bf16.gmra.mxu0 %v6830_v6  ;;  %v6840_v63 = vcombine.low %v2038_v53, %v2048_v27  ;;  %v8109_v10 = vld [vmem:[#allocation8 + $0x170] sm:$0xff]   ;;  %v2717_v27 = vld [vmem:[#allocation2 + $0x44] sm:$0xf] }
 0x195   : > { %v2776_v26 = vsel %vm8542_vm2, %v2768_v5, %v2775_v1  ;;  %v2066_v52 = vor.u32 %v2065_v59, %v2061_v29  ;;  %v2795_v22 = vshll.u32 %v2712_v24, 16  ;;  %v2074_v61 = vshrl.u32 %v1959_v4, 16 }
 0x196   : > { %v6879_v32 = vcombine.low %v2767_v21, %v2776_v26  ;;  %v2057_v48 = vrot.slane %v2056_v58, 4  ;;  %v2788_v8 = vor.u32 %v2786_v35, %v2785_v30  ;;  %v2790_v2 = vrot.slane %v2785_v30, 4  ;;  %7639 = vmatmul.mubr.bf16.vlgmr.msra.gmra.mxu1 %v6840_v63  ;;  %v8105_v35 = vld [vmem:[#allocation8 + $0x120] sm:$0xff]   ;;  %v2718_v63 = vld [vmem:[#allocation2 + $0x48] sm:$0xf] }
 0x197   : > { %v2067_v28 = vrot.slane %v2066_v52, 4  ;;  %v2794_v38 = vrot.slane %v2792_v19, 7  ;;  %v2077_v23 = vshll.u32 %v1959_v4, 16  ;;  %7719 = vmatpush3.bf16.msra.mxu1 %v8812_v49  ;;  %v2083_v14 = vshll.u32 %v1960_v34, 16 }
 0x198   : > { %7686 = vmatprep.mubr.bf16.mxu0 %v6879_v32  ;;  %v2062_v16 = vsel %vm8630_vm7, %v2057_v48, %v2061_v29  ;;  %v2789_v51 = vsel %vm8542_vm2, %v8644_v55, %v2788_v8  ;;  %v2087_v6 = vshrl.u32 %v1960_v34, 16  ;;  %7720 = vmatprep.subr.bf16.mxu1 %v8103_v60  ;;  %v2076_v36 = vrot.slane %v2074_v61, 4  ;;  %v1965_v34 = vld [vmem:[#allocation2 + $0x54] sm:$0xf] }
 0x199   : > { %v2072_v43 = vsel %vm8630_vm7, %v2067_v28, %v8642_v54  ;;  %v2797_v0 = vor.u32 %v2795_v22, %v2794_v38  ;;  %v2079_v57 = vrot.slane %v2077_v23, 5  ;;  %v2085_v25 = vrot.slane %v2083_v14, 5  ;;  %v8106_v28 = vld [vmem:[#allocation8 + $0x118] sm:$0xff]   ;;  %v8111_v38 = vld [vmem:[#allocation8 + $0x168] sm:$0xff]  }
 0x19a   : > { %v6841_v49 = vcombine.low %v2062_v16, %v2072_v43  ;;  %v2089_v3 = vrot.slane %v2087_v6, 4  ;;  %v2805_v7 = vshrl.u32 %v2714_v31, 16  ;;  %v2808_v33 = vshll.u32 %v2714_v31, 16 }
 0x19b   : > { %v2798_v55 = vsel %vm8542_vm2, %v2790_v2, %v2797_v0  ;;  %v2080_v53 = vor.u32 %v2079_v57, %v2076_v36  ;;  %v2814_v5 = vshrl.u32 %v2715_v39, 16  ;;  %v2817_v46 = vshll.u32 %v2715_v39, 16  ;;  %7721 = vmatpush3.bf16.msra.mxu1 %v8103_v60  ;;  %v2720_v36 = vld [vmem:[#allocation2 + $0x54] sm:$0xf]  ;;  %v8112_v57 = vld [vmem:[#allocation8 + $0x160] sm:$0xff]  }
 0x19c   : > { %7642 = vmatprep.mubr.bf16.mxu1 %v6841_v49  ;;  %v6880_v41 = vcombine.low %v2789_v51, %v2798_v55  ;;  %v2090_v54 = vor.u32 %v2089_v3, %v2085_v25  ;;  %v2807_v13 = vrot.slane %v2805_v7, 7  ;;  %v2098_v17 = vshrl.u32 %v1962_v37, 16  ;;  %7722 = vmatprep.subr.bf16.mxu1 %v8104_v40  ;;  %v2721_v7 = vld [vmem:[#allocation2 + $0x58] sm:$0xf] }
 0x19d   : > { %v2081_v24 = vrot.slane %v2080_v53, 4  ;;  %v2816_v45 = vrot.slane %v2814_v5, 7  ;;  %v2101_v18 = vshll.u32 %v1962_v37, 16  ;;  %v2107_v59 = vshll.u32 %v1963_v15, 16  ;;  %v8107_v37 = vld [vmem:[#allocation8 + $0x110] sm:$0xff]  }
 0x19e   : > { %7687 = vmatmul.mubr.bf16.vlgmr.msra.gmra.mxu0 %v6880_v41  ;;  %v2091_v21 = vrot.slane %v2090_v54, 4  ;;  %v2810_v1 = vor.u32 %v2808_v33, %v2807_v13  ;;  %v2812_v29 = vrot.slane %v2807_v13, 4  ;;  %v2100_v19 = vrot.slane %v2098_v17, 4 }
 0x19f   : > { %v2086_v58 = vsel %vm8630_vm7, %v2081_v24, %v2085_v25  ;;  %v2819_v30 = vor.u32 %v2817_v46, %v2816_v45  ;;  %v2103_v4 = vrot.slane %v2101_v18, 5  ;;  %7767 = vmatpush3.bf16.msra.mxu0 %v8853_v62  ;;  %v2109_v22 = vrot.slane %v2107_v59, 5  ;;  %7723 = vmatpush3.bf16.msra.mxu1 %v8104_v40  ;;  %v1966_v62 = vld [vmem:[#allocation2 + $0x58] sm:$0xf]  ;;  %v1968_v46 = vld [vmem:[#allocation2 + $0x64] sm:$0xf] }
 0x1a0   : > { %v2096_v26 = vsel %vm8630_vm7, %v2091_v21, %v8652_v20  ;;  %v2811_v52 = vsel %vm8542_vm2, %v8647_v11, %v2810_v1  ;;  %v2111_v60 = vshrl.u32 %v1963_v15, 16  ;;  %7768 = vmatprep.subr.bf16.mxu0 %v8109_v10  ;;  %v2827_v2 = vshrl.u32 %v2717_v27, 16  ;;  %7724 = vmatprep.subr.bf16.mxu1 %v8105_v35  ;;  %v1969_v1 = vld [vmem:[#allocation2 + $0x68] sm:$0xf]  ;;  %v8114_v59 = vld [vmem:[#allocation8 + $0x158] sm:$0xff]  }
 0x1a1   : > { %v6842_v32 = vcombine.low %v2086_v58, %v2096_v26  ;;  %v2820_v48 = vsel %vm8542_vm2, %v2812_v29, %v2819_v30  ;;  %v2104_v8 = vor.u32 %v2103_v4, %v2100_v19  ;;  %v2830_v23 = vshll.u32 %v2717_v27, 16  ;;  %v8110_v29 = vld [vmem:[#allocation8 + $0x108] sm:$0xff]  }
 0x1a2   : > { %v6881_v20 = vcombine.low %v2811_v52, %v2820_v48  ;;  %v2113_v61 = vrot.slane %v2111_v60, 4  ;;  %v2836_v31 = vshrl.u32 %v2718_v63, 16  ;;  %v2829_v16 = vrot.slane %v2827_v2, 7  ;;  %v2723_v52 = vld [vmem:[#allocation2 + $0x64] sm:$0xf] }
 0x1a3   : > { %7643 = vmatmul.mubr.bf16.gmra.mxu1 %v6842_v32  ;;  %v2105_v11 = vrot.slane %v2104_v8, 4  ;;  %v2839_v51 = vshll.u32 %v2718_v63, 16  ;;  %v2122_v14 = vshrl.u32 %v1965_v34, 16  ;;  %7769 = vmatpush3.bf16.msra.mxu0 %v8109_v10  ;;  %v2125_v43 = vshll.u32 %v1965_v34, 16 }
 0x1a4   : > { %7690 = vmatprep.mubr.bf16.mxu0 %v6881_v20  ;;  %v2114_v6 = vor.u32 %v2113_v61, %v2109_v22  ;;  %v2838_v39 = vrot.slane %v2836_v31, 7  ;;  %v2131_v0 = vshll.u32 %v1966_v62, 16  ;;  %7725 = vmatpush3.bf16.msra.mxu1 %v8105_v35  ;;  %v2832_v49 = vor.u32 %v2830_v23, %v2829_v16 }
 0x1a5   : > { %v2110_v40 = vsel %vm8630_vm7, %v2105_v11, %v2109_v22  ;;  %v2834_v25 = vrot.slane %v2829_v16, 4  ;;  %v2124_v3 = vrot.slane %v2122_v14, 4  ;;  %7726 = vmatprep.subr.bf16.mxu1 %v8106_v28  ;;  %7770 = vmatprep.subr.bf16.mxu0 %v8111_v38  ;;  %v2127_v33 = vrot.slane %v2125_v43, 5  ;;  %v1971_v11 = vld [vmem:[#allocation2 + $0x74] sm:$0xf] }
 0x1a6   : > { %v2115_v55 = vrot.slane %v2114_v6, 4  ;;  %v2841_v53 = vor.u32 %v2839_v51, %v2838_v39  ;;  %v2133_v5 = vrot.slane %v2131_v0, 5  ;;  %v2833_v15 = vsel %vm8542_vm2, %v8649_v12, %v2832_v49  ;;  %v8116_v16 = vld [vmem:[#allocation8 + $0x150] sm:$0xff]   ;;  %v1972_v39 = vld [vmem:[#allocation2 + $0x78] sm:$0xf] }
 0x1a7   : > { %v2135_v41 = vshrl.u32 %v1966_v62, 16  ;;  %v2849_v54 = vshrl.u32 %v2720_v36, 16  ;;  %v2852_v13 = vshll.u32 %v2720_v36, 16  ;;  %7771 = vmatpush3.bf16.msra.mxu0 %v8111_v38  ;;  %v2128_v45 = vor.u32 %v2127_v33, %v2124_v3  ;;  %v8113_v38 = vld [vmem:[#allocation8 + $0x100] sm:$0xff]  }
 0x1a8   : > { %v2120_v10 = vsel %vm8630_vm7, %v2115_v55, %v8655_v42  ;;  %v2842_v24 = vsel %vm8542_vm2, %v2834_v25, %v2841_v53  ;;  %v2858_v17 = vshrl.u32 %v2721_v7, 16  ;;  %7727 = vmatpush3.bf16.msra.mxu1 %v8106_v28  ;;  %7772 = vmatprep.subr.bf16.mxu0 %v8112_v57  ;;  %v2861_v30 = vshll.u32 %v2721_v7, 16  ;;  %v8951_v28 = vld [vmem:[#allocation2 + $0x68] sm:$0xf] }
 0x1a9   : > { %v6843_v18 = vcombine.low %v2110_v40, %v2120_v10  ;;  %v6882_v35 = vcombine.low %v2833_v15, %v2842_v24  ;;  %v2137_v21 = vrot.slane %v2135_v41, 4  ;;  %v2851_v12 = vrot.slane %v2849_v54, 7  ;;  %7728 = vmatprep.subr.bf16.mxu1 %v8107_v37  ;;  %v8117_v7 = vld [vmem:[#allocation8 + $0x148] sm:$0xff]  }
 0x1aa   : > { %v2129_v27 = vrot.slane %v2128_v45, 4  ;;  %v2860_v58 = vrot.slane %v2858_v17, 7  ;;  %v2146_v19 = vshrl.u32 %v1968_v46, 16  ;;  %v2149_v26 = vshll.u32 %v1968_v46, 16  ;;  %v8966_v46 = vld [vmem:[#allocation2 + $0x78] sm:$0xf] }
 0x1ab   : > { %7646 = vmatprep.mubr.bf16.mxu1 %v6843_v18  ;;  %7691 = vmatmul.mubr.bf16.gmra.mxu0 %v6882_v35  ;;  %v2138_v42 = vor.u32 %v2137_v21, %v2133_v5  ;;  %v2854_v4 = vor.u32 %v2852_v13, %v2851_v12  ;;  %v2856_v63 = vrot.slane %v2851_v12, 4  ;;  %v2155_v32 = vshll.u32 %v1969_v1, 16  ;;  %v10533_v18 = vld [vmem:[#allocation15_spill] sm:$0xff] }
 0x1ac   : > { %v2134_v22 = vsel %vm8630_vm7, %v2129_v27, %v2133_v5  ;;  %v2863_v60 = vor.u32 %v2861_v30, %v2860_v58  ;;  %v2148_v34 = vrot.slane %v2146_v19, 4  ;;  %7729 = vmatpush3.bf16.msra.mxu1 %v8107_v37  ;;  %7773 = vmatpush3.bf16.msra.mxu0 %v8112_v57  ;;  %v2151_v2 = vrot.slane %v2149_v26, 5  ;;  %v8962_v5 = vld [vmem:[#allocation2 + $0x74] sm:$0xf]  ;;  %v1975_v19 = vld [vmem:[#allocation2 + $0x88] sm:$0xf] }
 0x1ad   : > { %v2139_v48 = vrot.slane %v2138_v42, 4  ;;  %v2855_v8 = vsel %vm8542_vm2, %v8657_v47, %v2854_v4  ;;  %v2159_v62 = vshrl.u32 %v1969_v1, 16  ;;  %7730 = vmatprep.subr.bf16.mxu1 %v8110_v29  ;;  %7774 = vmatprep.subr.bf16.mxu0 %v8114_v59  ;;  %v2157_v61 = vrot.slane %v2155_v32, 5  ;;  %v8981_v32 = vld [vmem:[#allocation2 + $0x84] sm:$0xf] }
 0x1ae   : > { %v2864_v20 = vsel %vm8542_vm2, %v2856_v63, %v2863_v60  ;;  %v2871_v23 = vshrl.u32 %v2723_v52, 16  ;;  %v2874_v31 = vshll.u32 %v2723_v52, 16  ;;  %v2152_v14 = vor.u32 %v2151_v2, %v2148_v34 }
 0x1af   : > { %v2144_v51 = vsel %vm8630_vm7, %v2139_v48, %v8664_v9  ;;  %v6883_v47 = vcombine.low %v2855_v8, %v2864_v20  ;;  %v2161_v6 = vrot.slane %v2159_v62, 4  ;;  %v2880_v36 = vshrl.u32 %v8951_v28, 16  ;;  %v8960_v9 = vld [vmem:[#allocation8 + $0x1b8] sm:$0xff]  }
 0x1b0   : > { %v6844_v43 = vcombine.low %v2134_v22, %v2144_v51  ;;  %v2873_v0 = vrot.slane %v2871_v23, 7  ;;  %v2883_v57 = vshll.u32 %v8951_v28, 16  ;;  %7731 = vmatpush3.bf16.msra.mxu1 %v8110_v29  ;;  %7775 = vmatpush3.bf16.msra.mxu0 %v8114_v59  ;;  %v2153_v40 = vrot.slane %v2152_v14, 4  ;;  %v1974_v29 = vld [vmem:[#allocation2 + $0x84] sm:$0xf] }
 0x1b1   : > { %7694 = vmatprep.mubr.bf16.mxu0 %v6883_v47  ;;  %v2162_v49 = vor.u32 %v2161_v6, %v2157_v61  ;;  %v2170_v25 = vshrl.u32 %v1971_v11, 16  ;;  %v2173_v3 = vshll.u32 %v1971_v11, 16  ;;  %7732 = vmatprep.subr.bf16.mxu1 %v8113_v38  ;;  %v2882_v53 = vrot.slane %v2880_v36, 7  ;;  %v8121_v59 = vld [vmem:[#allocation8 + $0x140] sm:$0xff]   ;;  %v8987_v11 = vld [vmem:[#allocation2 + $0x88] sm:$0xf] }
 0x1b2   : > { %7647 = vmatmul.mubr.bf16.gmra.mxu1 %v6844_v43  ;;  %v2876_v37 = vor.u32 %v2874_v31, %v2873_v0  ;;  %v2878_v55 = vrot.slane %v2873_v0, 4  ;;  %v2179_v33 = vshll.u32 %v1972_v39, 16  ;;  %7776 = vmatprep.subr.bf16.mxu0 %v8116_v16  ;;  %v2158_v15 = vsel %vm8630_vm7, %v2153_v40, %v2157_v61  ;;  %v10535_v43 = vld [vmem:[#allocation18_spill] sm:$0xff] }
 0x1b3   : > { %v2163_v41 = vrot.slane %v2162_v49, 4  ;;  %v2172_v54 = vrot.slane %v2170_v25, 4  ;;  %v2175_v13 = vrot.slane %v2173_v3, 5  ;;  %v2885_v24 = vor.u32 %v2883_v57, %v2882_v53 }
 0x1b4   : > { %v2877_v10 = vsel %vm8542_vm2, %v8659_v50, %v2876_v37  ;;  %v2181_v45 = vrot.slane %v2179_v33, 5  ;;  %v2183_v17 = vshrl.u32 %v1972_v39, 16  ;;  %7733 = vmatpush3.bf16.msra.mxu1 %v8113_v38  ;;  %7777 = vmatpush3.bf16.msra.mxu0 %v8116_v16  ;;  %v2893_v12 = vshrl.u32 %v8962_v5, 16  ;;  %v8985_v38 = vld [vmem:[#allocation8 + $0x1f8] sm:$0xff]   ;;  %v1977_v39 = vld [vmem:[#allocation2 + $0x94] sm:$0xf] }
 0x1b5   : > { %v2168_v35 = vsel %vm8630_vm7, %v2163_v41, %v10533_v18  ;;  %v2176_v21 = vor.u32 %v2175_v13, %v2172_v54  ;;  %v2896_v1 = vshll.u32 %v8962_v5, 16  ;;  %7778 = vmatprep.subr.bf16.mxu0 %v8117_v7  ;;  %7814 = vmatprep.subr.bf16.mxu1 %v8960_v9  ;;  %v2886_v27 = vsel %vm8542_vm2, %v2878_v55, %v2885_v24  ;;  %v10534_v16 = vld [vmem:[#allocation16_spill] sm:$0xff] }
 0x1b6   : > { %v6845_v50 = vcombine.low %v2158_v15, %v2168_v35  ;;  %v2185_v58 = vrot.slane %v2183_v17, 4  ;;  %v2902_v30 = vshrl.u32 %v8966_v46, 16  ;;  %v6884_v42 = vcombine.low %v2877_v10, %v2886_v27  ;;  %v1978_v37 = vld [vmem:[#allocation2 + $0x98] sm:$0xf]  ;;  %v1979_v10 = vld [vmem:[#allocation2 + $0x9c] sm:$0x1] }
 0x1b7   : > { %v2177_v4 = vrot.slane %v2176_v21, 4  ;;  %v2895_v63 = vrot.slane %v2893_v12, 7  ;;  %v2905_v26 = vshll.u32 %v8966_v46, 16  ;;  %v2194_v60 = vshrl.u32 %v1974_v29, 16  ;;  %v9004_v12 = vld [vmem:[#allocation2 + $0x94] sm:$0xf] }
 0x1b8   : > { %7650 = vmatprep.mubr.bf16.mxu1 %v6845_v50  ;;  %v2186_v52 = vor.u32 %v2185_v58, %v2181_v45  ;;  %v2904_v22 = vrot.slane %v2902_v30, 7  ;;  %v2197_v34 = vshll.u32 %v1974_v29, 16  ;;  %7779 = vmatpush3.bf16.msra.mxu0 %v8117_v7  ;;  %v2203_v62 = vshll.u32 %v1975_v19, 16  ;;  %v10536_v29 = vld [vmem:[#allocation17_spill] sm:$0xff] }
 0x1b9   : > { %7695 = vmatmul.mubr.bf16.gmra.mxu0 %v6884_v42  ;;  %v2182_v48 = vsel %vm8630_vm7, %v2177_v4, %v2181_v45  ;;  %v2898_v8 = vor.u32 %v2896_v1, %v2895_v63  ;;  %v2900_v2 = vrot.slane %v2895_v63, 4  ;;  %7780 = vmatprep.subr.bf16.mxu0 %v8121_v59  ;;  %v2196_v23 = vrot.slane %v2194_v60, 4  ;;  %v2731_v45 = vld [vmem:[#allocation2 + $0x90] sm:$0x8] }
 0x1ba   : > { %v2187_v20 = vrot.slane %v2186_v52, 4  ;;  %v2907_v61 = vor.u32 %v2905_v26, %v2904_v22  ;;  %v2199_v31 = vrot.slane %v2197_v34, 5  ;;  %v2205_v47 = vrot.slane %v2203_v62, 5  ;;  %v10537_v4 = vld [vmem:[#allocation19_spill] sm:$0xff]  ;;  %v9012_v22 = vld [vmem:[#allocation2 + $0x98] sm:$0xf] }
 0x1bb   : > { %v2899_v51 = vsel %vm8542_vm2, %v10534_v16, %v2898_v8  ;;  %v2207_v14 = vshrl.u32 %v1975_v19, 16  ;;  %v2915_v6 = vshrl.u32 %v8981_v32, 16  ;;  %v2918_v40 = vshll.u32 %v8981_v32, 16  ;;  %v1980_v34 = vld [vmem:[#allocation2 + $0xa4] sm:$0xf] }
 0x1bc   : > { %v2192_v0 = vsel %vm8630_vm7, %v2187_v20, %v10535_v43  ;;  %v2908_v36 = vsel %vm8542_vm2, %v2900_v2, %v2907_v61  ;;  %v2200_v57 = vor.u32 %v2199_v31, %v2196_v23  ;;  %7781 = vmatpush3.bf16.msra.mxu0 %v8121_v59  ;;  %v2924_v53 = vshrl.u32 %v8987_v11, 16  ;;  %v1981_v16 = vld [vmem:[#allocation2 + $0xa8] sm:$0xf] }
 0x1bd   : > { %v6846_v49 = vcombine.low %v2182_v48, %v2192_v0  ;;  %v6885_v25 = vcombine.low %v2899_v51, %v2908_v36  ;;  %v2209_v3 = vrot.slane %v2207_v14, 4  ;;  %v2917_v7 = vrot.slane %v2915_v6, 7  ;;  %7862 = vmatprep.subr.bf16.mxu0 %v8985_v38  ;;  %v1982_v6 = vld [vmem:[#allocation2 + $0xac] sm:$0x1] }
 0x1be   : > { %v2201_v55 = vrot.slane %v2200_v57, 4  ;;  %v2927_v33 = vshll.u32 %v8987_v11, 16  ;;  %v2218_v15 = vshrl.u32 %v1977_v39, 16  ;;  %v2221_v24 = vshll.u32 %v1977_v39, 16 }
 0x1bf   : > { %7651 = vmatmul.mubr.bf16.gmra.mxu1 %v6846_v49  ;;  %7698 = vmatprep.mubr.bf16.mxu0 %v6885_v25  ;;  %v2210_v41 = vor.u32 %v2209_v3, %v2205_v47  ;;  %v2920_v54 = vor.u32 %v2918_v40, %v2917_v7  ;;  %v2922_v13 = vrot.slane %v2917_v7, 4  ;;  %v2926_v18 = vrot.slane %v2924_v53, 7  ;;  %v2734_v40 = vld [vmem:[#allocation2 + $0xa0] sm:$0x8] }
 0x1c0   : > { %v2206_v17 = vsel %vm8630_vm7, %v2201_v55, %v2205_v47  ;;  %v2220_v35 = vrot.slane %v2218_v15, 4  ;;  %v2227_v21 = vshll.u32 %v1978_v37, 16  ;;  %v2223_v50 = vrot.slane %v2221_v24, 5 }
 0x1c1   : > { %v2211_v1 = vrot.slane %v2210_v41, 4  ;;  %v2921_v59 = vsel %vm8542_vm2, %v10536_v29, %v2920_v54  ;;  %v2231_v27 = vshrl.u32 %v1978_v37, 16  ;;  %v2929_v58 = vor.u32 %v2927_v33, %v2926_v18  ;;  %v9022_v37 = vld [vmem:[#allocation2 + $0xa4] sm:$0xf]  ;;  %v9026_v41 = vld [vmem:[#allocation2 + $0xa8] sm:$0xf] }
 0x1c2   : > { %v2229_v30 = vrot.slane %v2227_v21, 5  ;;  %v2237_v19 = vshll.u32 %v1979_v10, 16  ;;  %v2932_v42 = vshrl.u32 %v2731_v45, 16  ;;  %v2224_v26 = vor.u32 %v2223_v50, %v2220_v35  ;;  %v345_v21 = vld [vmem:[#allocation2 + $0xbc] sm:$0x1] }
 0x1c3   : > { %v2216_v63 = vsel %vm8630_vm7, %v2211_v1, %v10537_v4  ;;  %v2233_v52 = vrot.slane %v2231_v27, 4  ;;  %v2937_v60 = vshrl.u32 %v9004_v12, 16  ;;  %v2930_v8 = vsel %vm8542_vm2, %v2922_v13, %v2929_v58  ;;  %v1983_v27 = vld [vmem:[#allocation2 + $0xb4] sm:$0xf]  ;;  %v1984_v4 = vld [vmem:[#allocation2 + $0xb8] sm:$0xf] }
 0x1c4   : > { %v6847_v48 = vcombine.low %v2206_v17, %v2216_v63  ;;  %v2239_v2 = vrot.slane %v2237_v19, 5  ;;  %v6871_v62 = vrot.slane %v2932_v42, 11  ;;  %v6886_v20 = vcombine.low %v2921_v59, %v2930_v8 }
 0x1c5   : > { %v2225_v61 = vrot.slane %v2224_v26, 4  ;;  %v2234_v23 = vor.u32 %v2233_v52, %v2229_v30  ;;  %v2939_v31 = vrot.slane %v2937_v60, 7  ;;  %v2940_v51 = vshll.u32 %v9004_v12, 16 }
 0x1c6   : > { %7654 = vmatprep.mubr.bf16.mxu1 %v6847_v48  ;;  %v2946_v47 = vshrl.u32 %v9012_v22, 16  ;;  %v2949_v14 = vshll.u32 %v9012_v22, 16  ;;  %v2242_v39 = vshrl.u32 %v1980_v34, 16  ;;  %7699 = vmatmul.mubr.bf16.gmra.mxu0 %v6886_v20  ;;  %v2245_v57 = vshll.u32 %v1980_v34, 16 }
 0x1c7   : > { %v2230_v43 = vsel %vm8630_vm7, %v2225_v61, %v2229_v30  ;;  %v2235_v0 = vrot.slane %v2234_v23, 4  ;;  %v2944_v36 = vrot.slane %v2939_v31, 4  ;;  %v2942_v49 = vor.u32 %v2940_v51, %v2939_v31  ;;  %v9040_v51 = vld [vmem:[#allocation2 + $0xb4] sm:$0xf] }
 0x1c8   : > { %v2948_v25 = vrot.slane %v2946_v47, 7  ;;  %v2244_v3 = vrot.slane %v2242_v39, 4  ;;  %v2251_v7 = vshll.u32 %v1981_v16, 16  ;;  %v2247_v53 = vrot.slane %v2245_v57, 5 }
 0x1c9   : > { %v2240_v55 = vsel %vm8630_vm7, %v2235_v0, %v2239_v2  ;;  %v2255_v33 = vshrl.u32 %v1981_v16, 16  ;;  %v2261_v15 = vshll.u32 %v1982_v6, 16  ;;  %v2943_v13 = vsel %vm8542_vm2, %v6871_v62, %v2942_v49  ;;  %v2737_v16 = vld [vmem:[#allocation2 + $0xb0] sm:$0x8]  ;;  %v351_v49 = vld [vmem:[#allocation2 + $0xcc] sm:$0x1] }
 0x1ca   : > { %v6848_v54 = vcombine.low %v2230_v43, %v2240_v55  ;;  %v2951_v10 = vor.u32 %v2949_v14, %v2948_v25  ;;  %v2253_v24 = vrot.slane %v2251_v7, 5  ;;  %v2248_v45 = vor.u32 %v2247_v53, %v2244_v3  ;;  %v9044_v43 = vld [vmem:[#allocation2 + $0xb8] sm:$0xf]  ;;  %v1986_v53 = vld [vmem:[#allocation2 + $0xc4] sm:$0xf] }
 0x1cb   : > { %v2257_v17 = vrot.slane %v2255_v33, 4  ;;  %v2263_v18 = vrot.slane %v2261_v15, 5  ;;  %v2954_v35 = vshrl.u32 %v2734_v40, 16  ;;  %v2959_v29 = vshrl.u32 %v9022_v37, 16 }
 0x1cc   : > { %7655 = vmatmul.mubr.bf16.gmra.mxu1 %v6848_v54  ;;  %v2952_v1 = vsel %vm8542_vm2, %v2944_v36, %v2951_v10  ;;  %v2962_v59 = vshll.u32 %v9022_v37, 16  ;;  %v2968_v50 = vshrl.u32 %v9026_v41, 16  ;;  %v2249_v30 = vrot.slane %v2248_v45, 4  ;;  %v1987_v10 = vld [vmem:[#allocation2 + $0xc8] sm:$0xf] }
 0x1cd   : > { %v6887_v58 = vcombine.low %v2943_v13, %v2952_v1  ;;  %v2258_v19 = vor.u32 %v2257_v17, %v2253_v24  ;;  %v6872_v42 = vrot.slane %v2954_v35, 11  ;;  %v2961_v63 = vrot.slane %v2959_v29, 7  ;;  %v2740_v35 = vld [vmem:[#allocation2 + $0xc0] sm:$0x8] }
 0x1ce   : > { %v2970_v26 = vrot.slane %v2968_v50, 7  ;;  %v2971_v52 = vshll.u32 %v9026_v41, 16  ;;  %v346_v34 = vsel %vm8553_vm4, 0, %v345_v21  ;;  %v2254_v48 = vsel %vm8630_vm7, %v2249_v30, %v2253_v24 }
 0x1cf   : > { %7702 = vmatprep.mubr.bf16.mxu0 %v6887_v58  ;;  %v2259_v8 = vrot.slane %v2258_v19, 4  ;;  %347 = vst [vmem:[#allocation2 + $0xbc] sm:$0x1] %v346_v34  ;;  %v2266_v2 = vshrl.u32 %v1983_v27, 16  ;;  %v2269_v62 = vshll.u32 %v1983_v27, 16  ;;  %v2964_v20 = vor.u32 %v2962_v59, %v2961_v63 }
 0x1d0   : > { %v2966_v61 = vrot.slane %v2961_v63, 4  ;;  %v2973_v23 = vor.u32 %v2971_v52, %v2970_v26  ;;  %v2275_v31 = vshll.u32 %v1984_v4, 16  ;;  %v2279_v39 = vshrl.u32 %v1984_v4, 16 }
 0x1d1   : > { %v2264_v47 = vsel %vm8630_vm7, %v2259_v8, %v2263_v18  ;;  %v2268_v14 = vrot.slane %v2266_v2, 4  ;;  %v2271_v6 = vrot.slane %v2269_v62, 5  ;;  %v2965_v36 = vsel %vm8542_vm2, %v6872_v42, %v2964_v20  ;;  %v9058_v42 = vld [vmem:[#allocation2 + $0xc4] sm:$0xf] }
 0x1d2   : > { %v6849_v0 = vcombine.low %v2254_v48, %v2264_v47  ;;  %v2974_v57 = vsel %vm8542_vm2, %v2966_v61, %v2973_v23  ;;  %v2277_v40 = vrot.slane %v2275_v31, 5  ;;  %v2281_v7 = vrot.slane %v2279_v39, 4  ;;  %v9064_v61 = vld [vmem:[#allocation2 + $0xc8] sm:$0xf]  ;;  %v357_v39 = vld [vmem:[#allocation2 + $0xdc] sm:$0x1] }
 0x1d3   : > { %v6888_v25 = vcombine.low %v2965_v36, %v2974_v57  ;;  %v2272_v3 = vor.u32 %v2271_v6, %v2268_v14  ;;  %v2976_v55 = vshrl.u32 %v2737_v16, 16  ;;  %v2981_v33 = vshrl.u32 %v9040_v51, 16 }
 0x1d4   : > { %7658 = vmatprep.mubr.bf16.mxu1 %v6849_v0  ;;  %v2984_v15 = vshll.u32 %v9040_v51, 16  ;;  %v2990_v54 = vshrl.u32 %v9044_v43, 16  ;;  %v2993_v13 = vshll.u32 %v9044_v43, 16  ;;  %v2282_v45 = vor.u32 %v2281_v7, %v2277_v40  ;;  %v1989_v0 = vld [vmem:[#allocation2 + $0xd4] sm:$0xf] }
 0x1d5   : > { %7703 = vmatmul.mubr.bf16.gmra.mxu0 %v6888_v25  ;;  %v2273_v24 = vrot.slane %v2272_v3, 4  ;;  %v6873_v17 = vrot.slane %v2976_v55, 11  ;;  %v352_v18 = vsel %vm8553_vm4, 0, %v351_v49  ;;  %v2983_v1 = vrot.slane %v2981_v33, 7  ;;  %v1990_v25 = vld [vmem:[#allocation2 + $0xd8] sm:$0xf] }
 0x1d6   : > { %v1985_v21 = vld [vmem:[#allocation2 + $0xbc] sm:$0x1]  ;;  %v2992_v29 = vrot.slane %v2990_v54, 7  ;;  %353 = vst [vmem:[#allocation2 + $0xcc] sm:$0x1] %v352_v18  ;;  %v2290_v59 = vshrl.u32 %v1986_v53, 16 }
 0x1d7   : > { %v2293_v50 = vshll.u32 %v1986_v53, 16  ;;  %v2278_v27 = vsel %vm8630_vm7, %v2273_v24, %v2277_v40  ;;  %v2283_v58 = vrot.slane %v2282_v45, 4  ;;  %v2285_v30 = vshll.u32 %v1985_v21, 16  ;;  %v2743_v24 = vld [vmem:[#allocation2 + $0xd0] sm:$0x8] }
 0x1d8   : > { %v2299_v19 = vshll.u32 %v1987_v10, 16  ;;  %v2986_v4 = vor.u32 %v2984_v15, %v2983_v1  ;;  %v2988_v63 = vrot.slane %v2983_v1, 4  ;;  %v2995_v26 = vor.u32 %v2993_v13, %v2992_v29  ;;  %v9076_v21 = vld [vmem:[#allocation2 + $0xd4] sm:$0xf] }
 0x1d9   : > { %v2292_v52 = vrot.slane %v2290_v59, 4  ;;  %v2287_v34 = vrot.slane %v2285_v30, 5  ;;  %v2295_v48 = vrot.slane %v2293_v50, 5  ;;  %v2303_v2 = vshrl.u32 %v1987_v10, 16 }
 0x1da   : > { %v2301_v8 = vrot.slane %v2299_v19, 5  ;;  %v2987_v62 = vsel %vm8542_vm2, %v6873_v17, %v2986_v4  ;;  %v2996_v20 = vsel %vm8542_vm2, %v2988_v63, %v2995_v26  ;;  %v2998_v23 = vshrl.u32 %v2740_v35, 16  ;;  %v363_v4 = vld [vmem:[#allocation2 + $0xec] sm:$0x1] }
 0x1db   : > { %v3003_v31 = vshrl.u32 %v9058_v42, 16  ;;  %v2288_v16 = vsel %vm8630_vm7, %v2283_v58, %v2287_v34  ;;  %v6889_v47 = vcombine.low %v2987_v62, %v2996_v20  ;;  %v2296_v14 = vor.u32 %v2295_v48, %v2292_v52  ;;  %v9082_v34 = vld [vmem:[#allocation2 + $0xd8] sm:$0xf] }
 0x1dc   : > { %v2305_v6 = vrot.slane %v2303_v2, 4  ;;  %v6850_v36 = vcombine.low %v2278_v27, %v2288_v16  ;;  %v6874_v57 = vrot.slane %v2998_v23, 11  ;;  %v3006_v49 = vshll.u32 %v9058_v42, 16  ;;  %v1992_v23 = vld [vmem:[#allocation2 + $0xe4] sm:$0xf] }
 0x1dd   : > { %v3005_v40 = vrot.slane %v3003_v31, 7  ;;  %7706 = vmatprep.mubr.bf16.mxu0 %v6889_v47  ;;  %v1988_v3 = vld [vmem:[#allocation2 + $0xcc] sm:$0x1]  ;;  %v2297_v7 = vrot.slane %v2296_v14, 4  ;;  %v3012_v53 = vshrl.u32 %v9064_v61, 16  ;;  %v3015_v33 = vshll.u32 %v9064_v61, 16 }
 0x1de   : > { %v2306_v55 = vor.u32 %v2305_v6, %v2301_v8  ;;  %7659 = vmatmul.mubr.bf16.gmra.mxu1 %v6850_v36  ;;  %v2309_v15 = vshll.u32 %v1988_v3, 16  ;;  %v358_v10 = vsel %vm8553_vm4, 0, %v357_v39  ;;  %v2314_v35 = vshrl.u32 %v1989_v0, 16 }
 0x1df   : > { %v3008_v54 = vor.u32 %v3006_v49, %v3005_v40  ;;  %v3010_v13 = vrot.slane %v3005_v40, 4  ;;  %v2302_v45 = vsel %vm8630_vm7, %v2297_v7, %v2301_v8  ;;  %v3014_v18 = vrot.slane %v3012_v53, 7  ;;  %359 = vst [vmem:[#allocation2 + $0xdc] sm:$0x1] %v358_v10  ;;  %v2746_v40 = vld [vmem:[#allocation2 + $0xe0] sm:$0x8] }
 0x1e0   : > { %v2307_v17 = vrot.slane %v2306_v55, 4  ;;  %v2311_v1 = vrot.slane %v2309_v15, 5  ;;  %v2317_v59 = vshll.u32 %v1989_v0, 16  ;;  %v2323_v50 = vshll.u32 %v1990_v25, 16 }
 0x1e1   : > { %v3009_v29 = vsel %vm8542_vm2, %v6874_v57, %v3008_v54  ;;  %v3017_v27 = vor.u32 %v3015_v33, %v3014_v18  ;;  %v2316_v58 = vrot.slane %v2314_v35, 4  ;;  %v2327_v30 = vshrl.u32 %v1990_v25, 16  ;;  %v1993_v57 = vld [vmem:[#allocation2 + $0xe8] sm:$0xf] }
 0x1e2   : > { %v3020_v19 = vshrl.u32 %v2743_v24, 16  ;;  %v2312_v63 = vsel %vm8630_vm7, %v2307_v17, %v2311_v1  ;;  %v2319_v26 = vrot.slane %v2317_v59, 5  ;;  %v2325_v52 = vrot.slane %v2323_v50, 5  ;;  %v9098_v50 = vld [vmem:[#allocation2 + $0xe8] sm:$0xf] }
 0x1e3   : > { %v3025_v48 = vshrl.u32 %v9076_v21, 16  ;;  %v6851_v8 = vcombine.low %v2302_v45, %v2312_v63  ;;  %v3018_v2 = vsel %vm8542_vm2, %v3010_v13, %v3017_v27  ;;  %v2329_v62 = vrot.slane %v2327_v30, 4  ;;  %v9092_v13 = vld [vmem:[#allocation2 + $0xe4] sm:$0xf] }
 0x1e4   : > { %v6875_v20 = vrot.slane %v3020_v19, 11  ;;  %v6890_v31 = vcombine.low %v3009_v29, %v3018_v2  ;;  %v2320_v16 = vor.u32 %v2319_v26, %v2316_v58  ;;  %v3028_v14 = vshll.u32 %v9076_v21, 16 }
 0x1e5   : > { %v3027_v47 = vrot.slane %v3025_v48, 7  ;;  %7662 = vmatprep.mubr.bf16.mxu1 %v6851_v8  ;;  %v2330_v6 = vor.u32 %v2329_v62, %v2325_v52  ;;  %v3034_v39 = vshrl.u32 %v9082_v34, 16  ;;  %v3037_v0 = vshll.u32 %v9082_v34, 16 }
 0x1e6   : > { %v364_v36 = vsel %vm8553_vm4, 0, %v363_v4  ;;  %7707 = vmatmul.mubr.bf16.gmra.mxu0 %v6890_v31  ;;  %v1991_v49 = vld [vmem:[#allocation2 + $0xdc] sm:$0x1]  ;;  %v2321_v25 = vrot.slane %v2320_v16, 4  ;;  %v2338_v55 = vshrl.u32 %v1992_v23, 16  ;;  %v2341_v54 = vshll.u32 %v1992_v23, 16 }
 0x1e7   : > { %v3030_v3 = vor.u32 %v3028_v14, %v3027_v47  ;;  %v3032_v7 = vrot.slane %v3027_v47, 4  ;;  %365 = vst [vmem:[#allocation2 + $0xec] sm:$0x1] %v364_v36  ;;  %v2331_v53 = vrot.slane %v2330_v6, 4  ;;  %v2333_v33 = vshll.u32 %v1991_v49, 16 }
 0x1e8   : > { %v3036_v15 = vrot.slane %v3034_v39, 7  ;;  %v2326_v10 = vsel %vm8630_vm7, %v2321_v25, %v2325_v52  ;;  %v2340_v45 = vrot.slane %v2338_v55, 4  ;;  %v2347_v17 = vshll.u32 %v1993_v57, 16  ;;  %v369_v52 = vld [vmem:[#allocation2 + $0xfc] sm:$0x1] }
 0x1e9   : > { %v3031_v24 = vsel %vm8542_vm2, %v6875_v20, %v3030_v3  ;;  %v2335_v18 = vrot.slane %v2333_v33, 5  ;;  %v2343_v1 = vrot.slane %v2341_v54, 5  ;;  %v2351_v29 = vshrl.u32 %v1993_v57, 16  ;;  %v1995_v20 = vld [vmem:[#allocation2 + $0xf4] sm:$0xf] }
 0x1ea   : > { %v3039_v35 = vor.u32 %v3037_v0, %v3036_v15  ;;  %v2349_v59 = vrot.slane %v2347_v17, 5  ;;  %v3042_v27 = vshrl.u32 %v2746_v40, 16  ;;  %v3047_v58 = vshrl.u32 %v9092_v13, 16  ;;  %v1996_v23 = vld [vmem:[#allocation2 + $0xf8] sm:$0xf] }
 0x1eb   : > { %v3050_v30 = vshll.u32 %v9092_v13, 16  ;;  %v2336_v19 = vsel %vm8630_vm7, %v2331_v53, %v2335_v18  ;;  %v2344_v63 = vor.u32 %v2343_v1, %v2340_v45  ;;  %v2353_v26 = vrot.slane %v2351_v29, 4  ;;  %v2749_v40 = vld [vmem:[#allocation2 + $0xf0] sm:$0x8]  ;;  %v9112_v55 = vld [vmem:[#allocation2 + $0xf4] sm:$0xf] }
 0x1ec   : > { %v3040_v4 = vsel %vm8542_vm2, %v3032_v7, %v3039_v35  ;;  %v6852_v48 = vcombine.low %v2326_v10, %v2336_v19  ;;  %v6876_v2 = vrot.slane %v3042_v27, 11  ;;  %v3049_v62 = vrot.slane %v3047_v58, 7  ;;  %v9118_v29 = vld [vmem:[#allocation2 + $0xf8] sm:$0xf] }
 0x1ed   : > { %v6891_v8 = vcombine.low %v3031_v24, %v3040_v4  ;;  %v2345_v16 = vrot.slane %v2344_v63, 4  ;;  %v2354_v47 = vor.u32 %v2353_v26, %v2349_v59  ;;  %v3056_v14 = vshrl.u32 %v9098_v50, 16  ;;  %v2752_v4 = vld [vmem:[#allocation2 + $0x100] sm:$0x8] }
 0x1ee   : > { %v1994_v31 = vld [vmem:[#allocation2 + $0xec] sm:$0x1]  ;;  %v3059_v6 = vshll.u32 %v9098_v50, 16  ;;  %7663 = vmatmul.mubr.bf16.gmra.mxu1 %v6852_v48  ;;  %v3052_v0 = vor.u32 %v3050_v30, %v3049_v62  ;;  %v3054_v36 = vrot.slane %v3049_v62, 4  ;;  %v370_v57 = vsel %vm8553_vm4, 0, %v369_v52 }
 0x1ef   : > { %7710 = vmatprep.mubr.bf16.mxu0 %v6891_v8  ;;  %v2357_v39 = vshll.u32 %v1994_v31, 16  ;;  %v2350_v49 = vsel %vm8630_vm7, %v2345_v16, %v2349_v59  ;;  %v2355_v25 = vrot.slane %v2354_v47, 4  ;;  %v3058_v3 = vrot.slane %v3056_v14, 7  ;;  %371 = vst [vmem:[#allocation2 + $0xfc] sm:$0x1] %v370_v57 }
 0x1f0   : > { %v2362_v7 = vshrl.u32 %v1995_v20, 16  ;;  %v3053_v33 = vsel %vm8542_vm2, %v6876_v2, %v3052_v0  ;;  %v2365_v15 = vshll.u32 %v1995_v20, 16  ;;  %v2371_v54 = vshll.u32 %v1996_v23, 16  ;;  %v9124_v8 = vld [vmem:[#allocation2 + $0x104] sm:$0xf] }
 0x1f1   : > { %v2359_v53 = vrot.slane %v2357_v39, 5  ;;  %v3061_v10 = vor.u32 %v3059_v6, %v3058_v3  ;;  %v2375_v45 = vshrl.u32 %v1996_v23, 16  ;;  %v3064_v17 = vshrl.u32 %v2749_v40, 16  ;;  %v8174_v23 = vld [vmem:[#allocation2 + $0x14] sm:$0xf] }
 0x1f2   : > { %v2364_v24 = vrot.slane %v2362_v7, 4  ;;  %v2367_v35 = vrot.slane %v2365_v15, 5  ;;  %v2373_v1 = vrot.slane %v2371_v54, 5  ;;  %v3069_v59 = vshrl.u32 %v9112_v55, 16  ;;  %v8175_v31 = vld [vmem:[#allocation2 + $0x18] sm:$0xf] }
 0x1f3   : > { %v2360_v18 = vsel %vm8630_vm7, %v2355_v25, %v2359_v53  ;;  %v3062_v58 = vsel %vm8542_vm2, %v3054_v36, %v3061_v10  ;;  %v2377_v30 = vrot.slane %v2375_v45, 4  ;;  %v6877_v19 = vrot.slane %v3064_v17, 11  ;;  %v9128_v47 = vld [vmem:[#allocation2 + $0x108] sm:$0xf]  ;;  %v3783_v3 = vld [vmem:[#allocation2 + $0x14] sm:$0xf] }
 0x1f4   : > { %v6853_v27 = vcombine.low %v2350_v49, %v2360_v18  ;;  %v6892_v63 = vcombine.low %v3053_v33, %v3062_v58  ;;  %v2368_v26 = vor.u32 %v2367_v35, %v2364_v24  ;;  %v3071_v52 = vrot.slane %v3069_v59, 7  ;;  %v9138_v18 = vld [vmem:[#allocation2 + $0x24] sm:$0xf]  ;;  %v9140_v35 = vld [vmem:[#allocation2 + $0x28] sm:$0xf] }
 0x1f5   : > { %v3072_v48 = vshll.u32 %v9112_v55, 16  ;;  %v2378_v2 = vor.u32 %v2377_v30, %v2373_v1  ;;  %v3078_v62 = vshrl.u32 %v9118_v29, 16  ;;  %v3081_v20 = vshll.u32 %v9118_v29, 16  ;;  %v3784_v59 = vld [vmem:[#allocation2 + $0x18] sm:$0xf] }
 0x1f6   : > { %7666 = vmatprep.mubr.bf16.mxu1 %v6853_v27  ;;  %v6903_v16 = vcombine.low %v8174_v23, %v8175_v31  ;;  %7711 = vmatmul.mubr.bf16.gmra.mxu0 %v6892_v63  ;;  %v1997_v14 = vld [vmem:[#allocation2 + $0xfc] sm:$0x1]  ;;  %v2369_v6 = vrot.slane %v2368_v26, 4  ;;  %v3076_v0 = vrot.slane %v3071_v52, 4  ;;  %v3086_v36 = vshrl.u32 %v2752_v4, 16 }
 0x1f7   : > { %v3074_v39 = vor.u32 %v3072_v48, %v3071_v52  ;;  %v2379_v57 = vrot.slane %v2378_v2, 4  ;;  %v2381_v40 = vshll.u32 %v1997_v14, 16  ;;  %v3080_v49 = vrot.slane %v3078_v62, 7  ;;  %v3785_v26 = vld [vmem:[#allocation2 + $0x1c] sm:$0x1] }
 0x1f8   : > { %v3091_v25 = vshrl.u32 %v9124_v8, 16  ;;  %v2374_v7 = vsel %vm8630_vm7, %v2369_v6, %v2373_v1  ;;  %v6878_v33 = vrot.slane %v3086_v36, 11  ;;  %v3094_v15 = vshll.u32 %v9124_v8, 16  ;;  %v3786_v52 = vld [vmem:[#allocation2 + $0x24] sm:$0xf] }
 0x1f9   : > { %v3075_v53 = vsel %vm8542_vm2, %v6877_v19, %v3074_v39  ;;  %v2383_v54 = vrot.slane %v2381_v40, 5  ;;  %v3083_v10 = vor.u32 %v3081_v20, %v3080_v49  ;;  %v3100_v45 = vshrl.u32 %v9128_v47, 16  ;;  %v3787_v39 = vld [vmem:[#allocation2 + $0x28] sm:$0xf]  ;;  %v8179_v40 = vld [vmem:[#allocation2 + $0x38] sm:$0xf] }
 0x1fa   : > { %v3093_v24 = vrot.slane %v3091_v25, 7  ;;  %v3103_v17 = vshll.u32 %v9128_v47, 16  ;;  %v6904_v1 = vcombine.low %v9138_v18, %v9140_v35  ;;  %v3832_v27 = vshrl.u32 %v3783_v3, 16 }
 0x1fb   : > { %v3835_v58 = vshll.u32 %v3783_v3, 16  ;;  %v2384_v30 = vsel %vm8630_vm7, %v2379_v57, %v2383_v54  ;;  %v3084_v19 = vsel %vm8542_vm2, %v3076_v0, %v3083_v10  ;;  %v3102_v62 = vrot.slane %v3100_v45, 7  ;;  %v8178_v0 = vld [vmem:[#allocation2 + $0x34] sm:$0xf] }
 0x1fc   : > { %v3096_v4 = vor.u32 %v3094_v15, %v3093_v24  ;;  %v3098_v63 = vrot.slane %v3093_v24, 4  ;;  %v6854_v48 = vcombine.low %v2374_v7, %v2384_v30  ;;  %v6893_v2 = vcombine.low %v3075_v53, %v3084_v19  ;;  %v3788_v15 = vld [vmem:[#allocation2 + $0x2c] sm:$0x1]  ;;  %v3790_v19 = vld [vmem:[#allocation2 + $0x38] sm:$0xf] }
 0x1fd   : > { %v3834_v20 = vrot.slane %v3832_v27, 4  ;;  %v3837_v31 = vrot.slane %v3835_v58, 5  ;;  %v3841_v14 = vshll.u32 %v3784_v59, 16  ;;  %v3845_v6 = vshrl.u32 %v3784_v59, 16  ;;  %v3789_v59 = vld [vmem:[#allocation2 + $0x34] sm:$0xf] }
 0x1fe   : > { %v3097_v23 = vsel %vm8542_vm2, %v6878_v33, %v3096_v4  ;;  %7667 = vmatmul.mubr.bf16.gmra.mxu1 %v6854_v48  ;;  %7714 = vmatprep.mubr.bf16.mxu0 %v6893_v2  ;;  %v3105_v36 = vor.u32 %v3103_v17, %v3102_v62  ;;  %v3851_v57 = vshll.u32 %v3785_v26, 16  ;;  %v6905_v49 = vcombine.low %v8178_v0, %v8179_v40  ;;  %v9152_v48 = vld [vmem:[#allocation2 + $0x44] sm:$0xf]  ;;  %v9154_v2 = vld [vmem:[#allocation2 + $0x48] sm:$0xf] }
 0x1ff   : > { %v3856_v25 = vshrl.u32 %v3786_v52, 16  ;;  %7734 = vmatprep.mubr.bf16.mxu1 %v6903_v16  ;;  %v3838_v3 = vor.u32 %v3837_v31, %v3834_v20  ;;  %v3843_v7 = vrot.slane %v3841_v14, 5  ;;  %v3847_v53 = vrot.slane %v3845_v6, 4 }
 0x200   : > { %v3859_v54 = vshll.u32 %v3786_v52, 16  ;;  %v3106_v33 = vsel %vm8542_vm2, %v3098_v63, %v3105_v36  ;;  %v3853_v10 = vrot.slane %v3851_v57, 5  ;;  %v3865_v45 = vshll.u32 %v3787_v39, 16  ;;  %v3791_v36 = vld [vmem:[#allocation2 + $0x3c] sm:$0x1] }
 0x201   : > { %v3858_v24 = vrot.slane %v3856_v25, 4  ;;  %v6894_v27 = vcombine.low %v3097_v23, %v3106_v33  ;;  %v3839_v17 = vrot.slane %v3838_v3, 4  ;;  %v3848_v58 = vor.u32 %v3847_v53, %v3843_v7  ;;  %v8122_v23 = vld [vmem:[#allocation8 + $0x1b0] sm:$0xff]   ;;  %v3792_v53 = vld [vmem:[#allocation2 + $0x44] sm:$0xf] }
 0x202   : > { %v3861_v30 = vrot.slane %v3859_v54, 5  ;;  %v3867_v4 = vrot.slane %v3865_v45, 5  ;;  %v3869_v26 = vshrl.u32 %v3787_v39, 16  ;;  %v3875_v16 = vshll.u32 %v3788_v15, 16 }
 0x203   : > { %v6906_v52 = vcombine.low %v9152_v48, %v9154_v2  ;;  %7715 = vmatmul.mubr.bf16.gmra.mxu0 %v6894_v27  ;;  %v3844_v63 = vsel %vm8630_vm7, %v3839_v17, %v3843_v7  ;;  %v3849_v62 = vrot.slane %v3848_v58, 4  ;;  %v3880_v31 = vshrl.u32 %v3789_v59, 16  ;;  %v8182_v27 = vld [vmem:[#allocation2 + $0x54] sm:$0xf]  ;;  %v8183_v17 = vld [vmem:[#allocation2 + $0x58] sm:$0xf] }
 0x204   : > { %v3862_v20 = vor.u32 %v3861_v30, %v3858_v24  ;;  %v3871_v14 = vrot.slane %v3869_v26, 4  ;;  %v3877_v6 = vrot.slane %v3875_v16, 5  ;;  %v3883_v39 = vshll.u32 %v3789_v59, 16  ;;  %v3793_v24 = vld [vmem:[#allocation2 + $0x48] sm:$0xf] }
 0x205   : > { %v3889_v57 = vshll.u32 %v3790_v19, 16  ;;  %v3854_v0 = vsel %vm8630_vm7, %v3849_v62, %v3853_v10  ;;  %v3882_v25 = vrot.slane %v3880_v31, 4  ;;  %v3893_v3 = vshrl.u32 %v3790_v19, 16  ;;  %v8125_v19 = vld [vmem:[#allocation8 + $0x1a8] sm:$0xff]  }
 0x206   : > { %v3863_v40 = vrot.slane %v3862_v20, 4  ;;  %7735 = vmatmul.mubr.bf16.vlgmr.msra.gmra.mxu1 %v6904_v1  ;;  %v6927_v7 = vcombine.low %v3844_v63, %v3854_v0  ;;  %v3872_v15 = vor.u32 %v3871_v14, %v3867_v4  ;;  %v3885_v54 = vrot.slane %v3883_v39, 5  ;;  %v3794_v63 = vld [vmem:[#allocation2 + $0x4c] sm:$0x1]  ;;  %v3795_v14 = vld [vmem:[#allocation2 + $0x54] sm:$0xf] }
 0x207   : > { %v3891_v33 = vrot.slane %v3889_v57, 5  ;;  %7815 = vmatpush3.bf16.msra.mxu1 %v8960_v9  ;;  %7738 = vmatprep.mubr.bf16.mxu1 %v6905_v49  ;;  %v3895_v10 = vrot.slane %v3893_v3, 4  ;;  %v3899_v59 = vshll.u32 %v3791_v36, 16  ;;  %v6907_v58 = vcombine.low %v8182_v27, %v8183_v17  ;;  %v8138_v27 = vld [vmem:[#allocation8 + $0x1f0] sm:$0xff]  }
 0x208   : > { %v3868_v45 = vsel %vm8630_vm7, %v3863_v40, %v3867_v4  ;;  %7782 = vmatprep.mubr.bf16.mxu0 %v6927_v7  ;;  %v3873_v30 = vrot.slane %v3872_v15, 4  ;;  %7816 = vmatprep.subr.bf16.mxu1 %v8122_v23  ;;  %v3886_v18 = vor.u32 %v3885_v54, %v3882_v25  ;;  %v3904_v35 = vshrl.u32 %v3792_v53, 16  ;;  %v3796_v40 = vld [vmem:[#allocation2 + $0x58] sm:$0xf]  ;;  %v9172_v7 = vld [vmem:[#allocation2 + $0x64] sm:$0xf] }
 0x209   : > { %v3907_v1 = vshll.u32 %v3792_v53, 16  ;;  %v3896_v26 = vor.u32 %v3895_v10, %v3891_v33  ;;  %v3901_v16 = vrot.slane %v3899_v59, 5  ;;  %v3913_v9 = vshll.u32 %v3793_v24, 16  ;;  %v3798_v15 = vld [vmem:[#allocation2 + $0x64] sm:$0xf] }
 0x20a   : > { %v3917_v49 = vshrl.u32 %v3793_v24, 16  ;;  %v3878_v4 = vsel %vm8630_vm7, %v3873_v30, %v3877_v6  ;;  %v3887_v62 = vrot.slane %v3886_v18, 4  ;;  %v3906_v20 = vrot.slane %v3904_v35, 4  ;;  %v8128_v54 = vld [vmem:[#allocation8 + $0x1a0] sm:$0xff]   ;;  %v3799_v35 = vld [vmem:[#allocation2 + $0x68] sm:$0xf] }
 0x20b   : > { %v3909_v31 = vrot.slane %v3907_v1, 5  ;;  %v6928_v36 = vcombine.low %v3868_v45, %v3878_v4  ;;  %v3897_v39 = vrot.slane %v3896_v26, 4  ;;  %7817 = vmatpush3.bf16.msra.mxu1 %v8122_v23  ;;  %v3915_v57 = vrot.slane %v3913_v9, 5  ;;  %v3797_v45 = vld [vmem:[#allocation2 + $0x5c] sm:$0x1]  ;;  %v8140_v9 = vld [vmem:[#allocation8 + $0x1e8] sm:$0xff]  }
 0x20c   : > { %v3919_v0 = vrot.slane %v3917_v49, 4  ;;  %v3892_v25 = vsel %vm8630_vm7, %v3887_v62, %v3891_v33  ;;  %v3923_v53 = vshll.u32 %v3794_v63, 16  ;;  %7818 = vmatprep.subr.bf16.mxu1 %v8125_v19  ;;  %v6908_v6 = vcombine.low %v9172_v7, %v8951_v28  ;;  %v8131_v4 = vld [vmem:[#allocation8 + $0x198] sm:$0xff]  }
 0x20d   : > { %v3910_v3 = vor.u32 %v3909_v31, %v3906_v20  ;;  %7783 = vmatmul.mubr.bf16.vlgmr.msra.gmra.mxu0 %v6928_v36  ;;  %v3902_v23 = vsel %vm8630_vm7, %v3897_v39, %v3901_v16  ;;  %v3928_v10 = vshrl.u32 %v3795_v14, 16  ;;  %v3931_v59 = vshll.u32 %v3795_v14, 16 }
 0x20e   : > { %v3920_v24 = vor.u32 %v3919_v0, %v3915_v57  ;;  %7739 = vmatmul.mubr.bf16.gmra.mxu1 %v6906_v52  ;;  %v6929_v33 = vcombine.low %v3892_v25, %v3902_v23  ;;  %v3925_v30 = vrot.slane %v3923_v53, 5  ;;  %v3937_v18 = vshll.u32 %v3796_v40, 16  ;;  %7863 = vmatpush3.bf16.msra.mxu0 %v8985_v38  ;;  %v3801_v0 = vld [vmem:[#allocation2 + $0x74] sm:$0xf]  ;;  %v3802_v53 = vld [vmem:[#allocation2 + $0x78] sm:$0xf] }
 0x20f   : > { %v3911_v17 = vrot.slane %v3910_v3, 4  ;;  %7742 = vmatprep.mubr.bf16.mxu1 %v6907_v58  ;;  %v3930_v26 = vrot.slane %v3928_v10, 4  ;;  %v3933_v16 = vrot.slane %v3931_v59, 5  ;;  %v3941_v63 = vshrl.u32 %v3796_v40, 16  ;;  %7819 = vmatpush3.bf16.msra.mxu1 %v8125_v19  ;;  %v9186_v62 = vpop.f32.mrf.mxu1  ;;  %v3800_v19 = vld [vmem:[#allocation2 + $0x6c] sm:$0x1] }
 0x210   : > { %v3921_v1 = vrot.slane %v3920_v24, 4  ;;  %7786 = vmatprep.mubr.bf16.mxu0 %v6929_v33  ;;  %v3939_v48 = vrot.slane %v3937_v18, 5  ;;  %v3947_v2 = vshll.u32 %v3797_v45, 16  ;;  %v6909_v52 = vcombine.low %v8962_v5, %v8966_v46  ;;  %7820 = vmatprep.subr.bf16.mxu1 %v8128_v54  ;;  %v8143_v59 = vld [vmem:[#allocation8 + $0x1e0] sm:$0xff]  }
 0x211   : > { %v3916_v49 = vsel %vm8630_vm7, %v3911_v17, %v3915_v57  ;;  %v3934_v58 = vor.u32 %v3933_v16, %v3930_v26  ;;  %v3943_v20 = vrot.slane %v3941_v63, 4  ;;  %v3952_v31 = vshrl.u32 %v3798_v15, 16  ;;  %7864 = vmatprep.subr.bf16.mxu0 %v8138_v27  ;;  %v9190_v40 = vpop.f32.mrf.mxu1 }
 0x212   : > { %v3926_v38 = vsel %vm8630_vm7, %v3921_v1, %v3925_v30  ;;  %v3949_v36 = vrot.slane %v3947_v2, 5  ;;  %v3955_v39 = vshll.u32 %v3798_v15, 16  ;;  %v3961_v57 = vshll.u32 %v3799_v35, 16  ;;  %7865 = vmatpush3.bf16.msra.mxu0 %v8138_v27  ;;  %v8134_v15 = vld [vmem:[#allocation8 + $0x190] sm:$0xff]   ;;  %v3803_v1 = vld [vmem:[#allocation2 + $0x7c] sm:$0x1] }
 0x213   : > { %v6930_v14 = vcombine.low %v3916_v49, %v3926_v38  ;;  %v3935_v5 = vrot.slane %v3934_v58, 4  ;;  %v3944_v46 = vor.u32 %v3943_v20, %v3939_v48  ;;  %v3954_v25 = vrot.slane %v3952_v31, 4  ;;  %7821 = vmatpush3.bf16.msra.mxu1 %v8128_v54  ;;  %7866 = vmatprep.subr.bf16.mxu0 %v8140_v9  ;;  %v9194_v33 = vpop.f32.mrf.mxu1  ;;  %v3804_v58 = vld [vmem:[#allocation2 + $0x84] sm:$0xf]  ;;  %v9205_v20 = vld [vmem:[#allocation8 + $0x1d8] sm:$0xff]  }
 0x214   : > { %v3965_v3 = vshrl.u32 %v3799_v35, 16  ;;  %v3957_v23 = vrot.slane %v3955_v39, 5  ;;  %v3963_v24 = vrot.slane %v3961_v57, 5  ;;  %v3971_v45 = vshll.u32 %v3800_v19, 16  ;;  %7822 = vmatprep.subr.bf16.mxu1 %v8131_v4 }
 0x215   : > { %v6910_v10 = vcombine.low %v8981_v32, %v8987_v11  ;;  %7787 = vmatmul.mubr.bf16.gmra.mxu0 %v6930_v14  ;;  %v3940_v27 = vsel %vm8630_vm7, %v3935_v5, %v3939_v48  ;;  %v3945_v17 = vrot.slane %v3944_v46, 4  ;;  %v3976_v18 = vshrl.u32 %v3801_v0, 16  ;;  %v9201_v63 = vpop.f32.mrf.mxu1  ;;  %v8139_v14 = vld [vmem:[#allocation8 + $0x188] sm:$0xff]   ;;  %v3810_v32 = vld [vmem:[#allocation2 + $0xa4] sm:$0xf] }
 0x216   : > { %v3967_v30 = vrot.slane %v3965_v3, 4  ;;  %7743 = vmatmul.mubr.bf16.gmra.mxu1 %v6908_v6  ;;  %v3958_v54 = vor.u32 %v3957_v23, %v3954_v25  ;;  %v3973_v35 = vrot.slane %v3971_v45, 5  ;;  %v3979_v26 = vshll.u32 %v3801_v0, 16  ;;  %7867 = vmatpush3.bf16.msra.mxu0 %v8140_v9  ;;  %v9207_v28 = vpop.f32.mrf.mxu0  ;;  %v3805_v9 = vld [vmem:[#allocation2 + $0x88] sm:$0xf] }
 0x217   : > { %v3985_v16 = vshll.u32 %v3802_v53, 16  ;;  %v3950_v49 = vsel %vm8630_vm7, %v3945_v17, %v3949_v36  ;;  %7746 = vmatprep.mubr.bf16.mxu1 %v6909_v52  ;;  %v3978_v2 = vrot.slane %v3976_v18, 4  ;;  %v3989_v38 = vshrl.u32 %v3802_v53, 16  ;;  %7823 = vmatpush3.bf16.msra.mxu1 %v8131_v4  ;;  %v9209_v39 = vpop.f32.mrf.mxu1  ;;  %v3806_v25 = vld [vmem:[#allocation2 + $0x8c] sm:$0x1] }
 0x218   : > { %v3968_v48 = vor.u32 %v3967_v30, %v3963_v24  ;;  %v6931_v7 = vcombine.low %v3940_v27, %v3950_v49  ;;  %v3959_v6 = vrot.slane %v3958_v54, 4  ;;  %v3981_v19 = vrot.slane %v3979_v26, 5  ;;  %7824 = vmatprep.subr.bf16.mxu1 %v8134_v15  ;;  %7868 = vmatprep.subr.bf16.mxu0 %v8143_v59  ;;  %v9213_v0 = vpop.f32.mrf.mxu0  ;;  %v3808_v26 = vld [vmem:[#allocation2 + $0x98] sm:$0xf] }
 0x219   : > { %v3987_v31 = vrot.slane %v3985_v16, 5  ;;  %v3991_v36 = vrot.slane %v3989_v38, 4  ;;  %v3995_v57 = vshll.u32 %v3803_v1, 16  ;;  %v6911_v4 = vcombine.low %v9004_v12, %v9012_v22  ;;  %v9217_v23 = vpop.f32.mrf.mxu1  ;;  %v3807_v12 = vld [vmem:[#allocation2 + $0x94] sm:$0xf] }
 0x21a   : > { %v3969_v52 = vrot.slane %v3968_v48, 4  ;;  %7790 = vmatprep.mubr.bf16.mxu0 %v6931_v7  ;;  %v3964_v5 = vsel %vm8630_vm7, %v3959_v6, %v3963_v24  ;;  %v3982_v46 = vor.u32 %v3981_v19, %v3978_v2  ;;  %v4000_v3 = vshrl.u32 %v3804_v58, 16  ;;  %7869 = vmatpush3.bf16.msra.mxu0 %v8143_v59  ;;  %v9222_v22 = vpop.f32.mrf.mxu0  ;;  %v8144_v59 = vld [vmem:[#allocation8 + $0x180] sm:$0xff]   ;;  %v8147_v38 = vld [vmem:[#allocation8 + $0x1d0] sm:$0xff]   ;;  %v3809_v19 = vld [vmem:[#allocation2 + $0x9c] sm:$0x1] }
 0x21b   : > { %v4003_v53 = vshll.u32 %v3804_v58, 16  ;;  %v3992_v27 = vor.u32 %v3991_v36, %v3987_v31  ;;  %v3997_v17 = vrot.slane %v3995_v57, 5  ;;  %v4009_v30 = vshll.u32 %v3805_v9, 16  ;;  %7825 = vmatpush3.bf16.msra.mxu1 %v8134_v15  ;;  %7870 = vmatprep.subr.bf16.mxu0 %v9205_v20  ;;  %v9224_v16 = vpop.f32.mrf.mxu1 }
 0x21c   : > { %v3974_v45 = vsel %vm8630_vm7, %v3969_v52, %v3973_v35  ;;  %v3983_v18 = vrot.slane %v3982_v46, 4  ;;  %v4002_v54 = vrot.slane %v4000_v3, 4  ;;  %7826 = vmatprep.subr.bf16.mxu1 %v8139_v14  ;;  %v4013_v48 = vshrl.u32 %v3805_v9, 16  ;;  %v9228_v15 = vpop.f32.mrf.mxu0 }
 0x21d   : > { %v6932_v24 = vcombine.low %v3964_v5, %v3974_v45  ;;  %v4005_v1 = vrot.slane %v4003_v53, 5  ;;  %v3993_v49 = vrot.slane %v3992_v27, 4  ;;  %v9226_v35 = vrot.slane %v4009_v30, 5  ;;  %v9237_v36 = vpop.f32.mrf.mxu1 }
 0x21e   : > { %v4019_v2 = vshll.u32 %v3806_v25, 16  ;;  %7747 = vmatmul.mubr.bf16.gmra.mxu1 %v6910_v10  ;;  %v3988_v58 = vsel %vm8630_vm7, %v3983_v18, %v3987_v31  ;;  %v6912_v6 = vcombine.low %v9022_v37, %v9026_v41  ;;  %v4024_v52 = vshrl.u32 %v3807_v12, 16  ;;  %10539 = vst [vmem:[#allocation15_spill] sm:$0xff] %v9237_v36  ;;  %v9241_v11 = vpop.f32.mrf.mxu0  ;;  %7871 = vmatpush3.bf16.msra.mxu0 %v9205_v20  ;;  %v9244_v37 = vld [vmem:[#allocation8 + $0x238] sm:$0xff]   ;;  %v3812_v18 = vld [vmem:[#allocation2 + $0xac] sm:$0x1] }
 0x21f   : > { %7791 = vmatmul.mubr.bf16.gmra.mxu0 %v6932_v24  ;;  %v4006_v7 = vor.u32 %v4005_v1, %v4002_v54  ;;  %v3998_v9 = vsel %vm8630_vm7, %v3993_v49, %v3997_v17  ;;  %7750 = vmatprep.mubr.bf16.mxu1 %v6911_v4  ;;  %v4015_v57 = vrot.slane %v4013_v48, 4  ;;  %v4027_v46 = vshll.u32 %v3807_v12, 16  ;;  %v9246_v41 = vpop.f32.mrf.mxu1  ;;  %v3811_v17 = vld [vmem:[#allocation2 + $0xa8] sm:$0xf] }
 0x220   : > { %v4021_v5 = vrot.slane %v4019_v2, 5  ;;  %7827 = vmatpush3.bf16.msra.mxu1 %v8139_v14  ;;  %v6933_v10 = vcombine.low %v3988_v58, %v3998_v9  ;;  %v4026_v25 = vrot.slane %v4024_v52, 4  ;;  %v4033_v3 = vshll.u32 %v3808_v26, 16  ;;  %7872 = vmatprep.subr.bf16.mxu0 %v8147_v38  ;;  %v8148_v14 = vld [vmem:[#allocation8 + $0x1c8] sm:$0xff]   ;;  %v9249_v30 = vpop.f32.mrf.mxu0 }
 0x221   : > { %v4007_v31 = vrot.slane %v4006_v7, 4  ;;  %7828 = vmatprep.subr.bf16.mxu1 %v8144_v59  ;;  %v4016_v4 = vor.u32 %v4015_v57, %v9226_v35  ;;  %v4029_v53 = vrot.slane %v4027_v46, 5  ;;  %v4037_v45 = vshrl.u32 %v3808_v26, 16  ;;  %v9256_v1 = vpop.f32.mrf.mxu1 }
 0x222   : > { %v4043_v27 = vshll.u32 %v3809_v19, 16  ;;  %7794 = vmatprep.mubr.bf16.mxu0 %v6933_v10  ;;  %v4035_v20 = vrot.slane %v4033_v3, 5  ;;  %v6913_v24 = vcombine.low %v9040_v51, %v9044_v43  ;;  %v4048_v54 = vshrl.u32 %v3810_v32, 16  ;;  %v9258_v58 = vpop.f32.mrf.mxu0  ;;  %7873 = vmatpush3.bf16.msra.mxu0 %v8147_v38  ;;  %v3813_v10 = vld [vmem:[#allocation2 + $0xb4] sm:$0xf] }
 0x223   : > { %v4012_v12 = vsel %vm8630_vm7, %v4007_v31, %v9226_v35  ;;  %v4017_v26 = vrot.slane %v4016_v4, 4  ;;  %v4030_v49 = vor.u32 %v4029_v53, %v4026_v25  ;;  %v4039_v48 = vrot.slane %v4037_v45, 4  ;;  %v9261_v35 = vpop.f32.mrf.mxu1  ;;  %v3814_v31 = vld [vmem:[#allocation2 + $0xb8] sm:$0xf]  ;;  %7874 = vmatprep.subr.bf16.mxu0 %v8148_v14  ;;  %v3815_v4 = vld [vmem:[#allocation2 + $0xbc] sm:$0x1] }
 0x224   : > { %v4045_v2 = vrot.slane %v4043_v27, 5  ;;  %7829 = vmatpush3.bf16.msra.mxu1 %v8144_v59  ;;  %v4050_v7 = vrot.slane %v4048_v54, 4  ;;  %v4051_v19 = vshll.u32 %v3810_v32, 16  ;;  %v4057_v52 = vshll.u32 %v3811_v17, 16  ;;  %v9265_v59 = vpop.f32.mrf.mxu0  ;;  %v8151_v53 = vld [vmem:[#allocation8 + $0x1c0] sm:$0xff]  }
 0x225   : > { %v4061_v9 = vshrl.u32 %v3811_v17, 16  ;;  %7910 = vmatprep.subr.bf16.mxu1 %v9244_v37  ;;  %v4022_v51 = vsel %vm8630_vm7, %v4017_v26, %v4021_v5  ;;  %v4031_v43 = vrot.slane %v4030_v49, 4  ;;  %v4040_v57 = vor.u32 %v4039_v48, %v4035_v20  ;;  %10540 = vst [vmem:[#allocation16_spill] sm:$0xff] %v9265_v59  ;;  %v9267_v45 = vpop.f32.mrf.mxu1 }
 0x226   : > { %v4067_v46 = vshll.u32 %v3812_v18, 16  ;;  %v6934_v25 = vcombine.low %v4012_v12, %v4022_v51  ;;  %7751 = vmatmul.mubr.bf16.gmra.mxu1 %v6912_v6  ;;  %v4053_v32 = vrot.slane %v4051_v19, 5  ;;  %v4059_v3 = vrot.slane %v4057_v52, 5  ;;  %10541 = vst [vmem:[#allocation18_spill] sm:$0xff] %v9267_v45  ;;  %7875 = vmatpush3.bf16.msra.mxu0 %v8148_v14 }
 0x227   : > { %v4063_v38 = vrot.slane %v4061_v9, 4  ;;  %v4036_v5 = vsel %vm8630_vm7, %v4031_v43, %v4035_v20  ;;  %v4041_v27 = vrot.slane %v4040_v57, 4  ;;  %7754 = vmatprep.mubr.bf16.mxu1 %v6913_v24  ;;  %v6914_v18 = vcombine.low %v9058_v42, %v9064_v61  ;;  %v3816_v9 = vld [vmem:[#allocation2 + $0xc4] sm:$0xf]  ;;  %v3817_v42 = vld [vmem:[#allocation2 + $0xc8] sm:$0xf]  ;;  %7876 = vmatprep.subr.bf16.mxu0 %v8151_v53 }
 0x228   : > { %v4069_v17 = vrot.slane %v4067_v46, 5  ;;  %7795 = vmatmul.mubr.bf16.gmra.mxu0 %v6934_v25  ;;  %v4054_v54 = vor.u32 %v4053_v32, %v4050_v7  ;;  %v4072_v6 = vshrl.u32 %v3813_v10, 16  ;;  %v4075_v26 = vshll.u32 %v3813_v10, 16  ;;  %v9275_v20 = vpop.f32.mrf.mxu0 }
 0x229   : > { %v4064_v12 = vor.u32 %v4063_v38, %v4059_v3  ;;  %v4046_v49 = vsel %vm8630_vm7, %v4041_v27, %v4045_v2  ;;  %v4081_v48 = vshll.u32 %v3814_v31, 16  ;;  %v4085_v19 = vshrl.u32 %v3814_v31, 16  ;;  %v9277_v61 = vpop.f32.mrf.mxu1  ;;  %v3818_v2 = vld [vmem:[#allocation2 + $0xcc] sm:$0x1] }
 0x22a   : > { %v4091_v52 = vshll.u32 %v3815_v4, 16  ;;  %v6935_v24 = vcombine.low %v4036_v5, %v4046_v49  ;;  %v4055_v51 = vrot.slane %v4054_v54, 4  ;;  %v4074_v57 = vrot.slane %v4072_v6, 4  ;;  %v9279_v32 = vpop.f32.mrf.mxu0  ;;  %7877 = vmatpush3.bf16.msra.mxu0 %v8151_v53 }
 0x22b   : > { %v4065_v43 = vrot.slane %v4064_v12, 4  ;;  %v4077_v7 = vrot.slane %v4075_v26, 5  ;;  %v4083_v46 = vrot.slane %v4081_v48, 5  ;;  %v4087_v10 = vrot.slane %v4085_v19, 4  ;;  %v9287_v5 = vpop.f32.mrf.mxu1  ;;  %v3819_v26 = vld [vmem:[#allocation2 + $0xd4] sm:$0xf] }
 0x22c   : > { %v4093_v25 = vrot.slane %v4091_v52, 5  ;;  %7798 = vmatprep.mubr.bf16.mxu0 %v6935_v24  ;;  %v4060_v14 = vsel %vm8630_vm7, %v4055_v51, %v4059_v3  ;;  %v6915_v38 = vcombine.low %v9076_v21, %v9082_v34  ;;  %v4096_v4 = vshrl.u32 %v3816_v9, 16  ;;  %v9289_v49 = vpop.f32.mrf.mxu0 }
 0x22d   : > { %v4070_v31 = vsel %vm8630_vm7, %v4065_v43, %v4069_v17  ;;  %v4078_v54 = vor.u32 %v4077_v7, %v4074_v57  ;;  %v4088_v12 = vor.u32 %v4087_v10, %v4083_v46  ;;  %v4099_v6 = vshll.u32 %v3816_v9, 16  ;;  %v9291_v17 = vpop.f32.mrf.mxu1  ;;  %v3820_v43 = vld [vmem:[#allocation2 + $0xd8] sm:$0xf]  ;;  %v3821_v7 = vld [vmem:[#allocation2 + $0xdc] sm:$0x1] }
 0x22e   : > { %v6936_v27 = vcombine.low %v4060_v14, %v4070_v31  ;;  %7755 = vmatmul.mubr.bf16.gmra.mxu1 %v6914_v18  ;;  %v4098_v48 = vrot.slane %v4096_v4, 4  ;;  %v4105_v3 = vshll.u32 %v3817_v42, 16  ;;  %v4109_v19 = vshrl.u32 %v3817_v42, 16  ;;  %v9295_v9 = vpop.f32.mrf.mxu0 }
 0x22f   : > { %v4115_v52 = vshll.u32 %v3818_v2, 16  ;;  %v4079_v24 = vrot.slane %v4078_v54, 4  ;;  %v4089_v21 = vrot.slane %v4088_v12, 4  ;;  %7758 = vmatprep.mubr.bf16.mxu1 %v6915_v38  ;;  %v4101_v34 = vrot.slane %v4099_v6, 5  ;;  %10542 = vst [vmem:[#allocation17_spill] sm:$0xff] %v9295_v9  ;;  %v9297_v42 = vpop.f32.mrf.mxu1 }
 0x230   : > { %v6916_v51 = vcombine.low %v9092_v13, %v9098_v50  ;;  %7799 = vmatmul.mubr.bf16.gmra.mxu0 %v6936_v27  ;;  %v4107_v53 = vrot.slane %v4105_v3, 5  ;;  %v4111_v57 = vrot.slane %v4109_v19, 4  ;;  %v4120_v10 = vshrl.u32 %v3819_v26, 16  ;;  %10543 = vst [vmem:[#allocation19_spill] sm:$0xff] %v9297_v42  ;;  %v3822_v13 = vld [vmem:[#allocation2 + $0xe4] sm:$0xf] }
 0x231   : > { %v4117_v18 = vrot.slane %v4115_v52, 5  ;;  %v4084_v2 = vsel %vm8630_vm7, %v4079_v24, %v4083_v46  ;;  %v4094_v14 = vsel %vm8630_vm7, %v4089_v21, %v4093_v25  ;;  %v4102_v31 = vor.u32 %v4101_v34, %v4098_v48  ;;  %v3823_v52 = vld [vmem:[#allocation2 + $0xe8] sm:$0xf] }
 0x232   : > { %v4123_v38 = vshll.u32 %v3819_v26, 16  ;;  %v6937_v50 = vcombine.low %v4084_v2, %v4094_v14  ;;  %v4112_v4 = vor.u32 %v4111_v57, %v4107_v53  ;;  %v4122_v54 = vrot.slane %v4120_v10, 4  ;;  %v9303_v9 = vpop.f32.mrf.mxu0 }
 0x233   : > { %v4129_v27 = vshll.u32 %v3820_v43, 16  ;;  %v4103_v12 = vrot.slane %v4102_v31, 4  ;;  %v4133_v3 = vshrl.u32 %v3820_v43, 16  ;;  %v4139_v19 = vshll.u32 %v3821_v7, 16  ;;  %v9307_v26 = vpop.f32.mrf.mxu1  ;;  %v3824_v43 = vld [vmem:[#allocation2 + $0xec] sm:$0x1] }
 0x234   : > { %v4125_v6 = vrot.slane %v4123_v38, 5  ;;  %7802 = vmatprep.mubr.bf16.mxu0 %v6937_v50  ;;  %v4113_v42 = vrot.slane %v4112_v4, 4  ;;  %v6917_v25 = vcombine.low %v9112_v55, %v9118_v29  ;;  %v4144_v48 = vshrl.u32 %v3822_v13, 16  ;;  %v9311_v7 = vpop.f32.mrf.mxu0  ;;  %v3825_v55 = vld [vmem:[#allocation2 + $0xf4] sm:$0xf] }
 0x235   : > { %v4131_v46 = vrot.slane %v4129_v27, 5  ;;  %v4108_v24 = vsel %vm8630_vm7, %v4103_v12, %v4107_v53  ;;  %v4135_v34 = vrot.slane %v4133_v3, 4  ;;  %v4141_v57 = vrot.slane %v4139_v19, 5  ;;  %v9315_v29 = vpop.f32.mrf.mxu1 }
 0x236   : > { %v4126_v21 = vor.u32 %v4125_v6, %v4122_v54  ;;  %v4118_v10 = vsel %vm8630_vm7, %v4113_v42, %v4117_v18  ;;  %7759 = vmatmul.mubr.bf16.gmra.mxu1 %v6916_v51  ;;  %v4146_v2 = vrot.slane %v4144_v48, 4  ;;  %v4147_v14 = vshll.u32 %v3822_v13, 16  ;;  %v3826_v54 = vld [vmem:[#allocation2 + $0xf8] sm:$0xf]  ;;  %v9317_v27 = vpop.f32.mrf.mxu0 }
 0x237   : > { %v4153_v31 = vshll.u32 %v3823_v52, 16  ;;  %v6938_v38 = vcombine.low %v4108_v24, %v4118_v10  ;;  %v4136_v4 = vor.u32 %v4135_v34, %v4131_v46  ;;  %7762 = vmatprep.mubr.bf16.mxu1 %v6917_v25  ;;  %v4157_v53 = vshrl.u32 %v3823_v52, 16  ;;  %v9321_v18 = vpop.f32.mrf.mxu1  ;;  %v4538_v25 = vld [vmem:[#allocation2 + $0x20] sm:$0x8]  ;;  %v3827_v34 = vld [vmem:[#allocation2 + $0xfc] sm:$0x1] }
 0x238   : > { %v4127_v50 = vrot.slane %v4126_v21, 4  ;;  %v4149_v12 = vrot.slane %v4147_v14, 5  ;;  %v4163_v3 = vshll.u32 %v3824_v43, 16  ;;  %v6918_v51 = vcombine.low %v9124_v8, %v9128_v47  ;;  %v9325_v52 = vpop.f32.mrf.mxu0 }
 0x239   : > { %v4155_v6 = vrot.slane %v4153_v31, 5  ;;  %7803 = vmatmul.mubr.bf16.gmra.mxu0 %v6938_v38  ;;  %v4137_v13 = vrot.slane %v4136_v4, 4  ;;  %v4159_v19 = vrot.slane %v4157_v53, 4  ;;  %v4168_v48 = vshrl.u32 %v3825_v55, 16  ;;  %10544 = vst [vmem:[#allocation20_spill] sm:$0xff] %v9325_v52  ;;  %v9327_v14 = vpop.f32.mrf.mxu1 }
 0x23a   : > { %v4132_v42 = vsel %vm8630_vm7, %v4127_v50, %v4131_v46  ;;  %v4150_v24 = vor.u32 %v4149_v12, %v4146_v2  ;;  %v4165_v21 = vrot.slane %v4163_v3, 5  ;;  %v4171_v10 = vshll.u32 %v3825_v55, 16  ;;  %10545 = vst [vmem:[#allocation21_spill] sm:$0xff] %v9327_v14  ;;  %v9331_v46 = vld [vmem:[#allocation2 + $0x24] sm:$0xf] }
 0x23b   : > { %v4177_v43 = vshll.u32 %v3826_v54, 16  ;;  %v4142_v8 = vsel %vm8630_vm7, %v4137_v13, %v4141_v57  ;;  %v4160_v47 = vor.u32 %v4159_v19, %v4155_v6  ;;  %v4170_v31 = vrot.slane %v4168_v48, 4  ;;  %v9333_v3 = vld [vmem:[#allocation2 + $0x28] sm:$0xf]  ;;  %v375_v19 = vld [vmem:[#allocation2 + $0x10c] sm:$0x1] }
 0x23c   : > { %v4181_v38 = vshrl.u32 %v3826_v54, 16  ;;  %v6939_v50 = vcombine.low %v4132_v42, %v4142_v8  ;;  %v4151_v4 = vrot.slane %v4150_v24, 4  ;;  %v4173_v53 = vrot.slane %v4171_v10, 5  ;;  %v9335_v59 = vpop.f32.mrf.mxu0  ;;  %v3828_v48 = vld [vmem:[#allocation2 + $0x104] sm:$0xf] }
 0x23d   : > { %v4179_v45 = vrot.slane %v4177_v43, 5  ;;  %v4161_v52 = vrot.slane %v4160_v47, 4  ;;  %v4187_v12 = vshll.u32 %v3827_v34, 16  ;;  %v4587_v55 = vshrl.u32 %v4538_v25, 16  ;;  %v9341_v24 = vpop.f32.mrf.mxu1 }
 0x23e   : > { %v4183_v2 = vrot.slane %v4181_v38, 4  ;;  %7806 = vmatprep.mubr.bf16.mxu0 %v6939_v50  ;;  %v4156_v57 = vsel %vm8630_vm7, %v4151_v4, %v4155_v6  ;;  %7763 = vmatmul.mubr.bf16.gmra.mxu1 %v6918_v51  ;;  %v4174_v54 = vor.u32 %v4173_v53, %v4170_v31  ;;  %v4592_v13 = vshrl.u32 %v9331_v46, 16  ;;  %10546 = vst [vmem:[#allocation22_spill] sm:$0xff] %v9341_v24  ;;  %v9345_v8 = vpop.f32.mrf.mxu0  ;;  %v3829_v38 = vld [vmem:[#allocation2 + $0x108] sm:$0xf] }
 0x23f   : > { %v4595_v42 = vshll.u32 %v9331_v46, 16  ;;  %v4166_v34 = vsel %vm8630_vm7, %v4161_v52, %v4165_v21  ;;  %v4189_v10 = vrot.slane %v4187_v12, 5  ;;  %v6951_v43 = vrot.slane %v4587_v55, 11  ;;  %v9348_v50 = vpop.f32.mrf.mxu1 }
 0x240   : > { %v4184_v25 = vor.u32 %v4183_v2, %v4179_v45  ;;  %v6940_v47 = vcombine.low %v4156_v57, %v4166_v34  ;;  %v4175_v6 = vrot.slane %v4174_v54, 4  ;;  %v4594_v51 = vrot.slane %v4592_v13, 7  ;;  %10547 = vst [vmem:[#allocation23_spill] sm:$0xff] %v9348_v50  ;;  %v9353_v21 = vpop.f32.mrf.mxu0  ;;  %v4541_v54 = vld [vmem:[#allocation2 + $0x30] sm:$0x8] }
 0x241   : > { %v4601_v31 = vshrl.u32 %v9333_v3, 16  ;;  %v4604_v53 = vshll.u32 %v9333_v3, 16  ;;  %v376_v14 = vsel %vm8553_vm4, 0, %v375_v19  ;;  %v4192_v52 = vshrl.u32 %v3828_v48, 16  ;;  %10548 = vst [vmem:[#allocation24_spill] sm:$0xff] %v9353_v21  ;;  %v9359_v34 = vpop.f32.mrf.mxu1 }
 0x242   : > { %v4185_v4 = vrot.slane %v4184_v25, 4  ;;  %7807 = vmatmul.mubr.bf16.gmra.mxu0 %v6940_v47  ;;  %v4180_v2 = vsel %vm8630_vm7, %v4175_v6, %v4179_v45  ;;  %v4597_v12 = vor.u32 %v4595_v42, %v4594_v51  ;;  %v4599_v55 = vrot.slane %v4594_v51, 4  ;;  %377 = vst [vmem:[#allocation2 + $0x10c] sm:$0x1] %v376_v14  ;;  %v9357_v13 = vld [vmem:[#allocation2 + $0x34] sm:$0xf]  ;;  %v9365_v47 = vpop.f32.mrf.mxu0 }
 0x243   : > { %v4603_v57 = vrot.slane %v4601_v31, 7  ;;  %10549 = vst [vmem:[#allocation25_spill] sm:$0xff] %v9359_v34  ;;  %v4194_v19 = vrot.slane %v4192_v52, 4  ;;  %v4195_v60 = vshll.u32 %v3828_v48, 16  ;;  %v4201_v36 = vshll.u32 %v3829_v38, 16  ;;  %10550 = vst [vmem:[#allocation26_spill] sm:$0xff] %v9365_v47  ;;  %v9369_v51 = vpop.f32.mrf.mxu1 }
 0x244   : > { %v4190_v25 = vsel %vm8630_vm7, %v4185_v4, %v4189_v10  ;;  %v9363_v50 = vld [vmem:[#allocation2 + $0x38] sm:$0xf]  ;;  %v4598_v42 = vsel %vm8542_vm2, %v6951_v43, %v4597_v12  ;;  %v4205_v6 = vshrl.u32 %v3829_v38, 16  ;;  %10551 = vst [vmem:[#allocation27_spill] sm:$0xff] %v9369_v51  ;;  %v4609_v24 = vshrl.u32 %v4541_v54, 16  ;;  %v9372_v4 = vpop.f32.mrf.mxu0 }
 0x245   : > { %v6941_v45 = vcombine.low %v4180_v2, %v4190_v25  ;;  %v4606_v14 = vor.u32 %v4604_v53, %v4603_v57  ;;  %v4197_v31 = vrot.slane %v4195_v60, 5  ;;  %v4203_v34 = vrot.slane %v4201_v36, 5  ;;  %10552 = vst [vmem:[#allocation28_spill] sm:$0xff] %v9372_v4  ;;  %v4544_v53 = vld [vmem:[#allocation2 + $0x40] sm:$0x8]  ;;  %v9378_v38 = vpop.f32.mrf.mxu1 }
 0x246   : > { %v4614_v10 = vshrl.u32 %v9357_v13, 16  ;;  %v4207_v52 = vrot.slane %v4205_v6, 4  ;;  %v4617_v2 = vshll.u32 %v9357_v13, 16  ;;  %v4623_v43 = vshrl.u32 %v9363_v50, 16  ;;  %10553 = vst [vmem:[#allocation29_spill] sm:$0xff] %v9378_v38  ;;  %v9382_v25 = vpop.f32.mrf.mxu0 }
 0x247   : > { %7810 = vmatprep.mubr.bf16.mxu0 %v6941_v45  ;;  %v4607_v48 = vsel %vm8542_vm2, %v4599_v55, %v4606_v14  ;;  %v4198_v60 = vor.u32 %v4197_v31, %v4194_v19  ;;  %v6952_v36 = vrot.slane %v4609_v24, 11  ;;  %v9380_v54 = vld [vmem:[#allocation2 + $0x44] sm:$0xf]  ;;  %10554 = vst [vmem:[#allocation30_spill] sm:$0xff] %v9382_v25  ;;  %v4626_v55 = vshll.u32 %v9363_v50, 16  ;;  %v9387_v6 = vpop.f32.mrf.mxu1 }
 0x248   : > { %v6967_v12 = vcombine.low %v4598_v42, %v4607_v48  ;;  %v4616_v57 = vrot.slane %v4614_v10, 7  ;;  %v4208_v45 = vor.u32 %v4207_v52, %v4203_v34  ;;  %v4625_v51 = vrot.slane %v4623_v43, 7  ;;  %v9385_v14 = vld [vmem:[#allocation2 + $0x48] sm:$0xf]  ;;  %10555 = vst [vmem:[#allocation31_spill] sm:$0xff] %v9387_v6  ;;  %v9389_v24 = vpop.f32.mrf.mxu0 }
 0x249   : > { %v3830_v47 = vld [vmem:[#allocation2 + $0x10c] sm:$0x1]  ;;  %v4199_v4 = vrot.slane %v4198_v60, 4  ;;  %v4631_v19 = vshrl.u32 %v4544_v53, 16  ;;  %v4636_v52 = vshrl.u32 %v9380_v54, 16  ;;  %v9392_v43 = vpop.f32.mrf.mxu1 }
 0x24a   : > { %7830 = vmatprep.mubr.bf16.mxu1 %v6967_v12  ;;  %v4619_v38 = vor.u32 %v4617_v2, %v4616_v57  ;;  %v4621_v42 = vrot.slane %v4616_v57, 4  ;;  %v4209_v31 = vrot.slane %v4208_v45, 4  ;;  %v4211_v10 = vshll.u32 %v3830_v47, 16  ;;  %10556 = vst [vmem:[#allocation32_spill] sm:$0xff] %v9392_v43  ;;  %v9397_v6 = vld [vmem:[#allocation2 + $0x54] sm:$0xf]  ;;  %v9399_v2 = vpop.f32.mrf.mxu0 }
 0x24b   : > { %v4628_v48 = vor.u32 %v4626_v55, %v4625_v51  ;;  %v6953_v21 = vrot.slane %v4631_v19, 11  ;;  %v4639_v12 = vshll.u32 %v9380_v54, 16  ;;  %10557 = vst [vmem:[#allocation33_spill] sm:$0xff] %v9399_v2  ;;  %v4638_v47 = vrot.slane %v4636_v52, 7  ;;  %v4547_v57 = vld [vmem:[#allocation2 + $0x50] sm:$0x8]  ;;  %v9404_v45 = vpop.f32.mrf.mxu1 }
 0x24c   : > { %v4620_v25 = vsel %vm8542_vm2, %v6952_v36, %v4619_v38  ;;  %v4213_v53 = vrot.slane %v4211_v10, 5  ;;  %v4645_v51 = vshrl.u32 %v9385_v14, 16  ;;  %10558 = vst [vmem:[#allocation34_spill] sm:$0xff] %v9404_v45  ;;  %v4204_v38 = vsel %vm8630_vm7, %v4199_v4, %v4203_v34  ;;  %v8153_v10 = vld [vmem:[#allocation8 + $0x230] sm:$0xff]   ;;  %v9414_v2 = vld [vmem:[#allocation2 + $0x58] sm:$0xf] }
 0x24d   : > { %v4629_v60 = vsel %vm8542_vm2, %v4621_v42, %v4628_v48  ;;  %v6991_v55 = vcombine.low %v9331_v46, %v9333_v3  ;;  %v9412_v19 = vadd.f32 %v9207_v28, %v9186_v62  ;;  %v9416_v42 = vpop.f32.mrf.mxu0  ;;  %v4641_v52 = vor.u32 %v4639_v12, %v4638_v47  ;;  %v9421_v4 = vld [vmem:[#allocation2 + $0x64] sm:$0xf]  ;;  %v4553_v43 = vld [vmem:[#allocation2 + $0x70] sm:$0x8] }
 0x24e   : > { %v6968_v36 = vcombine.low %v4620_v25, %v4629_v60  ;;  %v4214_v48 = vsel %vm8630_vm7, %v4209_v31, %v4213_v53  ;;  %v4647_v45 = vrot.slane %v4645_v51, 7  ;;  %v4648_v34 = vshll.u32 %v9385_v14, 16  ;;  %v9423_v25 = vpop.f32.mrf.mxu1  ;;  %v4550_v60 = vld [vmem:[#allocation2 + $0x60] sm:$0x8] }
 0x24f   : > { %10559 = vst [vmem:[#allocation35_spill] sm:$0xff] %v9412_v19  ;;  %10560 = vst [vmem:[#allocation36_spill] sm:$0xff] %v9423_v25  ;;  %v6942_v46 = vcombine.low %v4204_v38, %v4214_v48  ;;  %v4643_v62 = vrot.slane %v4638_v47, 4  ;;  %v4653_v28 = vshrl.u32 %v4547_v57, 16  ;;  %v4658_v3 = vshrl.u32 %v9397_v6, 16  ;;  %v9426_v19 = vpop.f32.mrf.mxu0 }
 0x250   : > { %7831 = vmatmul.mubr.bf16.vlgmr.msra.gmra.mxu1 %v6968_v36  ;;  %v4642_v31 = vsel %vm8542_vm2, %v6953_v21, %v4641_v52  ;;  %v4650_v12 = vor.u32 %v4648_v34, %v4647_v45  ;;  %v4661_v53 = vshll.u32 %v9397_v6, 16  ;;  %v4667_v51 = vshrl.u32 %v9414_v2, 16  ;;  %v9433_v44 = vpop.f32.mrf.mxu1  ;;  %v8156_v21 = vld [vmem:[#allocation8 + $0x228] sm:$0xff]  }
 0x251   : > { %7911 = vmatpush3.bf16.msra.mxu1 %v9244_v37  ;;  %10561 = vst [vmem:[#allocation37_spill] sm:$0xff] %v9433_v44  ;;  %7811 = vmatmul.mubr.bf16.gmra.mxu0 %v6942_v46  ;;  %v6954_v47 = vrot.slane %v4653_v28, 11  ;;  %v4660_v57 = vrot.slane %v4658_v3, 7  ;;  %v4670_v38 = vshll.u32 %v9414_v2, 16  ;;  %v9438_v36 = vadd.f32 %v9213_v0, %v9190_v40  ;;  %v9440_v37 = vld [vmem:[#allocation2 + $0x68] sm:$0xf]  ;;  %v9442_v45 = vpop.f32.mrf.mxu0 }
 0x252   : > { %7912 = vmatprep.subr.bf16.mxu1 %v8153_v10  ;;  %10563 = vst [vmem:[#allocation39_spill] sm:$0xff] %v9442_v45  ;;  %7878 = vmatprep.mubr.bf16.mxu0 %v6991_v55  ;;  %v4651_v48 = vsel %vm8542_vm2, %v4643_v62, %v4650_v12  ;;  %v4669_v52 = vrot.slane %v4667_v51, 7  ;;  %v4675_v34 = vshrl.u32 %v4550_v60, 16  ;;  %v4680_v46 = vshrl.u32 %v9421_v4, 16  ;;  %v9447_v28 = vpop.f32.mrf.mxu1 }
 0x253   : > { %10562 = vst [vmem:[#allocation38_spill] sm:$0xff] %v9438_v36  ;;  %v6969_v3 = vcombine.low %v4642_v31, %v4651_v48  ;;  %v4663_v44 = vor.u32 %v4661_v53, %v4660_v57  ;;  %v4665_v25 = vrot.slane %v4660_v57, 4  ;;  %v9449_v40 = vpop.f32.mrf.mxu0  ;;  %v4683_v45 = vshll.u32 %v9421_v4, 16 }
 0x254   : > { %10564 = vst [vmem:[#allocation40_spill] sm:$0xff] %v9449_v40  ;;  %v4672_v0 = vor.u32 %v4670_v38, %v4669_v52  ;;  %v4682_v36 = vrot.slane %v4680_v46, 7  ;;  %v4689_v55 = vshrl.u32 %v9440_v37, 16  ;;  %v9453_v62 = vpop.f32.mrf.mxu1  ;;  %v6992_v60 = vcombine.low %v9357_v13, %v9363_v50  ;;  %v9470_v13 = vld [vmem:[#allocation2 + $0x78] sm:$0xf] }
 0x255   : > { %7913 = vmatpush3.bf16.msra.mxu1 %v8153_v10  ;;  %10565 = vst [vmem:[#allocation41_spill] sm:$0xff] %v9453_v62  ;;  %7834 = vmatprep.mubr.bf16.mxu1 %v6969_v3  ;;  %v4664_v31 = vsel %vm8542_vm2, %v6954_v47, %v4663_v44  ;;  %v6955_v12 = vrot.slane %v4675_v34, 11  ;;  %v9461_v53 = vadd.f32 %v9222_v22, %v9194_v33  ;;  %v9463_v10 = vld [vmem:[#allocation2 + $0x74] sm:$0xf]  ;;  %v9465_v51 = vpop.f32.mrf.mxu0  ;;  %v4692_v50 = vshll.u32 %v9440_v37, 16  ;;  %v8159_v44 = vld [vmem:[#allocation8 + $0x220] sm:$0xff]  }
 0x256   : > { %7914 = vmatprep.subr.bf16.mxu1 %v8156_v21  ;;  %v4673_v57 = vsel %vm8542_vm2, %v4665_v25, %v4672_v0  ;;  %v4685_v38 = vor.u32 %v4683_v45, %v4682_v36  ;;  %v4691_v48 = vrot.slane %v4689_v55, 7  ;;  %v6993_v33 = vcombine.low %v9380_v54, %v9385_v14  ;;  %v4556_v34 = vld [vmem:[#allocation2 + $0x80] sm:$0x8]  ;;  %v9478_v46 = vpop.f32.mrf.mxu1 }
 0x257   : > { %v6970_v47 = vcombine.low %v4664_v31, %v4673_v57  ;;  %v9476_v22 = vadd.f32 %v9241_v11, %v9209_v39  ;;  %v4697_v52 = vshrl.u32 %v4553_v43, 16  ;;  %v9480_v25 = vpop.f32.mrf.mxu0  ;;  %v4687_v45 = vrot.slane %v4682_v36, 4  ;;  %v9485_v31 = vld [vmem:[#allocation2 + $0x84] sm:$0xf]  ;;  %v9491_v43 = vld [vmem:[#allocation2 + $0x88] sm:$0xf] }
 0x258   : > { %v4694_v3 = vor.u32 %v4692_v50, %v4691_v48  ;;  %v6994_v0 = vcombine.low %v9397_v6, %v9414_v2  ;;  %v4702_v55 = vshrl.u32 %v9463_v10, 16  ;;  %v4686_v39 = vsel %vm8542_vm2, %v6955_v12, %v4685_v38  ;;  %v8162_v36 = vld [vmem:[#allocation8 + $0x218] sm:$0xff]   ;;  %v9493_v57 = vpop.f32.mrf.mxu1 }
 0x259   : > { %7915 = vmatpush3.bf16.msra.mxu1 %v8156_v21  ;;  %7879 = vmatmul.mubr.bf16.vlgmr.msra.gmra.mxu0 %v6992_v60  ;;  %v6956_v11 = vrot.slane %v4697_v52, 11  ;;  %v4705_v54 = vshll.u32 %v9463_v10, 16  ;;  %v4711_v14 = vshrl.u32 %v9470_v13, 16  ;;  %v9495_v6 = vpop.f32.mrf.mxu0  ;;  %v9501_v60 = vadd.f32 %v9249_v30, %v9217_v23  ;;  %v4559_v23 = vld [vmem:[#allocation2 + $0x90] sm:$0x8] }
 0x25a   : > { %7835 = vmatmul.mubr.bf16.gmra.mxu1 %v6970_v47  ;;  %7882 = vmatprep.mubr.bf16.mxu0 %v6993_v33  ;;  %v4695_v2 = vsel %vm8542_vm2, %v4687_v45, %v4694_v3  ;;  %v4704_v21 = vrot.slane %v4702_v55, 7  ;;  %v4719_v12 = vshrl.u32 %v4556_v34, 16  ;;  %v4714_v50 = vshll.u32 %v9470_v13, 16  ;;  %v9505_v52 = vpop.f32.mrf.mxu1 }
 0x25b   : > { %7916 = vmatprep.subr.bf16.mxu1 %v8159_v44  ;;  %v6971_v38 = vcombine.low %v4686_v39, %v4695_v2  ;;  %v4713_v48 = vrot.slane %v4711_v14, 7  ;;  %v4724_v47 = vshrl.u32 %v9485_v31, 16  ;;  %v9507_v62 = vpop.f32.mrf.mxu0  ;;  %v4727_v45 = vshll.u32 %v9485_v31, 16  ;;  %v9515_v14 = vld [vmem:[#allocation2 + $0x94] sm:$0xf] }
 0x25c   : > { %10566 = vst [vmem:[#allocation42_spill] sm:$0xff] %v9507_v62  ;;  %v4707_v33 = vor.u32 %v4705_v54, %v4704_v21  ;;  %v4709_v40 = vrot.slane %v4704_v21, 4  ;;  %v4733_v3 = vshrl.u32 %v9491_v43, 16  ;;  %v6957_v34 = vrot.slane %v4719_v12, 11  ;;  %v8165_v2 = vld [vmem:[#allocation8 + $0x210] sm:$0xff]  }
 0x25d   : > { %7917 = vmatpush3.bf16.msra.mxu1 %v8159_v44  ;;  %7838 = vmatprep.mubr.bf16.mxu1 %v6971_v38  ;;  %v4716_v30 = vor.u32 %v4714_v50, %v4713_v48  ;;  %v4726_v55 = vrot.slane %v4724_v47, 7  ;;  %v9513_v39 = vadd.f32 %v9258_v58, %v9224_v16  ;;  %v6995_v54 = vcombine.low %v9421_v4, %v9440_v37  ;;  %v9524_v12 = vld [vmem:[#allocation2 + $0x98] sm:$0xf]  ;;  %v9532_v4 = vpop.f32.mrf.mxu1 }
 0x25e   : > { %7918 = vmatprep.subr.bf16.mxu1 %v8162_v36  ;;  %v4735_v21 = vrot.slane %v4733_v3, 7  ;;  %v4736_v62 = vshll.u32 %v9491_v43, 16  ;;  %v9522_v44 = vadd.f32 %v9275_v20, %v9246_v41  ;;  %v9526_v38 = vpop.f32.mrf.mxu0  ;;  %v4708_v16 = vsel %vm8542_vm2, %v6956_v11, %v4707_v33  ;;  %10568 = vst [vmem:[#allocation44_spill] sm:$0xff] %v9532_v4  ;;  %v4562_v20 = vld [vmem:[#allocation2 + $0xa0] sm:$0x8] }
 0x25f   : > { %v4717_v58 = vsel %vm8542_vm2, %v4709_v40, %v4716_v30  ;;  %v4729_v48 = vor.u32 %v4727_v45, %v4726_v55  ;;  %v4731_v50 = vrot.slane %v4726_v55, 4  ;;  %v4741_v3 = vshrl.u32 %v4559_v23, 16  ;;  %v9541_v45 = vld [vmem:[#allocation2 + $0xa4] sm:$0xf]  ;;  %v8168_v30 = vld [vmem:[#allocation8 + $0x208] sm:$0xff]  }
 0x260   : > { %10567 = vst [vmem:[#allocation43_spill] sm:$0xff] %v9522_v44  ;;  %v6972_v37 = vcombine.low %v4708_v16, %v4717_v58  ;;  %v4738_v47 = vor.u32 %v4736_v62, %v4735_v21  ;;  %v4746_v41 = vshrl.u32 %v9515_v14, 16  ;;  %v9535_v44 = vpop.f32.mrf.mxu0  ;;  %v4749_v33 = vshll.u32 %v9515_v14, 16  ;;  %v9546_v55 = vld [vmem:[#allocation2 + $0xa8] sm:$0xf] }
 0x261   : > { %7919 = vmatpush3.bf16.msra.mxu1 %v8162_v36  ;;  %7883 = vmatmul.mubr.bf16.gmra.mxu0 %v6994_v0  ;;  %v4730_v11 = vsel %vm8542_vm2, %v6957_v34, %v4729_v48  ;;  %v4755_v40 = vshrl.u32 %v9524_v12, 16  ;;  %v6958_v36 = vrot.slane %v4741_v3, 11  ;;  %v4758_v0 = vshll.u32 %v9524_v12, 16  ;;  %v9559_v3 = vld [vmem:[#allocation2 + $0xb4] sm:$0xf] }
 0x262   : > { %7920 = vmatprep.subr.bf16.mxu1 %v8165_v2  ;;  %7839 = vmatmul.mubr.bf16.gmra.mxu1 %v6972_v37  ;;  %v4739_v62 = vsel %vm8542_vm2, %v4731_v50, %v4738_v47  ;;  %v4748_v23 = vrot.slane %v4746_v41, 7  ;;  %v9550_v16 = vadd.f32 %v9279_v32, %v9256_v1  ;;  %v4763_v58 = vshrl.u32 %v4562_v20, 16  ;;  %v9554_v37 = vpop.f32.mrf.mxu0  ;;  %v4565_v20 = vld [vmem:[#allocation2 + $0xb0] sm:$0x8] }
 0x263   : > { %7886 = vmatprep.mubr.bf16.mxu0 %v6995_v54  ;;  %v6973_v34 = vcombine.low %v4730_v11, %v4739_v62  ;;  %v4757_v21 = vrot.slane %v4755_v40, 7  ;;  %v9552_v48 = vpop.f32.mrf.mxu1  ;;  %v6996_v54 = vcombine.low %v9463_v10, %v9470_v13  ;;  %v4768_v47 = vshrl.u32 %v9541_v45, 16  ;;  %v8171_v40 = vld [vmem:[#allocation8 + $0x200] sm:$0xff]  }
 0x264   : > { %10569 = vst [vmem:[#allocation45_spill] sm:$0xff] %v9550_v16  ;;  %v4751_v50 = vor.u32 %v4749_v33, %v4748_v23  ;;  %v4753_v41 = vrot.slane %v4748_v23, 4  ;;  %v4771_v1 = vshll.u32 %v9541_v45, 16  ;;  %v4777_v32 = vshrl.u32 %v9546_v55, 16  ;;  %v9568_v33 = vld [vmem:[#allocation2 + $0xb8] sm:$0xf] }
 0x265   : > { %7921 = vmatpush3.bf16.msra.mxu1 %v8165_v2  ;;  %7842 = vmatprep.mubr.bf16.mxu1 %v6973_v34  ;;  %v4760_v11 = vor.u32 %v4758_v0, %v4757_v21  ;;  %v6959_v62 = vrot.slane %v4763_v58, 11  ;;  %v4770_v4 = vrot.slane %v4768_v47, 7  ;;  %v4780_v10 = vshll.u32 %v9546_v55, 16  ;;  %v9570_v2 = vpop.f32.mrf.mxu1  ;;  %v9580_v58 = vpop.f32.mrf.mxu0  ;;  %v4568_v16 = vld [vmem:[#allocation2 + $0xc0] sm:$0x8] }
 0x266   : > { %7922 = vmatprep.subr.bf16.mxu1 %v8168_v30  ;;  %v9566_v13 = vadd.f32 %v9289_v49, %v9261_v35  ;;  %v4752_v23 = vsel %vm8542_vm2, %v6958_v36, %v4751_v50  ;;  %v4779_v34 = vrot.slane %v4777_v32, 7  ;;  %v9578_v21 = vadd.f32 %v9303_v9, %v9277_v61  ;;  %v9586_v32 = vld [vmem:[#allocation2 + $0xc4] sm:$0xf] }
 0x267   : > { %v4761_v0 = vsel %vm8542_vm2, %v4753_v41, %v4760_v11  ;;  %v6997_v35 = vcombine.low %v9485_v31, %v9491_v43  ;;  %v4773_v49 = vor.u32 %v4771_v1, %v4770_v4  ;;  %v4775_v36 = vrot.slane %v4770_v4, 4  ;;  %v9594_v4 = vpop.f32.mrf.mxu1 }
 0x268   : > { %10570 = vst [vmem:[#allocation46_spill] sm:$0xff] %v9566_v13  ;;  %v6974_v47 = vcombine.low %v4752_v23, %v4761_v0  ;;  %v4785_v13 = vshrl.u32 %v4565_v20, 16  ;;  %v4782_v50 = vor.u32 %v4780_v10, %v4779_v34  ;;  %v4790_v41 = vshrl.u32 %v9559_v3, 16 }
 0x269   : > { %7923 = vmatpush3.bf16.msra.mxu1 %v8168_v30  ;;  %7887 = vmatmul.mubr.bf16.gmra.mxu0 %v6996_v54  ;;  %v4799_v11 = vshrl.u32 %v9568_v33, 16  ;;  %v4774_v61 = vsel %vm8542_vm2, %v6959_v62, %v4773_v49  ;;  %v4793_v31 = vshll.u32 %v9559_v3, 16  ;;  %v4802_v43 = vshll.u32 %v9568_v33, 16  ;;  %v9592_v30 = vld [vmem:[#allocation2 + $0xc8] sm:$0xf] }
 0x26a   : > { %7924 = vmatprep.subr.bf16.mxu1 %v8171_v40  ;;  %7843 = vmatmul.mubr.bf16.gmra.mxu1 %v6974_v47  ;;  %v6960_v9 = vrot.slane %v4785_v13, 11  ;;  %v4783_v54 = vsel %vm8542_vm2, %v4775_v36, %v4782_v50  ;;  %v4792_v1 = vrot.slane %v4790_v41, 7  ;;  %v9600_v10 = vadd.f32 %v9311_v7, %v9287_v5  ;;  %v9608_v50 = vld [vmem:[#allocation2 + $0xd4] sm:$0xf] }
 0x26b   : > { %7890 = vmatprep.mubr.bf16.mxu0 %v6997_v35  ;;  %v4801_v20 = vrot.slane %v4799_v11, 7  ;;  %v9602_v23 = vpop.f32.mrf.mxu0  ;;  %v6975_v62 = vcombine.low %v4774_v61, %v4783_v54  ;;  %v6998_v13 = vcombine.low %v9515_v14, %v9524_v12  ;;  %v4807_v0 = vshrl.u32 %v4568_v16, 16  ;;  %v4571_v12 = vld [vmem:[#allocation2 + $0xd0] sm:$0x8]  ;;  %v9617_v16 = vpop.f32.mrf.mxu1  ;;  %v9624_v54 = vld [vmem:[#allocation2 + $0xd8] sm:$0xf] }
 0x26c   : > { %v4812_v34 = vshrl.u32 %v9586_v32, 16  ;;  %v4795_v47 = vor.u32 %v4793_v31, %v4792_v1  ;;  %v4797_v35 = vrot.slane %v4792_v1, 4  ;;  %v4821_v36 = vshrl.u32 %v9592_v30, 16  ;;  %10572 = vst [vmem:[#allocation48_spill] sm:$0xff] %v9617_v16  ;;  %v4583_v16 = vld [vmem:[#allocation2 + $0x110] sm:$0x8] }
 0x26d   : > { %7925 = vmatpush3.bf16.msra.mxu1 %v8171_v40  ;;  %v4804_v49 = vor.u32 %v4802_v43, %v4801_v20  ;;  %v9610_v41 = vpop.f32.mrf.mxu0  ;;  %7846 = vmatprep.mubr.bf16.mxu1 %v6975_v62  ;;  %v6961_v5 = vrot.slane %v4807_v0, 11  ;;  %v4815_v11 = vshll.u32 %v9586_v32, 16  ;;  %v9615_v14 = vadd.f32 %v9317_v27, %v9291_v17 }
 0x26e   : > { %v4814_v7 = vrot.slane %v4812_v34, 7  ;;  %v4796_v40 = vsel %vm8542_vm2, %v6960_v9, %v4795_v47  ;;  %v4823_v31 = vrot.slane %v4821_v36, 7  ;;  %v4824_v43 = vshll.u32 %v9592_v30, 16  ;;  %v4574_v47 = vld [vmem:[#allocation2 + $0xe0] sm:$0x8] }
 0x26f   : > { %10571 = vst [vmem:[#allocation47_spill] sm:$0xff] %v9615_v14  ;;  %v4805_v61 = vsel %vm8542_vm2, %v4797_v35, %v4804_v49  ;;  %v6999_v20 = vcombine.low %v9541_v45, %v9546_v55  ;;  %v9630_v27 = vadd.f32 %v9335_v59, %v9307_v26  ;;  %v4829_v0 = vshrl.u32 %v4571_v12, 16  ;;  %v9633_v35 = vpop.f32.mrf.mxu0  ;;  %v9643_v55 = vld [vmem:[#allocation2 + $0xe4] sm:$0xf] }
 0x270   : > { %v6976_v1 = vcombine.low %v4796_v40, %v4805_v61  ;;  %v4817_v17 = vor.u32 %v4815_v11, %v4814_v7  ;;  %v4819_v62 = vrot.slane %v4814_v7, 4  ;;  %v4826_v9 = vor.u32 %v4824_v43, %v4823_v31 }
 0x271   : > { %10573 = vst [vmem:[#allocation49_spill] sm:$0xff] %v9630_v27  ;;  %7891 = vmatmul.mubr.bf16.gmra.mxu0 %v6998_v13  ;;  %v4834_v34 = vshrl.u32 %v9608_v50, 16  ;;  %v9637_v49 = vadd.f32 %v9228_v15, %v9201_v63  ;;  %v4837_v59 = vshll.u32 %v9608_v50, 16  ;;  %v4843_v26 = vshrl.u32 %v9624_v54, 16  ;;  %v9650_v15 = vld [vmem:[#allocation2 + $0xe8] sm:$0xf] }
 0x272   : > { %7847 = vmatmul.mubr.bf16.gmra.mxu1 %v6976_v1  ;;  %7894 = vmatprep.mubr.bf16.mxu0 %v6999_v20  ;;  %v4818_v45 = vsel %vm8542_vm2, %v6961_v5, %v4817_v17  ;;  %v9645_v13 = vpop.f32.mrf.mxu1  ;;  %v4827_v36 = vsel %vm8542_vm2, %v4819_v62, %v4826_v9  ;;  %v6962_v7 = vrot.slane %v4829_v0, 11  ;;  %v4846_v63 = vshll.u32 %v9624_v54, 16  ;;  %v9663_v62 = vld [vmem:[#allocation2 + $0xf4] sm:$0xf]  ;;  %v9665_v9 = vpop.f32.mrf.mxu0 }
 0x273   : > { %v4836_v11 = vrot.slane %v4834_v34, 7  ;;  %v6977_v12 = vcombine.low %v4818_v45, %v4827_v36  ;;  %v4845_v40 = vrot.slane %v4843_v26, 7  ;;  %v9654_v5 = vadd.f32 %v9345_v8, %v9315_v29  ;;  %10575 = vst [vmem:[#allocation51_spill] sm:$0xff] %v9665_v9 }
 0x274   : > { %v4851_v61 = vshrl.u32 %v4574_v47, 16  ;;  %v9656_v31 = vpop.f32.mrf.mxu1  ;;  %v7000_v43 = vcombine.low %v9559_v3, %v9568_v33  ;;  %v7001_v20 = vcombine.low %v9586_v32, %v9592_v30  ;;  %v4856_v17 = vshrl.u32 %v9643_v55, 16  ;;  %v4577_v47 = vld [vmem:[#allocation2 + $0xf0] sm:$0x8]  ;;  %v10576_v32 = vld [vmem:[#allocation24_spill] sm:$0xff] }
 0x275   : > { %10574 = vst [vmem:[#allocation50_spill] sm:$0xff] %v9654_v5  ;;  %v4839_v1 = vor.u32 %v4837_v59, %v4836_v11  ;;  %7850 = vmatprep.mubr.bf16.mxu1 %v6977_v12  ;;  %v4841_v0 = vrot.slane %v4836_v11, 4  ;;  %v4848_v29 = vor.u32 %v4846_v63, %v4845_v40  ;;  %v4859_v8 = vshll.u32 %v9643_v55, 16  ;;  %v9674_v59 = vld [vmem:[#allocation2 + $0xf8] sm:$0xf]  ;;  %v10578_v12 = vld [vmem:[#allocation22_spill] sm:$0xff] }
 0x276   : > { %v4865_v34 = vshrl.u32 %v9650_v15, 16  ;;  %v6963_v45 = vrot.slane %v4851_v61, 11  ;;  %v4858_v3 = vrot.slane %v4856_v17, 7  ;;  %v4868_v33 = vshll.u32 %v9650_v15, 16  ;;  %v9676_v26 = vpop.f32.mrf.mxu1  ;;  %v10579_v40 = vld [vmem:[#allocation28_spill] sm:$0xff] }
 0x277   : > { %v9672_v30 = vadd.f32 %v10576_v32, %v9321_v18  ;;  %v4840_v36 = vsel %vm8542_vm2, %v6962_v7, %v4839_v1  ;;  %v4849_v11 = vsel %vm8542_vm2, %v4841_v0, %v4848_v29  ;;  %v9684_v61 = vadd.f32 %v10579_v40, %v10578_v12  ;;  %v10583_v12 = vld [vmem:[#allocation30_spill] sm:$0xff] }
 0x278   : > { %v4867_v63 = vrot.slane %v4865_v34, 7  ;;  %v6978_v17 = vcombine.low %v4840_v36, %v4849_v11  ;;  %v4861_v9 = vor.u32 %v4859_v8, %v4858_v3  ;;  %v7002_v18 = vcombine.low %v9608_v50, %v9624_v54  ;;  %v4580_v34 = vld [vmem:[#allocation2 + $0x100] sm:$0x8]  ;;  %v9700_v36 = vpop.f32.mrf.mxu1 }
 0x279   : > { %10577 = vst [vmem:[#allocation24_spill] sm:$0xff] %v9672_v30  ;;  %10580 = vst [vmem:[#allocation22_spill] sm:$0xff] %v9684_v61  ;;  %7895 = vmatmul.mubr.bf16.gmra.mxu0 %v7000_v43  ;;  %v4873_v32 = vshrl.u32 %v4577_v47, 16  ;;  %v9688_v30 = vld [vmem:[#allocation2 + $0x104] sm:$0xf]  ;;  %v9690_v5 = vpop.f32.mrf.mxu0  ;;  %v4863_v7 = vrot.slane %v4858_v3, 4 }
 0x27a   : > { %7898 = vmatprep.mubr.bf16.mxu0 %v7001_v20  ;;  %v4870_v1 = vor.u32 %v4868_v33, %v4867_v63  ;;  %v4878_v0 = vshrl.u32 %v9663_v62, 16  ;;  %v4887_v29 = vshrl.u32 %v9674_v59, 16  ;;  %7851 = vmatmul.mubr.bf16.gmra.mxu1 %v6978_v17  ;;  %v4862_v43 = vsel %vm8542_vm2, %v6963_v45, %v4861_v9  ;;  %v9698_v47 = vld [vmem:[#allocation2 + $0x108] sm:$0xf]  ;;  %10581 = vst [vmem:[#allocation28_spill] sm:$0xff] %v9700_v36  ;;  %v10582_v63 = vld [vmem:[#allocation23_spill] sm:$0xff] }
 0x27b   : > { %v6964_v8 = vrot.slane %v4873_v32, 11  ;;  %v4881_v50 = vshll.u32 %v9663_v62, 16  ;;  %v4890_v54 = vshll.u32 %v9674_v59, 16  ;;  %v9702_v20 = vpop.f32.mrf.mxu0  ;;  %v9708_v40 = vadd.f32 %v10583_v12, %v10582_v63 }
 0x27c   : > { %v4871_v3 = vsel %vm8542_vm2, %v4863_v7, %v4870_v1  ;;  %v4880_v33 = vrot.slane %v4878_v0, 7  ;;  %v4889_v11 = vrot.slane %v4887_v29, 7  ;;  %v7003_v45 = vcombine.low %v9643_v55, %v9650_v15  ;;  %v10585_v29 = vld [vmem:[#allocation25_spill] sm:$0xff] }
 0x27d   : > { %10584 = vst [vmem:[#allocation23_spill] sm:$0xff] %v9708_v40  ;;  %v6979_v9 = vcombine.low %v4862_v43, %v4871_v3  ;;  %v4895_v17 = vshrl.u32 %v4580_v34, 16  ;;  %v4900_v32 = vshrl.u32 %v9688_v30, 16  ;;  %v4909_v14 = vshrl.u32 %v9698_v47, 16  ;;  %v9719_v3 = vld [vmem:[#allocation2 + $0x114] sm:$0xf]  ;;  %v9723_v15 = vpop.f32.mrf.mxu0 }
 0x27e   : > { %v4883_v61 = vor.u32 %v4881_v50, %v4880_v33  ;;  %v4885_v36 = vrot.slane %v4880_v33, 4  ;;  %v4892_v27 = vor.u32 %v4890_v54, %v4889_v11  ;;  %v4903_v0 = vshll.u32 %v9688_v30, 16  ;;  %v9730_v11 = vld [vmem:[#allocation2 + $0x118] sm:$0xf] }
 0x27f   : > { %7854 = vmatprep.mubr.bf16.mxu1 %v6979_v9  ;;  %v6965_v7 = vrot.slane %v4895_v17, 11  ;;  %v4902_v1 = vrot.slane %v4900_v32, 7  ;;  %v9717_v43 = vadd.f32 %v9389_v24, %v10585_v29  ;;  %v9721_v55 = vpop.f32.mrf.mxu1  ;;  %v4911_v54 = vrot.slane %v4909_v14, 7  ;;  %v10587_v9 = vld [vmem:[#allocation29_spill] sm:$0xff]  ;;  %v9746_v29 = vpop.f32.mrf.mxu0 }
 0x280   : > { %v4884_v34 = vsel %vm8542_vm2, %v6964_v8, %v4883_v61  ;;  %v4893_v50 = vsel %vm8542_vm2, %v4885_v36, %v4892_v27  ;;  %v4912_v33 = vshll.u32 %v9698_v47, 16  ;;  %v9734_v17 = vadd.f32 %v9416_v42, %v10587_v9  ;;  %v5614_v27 = vld [vmem:[#allocation2 + $0x24] sm:$0xf]  ;;  %10589 = vst [vmem:[#allocation29_spill] sm:$0xff] %v9746_v29 }
 0x281   : > { %10586 = vst [vmem:[#allocation30_spill] sm:$0xff] %v9717_v43  ;;  %7899 = vmatmul.mubr.bf16.gmra.mxu0 %v7002_v18  ;;  %v6980_v24 = vcombine.low %v4884_v34, %v4893_v50  ;;  %v4905_v63 = vor.u32 %v4903_v0, %v4902_v1  ;;  %v4907_v12 = vrot.slane %v4902_v1, 4  ;;  %v7004_v61 = vcombine.low %v9663_v62, %v9674_v59  ;;  %v9739_v36 = vpop.f32.mrf.mxu1  ;;  %v5615_v0 = vld [vmem:[#allocation2 + $0x28] sm:$0xf]  ;;  %v5616_v50 = vld [vmem:[#allocation2 + $0x2c] sm:$0x1] }
 0x282   : > { %10588 = vst [vmem:[#allocation25_spill] sm:$0xff] %v9734_v17  ;;  %7902 = vmatprep.mubr.bf16.mxu0 %v7003_v45  ;;  %v4914_v32 = vor.u32 %v4912_v33, %v4911_v54  ;;  %v4917_v8 = vshrl.u32 %v4583_v16, 16  ;;  %v4922_v14 = vshrl.u32 %v9719_v3, 16  ;;  %v4925_v1 = vshll.u32 %v9719_v3, 16  ;;  %v10590_v33 = vld [vmem:[#allocation31_spill] sm:$0xff] }
 0x283   : > { %7855 = vmatmul.mubr.bf16.gmra.mxu1 %v6980_v24  ;;  %v4906_v18 = vsel %vm8542_vm2, %v6965_v7, %v4905_v63  ;;  %v4931_v42 = vshrl.u32 %v9730_v11, 16  ;;  %v4934_v45 = vshll.u32 %v9730_v11, 16  ;;  %v7005_v34 = vcombine.low %v9688_v30, %v9698_v47  ;;  %v9756_v40 = vpop.f32.mrf.mxu1 }
 0x284   : > { %v4915_v16 = vsel %vm8542_vm2, %v4907_v12, %v4914_v32  ;;  %v6966_v62 = vrot.slane %v4917_v8, 11  ;;  %v4924_v59 = vrot.slane %v4922_v14, 7  ;;  %v9754_v24 = vadd.f32 %v9426_v19, %v10590_v33  ;;  %v10596_v33 = vld [vmem:[#allocation16_spill] sm:$0xff] }
 0x285   : > { %v6981_v54 = vcombine.low %v4906_v18, %v4915_v16  ;;  %v4933_v7 = vrot.slane %v4931_v42, 7  ;;  %v5663_v63 = vshrl.u32 %v5614_v27, 16  ;;  %v5666_v43 = vshll.u32 %v5614_v27, 16  ;;  %v10592_v42 = vld [vmem:[#allocation32_spill] sm:$0xff]  ;;  %v10593_v16 = vld [vmem:[#allocation39_spill] sm:$0xff] }
 0x286   : > { %10591 = vst [vmem:[#allocation31_spill] sm:$0xff] %v9754_v24  ;;  %v4927_v9 = vor.u32 %v4925_v1, %v4924_v59  ;;  %v4929_v17 = vrot.slane %v4924_v59, 4  ;;  %v5672_v29 = vshll.u32 %v5615_v0, 16  ;;  %v5676_v8 = vshrl.u32 %v5615_v0, 16  ;;  %v9758_v30 = vpop.f32.mrf.mxu0  ;;  %v5617_v27 = vld [vmem:[#allocation2 + $0x34] sm:$0xf] }
 0x287   : > { %7858 = vmatprep.mubr.bf16.mxu1 %v6981_v54  ;;  %v4936_v12 = vor.u32 %v4934_v45, %v4933_v7  ;;  %v5665_v32 = vrot.slane %v5663_v63, 4  ;;  %v5682_v14 = vshll.u32 %v5616_v50, 16  ;;  %v5668_v18 = vrot.slane %v5666_v43, 5  ;;  %v10595_v59 = vld [vmem:[#allocation15_spill] sm:$0xff]  ;;  %v5618_v54 = vld [vmem:[#allocation2 + $0x38] sm:$0xf] }
 0x288   : > { %v4928_v47 = vsel %vm8542_vm2, %v6966_v62, %v4927_v9  ;;  %v5674_v19 = vrot.slane %v5672_v29, 5  ;;  %v9764_v1 = vadd.f32 %v10593_v16, %v10592_v42  ;;  %v9768_v24 = vadd.f32 %v10596_v33, %v10595_v59  ;;  %v5619_v7 = vld [vmem:[#allocation2 + $0x3c] sm:$0x1]  ;;  %v9778_v42 = vpop.f32.mrf.mxu1 }
 0x289   : > { %7903 = vmatmul.mubr.bf16.gmra.mxu0 %v7004_v61  ;;  %v4937_v45 = vsel %vm8542_vm2, %v4929_v17, %v4936_v12  ;;  %v5678_v0 = vrot.slane %v5676_v8, 4  ;;  %v5684_v50 = vrot.slane %v5682_v14, 5  ;;  %v5669_v43 = vor.u32 %v5668_v18, %v5665_v32  ;;  %v10597_v29 = vld [vmem:[#allocation36_spill] sm:$0xff]  ;;  %10599 = vst [vmem:[#allocation15_spill] sm:$0xff] %v9778_v42  ;;  %v9780_v61 = vpop.f32.mrf.mxu0  ;;  %v10601_v17 = vld [vmem:[#allocation35_spill] sm:$0xff] }
 0x28a   : > { %10594 = vst [vmem:[#allocation32_spill] sm:$0xff] %v9764_v1  ;;  %v6982_v62 = vcombine.low %v4928_v47, %v4937_v45  ;;  %7906 = vmatprep.mubr.bf16.mxu0 %v7005_v34  ;;  %v9774_v63 = vadd.f32 %v9465_v51, %v10597_v29  ;;  %v7006_v9 = vcombine.low %v9719_v3, %v9730_v11  ;;  %10600 = vst [vmem:[#allocation16_spill] sm:$0xff] %v9780_v61  ;;  %v5620_v51 = vld [vmem:[#allocation2 + $0x44] sm:$0xf]  ;;  %v5621_v45 = vld [vmem:[#allocation2 + $0x48] sm:$0xf] }
 0x28b   : > { %v5679_v56 = vor.u32 %v5678_v0, %v5674_v19  ;;  %v2677_v12 = vadd.f32 %v9478_v46, %v10601_v17  ;;  %v5687_v8 = vshrl.u32 %v5617_v27, 16  ;;  %v5690_v14 = vshll.u32 %v5617_v27, 16  ;;  %v10602_v3 = vld [vmem:[#allocation37_spill] sm:$0xff] }
 0x28c   : > { %10598 = vst [vmem:[#allocation39_spill] sm:$0xff] %v9774_v63  ;;  %7859 = vmatmul.mubr.bf16.gmra.mxu1 %v6982_v62  ;;  %v5670_v34 = vrot.slane %v5669_v43, 4  ;;  %v5696_v32 = vshll.u32 %v5618_v54, 16  ;;  %v5700_v47 = vshrl.u32 %v5618_v54, 16  ;;  %v5706_v18 = vshll.u32 %v5619_v7, 16  ;;  %v9790_v43 = vpop.f32.mrf.mxu1  ;;  %v9792_v54 = vpop.f32.mrf.mxu0 }
 0x28d   : > { %v5680_v16 = vrot.slane %v5679_v56, 4  ;;  %v5689_v59 = vrot.slane %v5687_v8, 4  ;;  %v5692_v33 = vrot.slane %v5690_v14, 5  ;;  %v9786_v11 = vadd.f32 %v9480_v25, %v10602_v3  ;;  %v5622_v62 = vld [vmem:[#allocation2 + $0x4c] sm:$0x1]  ;;  %10605 = vst [vmem:[#allocation35_spill] sm:$0xff] %v9792_v54 }
 0x28e   : > { %v5675_v29 = vsel %vm8630_vm7, %v5670_v34, %v5674_v19  ;;  %v5698_v46 = vrot.slane %v5696_v32, 5  ;;  %v5702_v17 = vrot.slane %v5700_v47, 4  ;;  %v5708_v27 = vrot.slane %v5706_v18, 5  ;;  %v10606_v54 = vld [vmem:[#allocation38_spill] sm:$0xff] }
 0x28f   : > { %10603 = vst [vmem:[#allocation36_spill] sm:$0xff] %v9786_v11  ;;  %v5685_v7 = vsel %vm8630_vm7, %v5680_v16, %v5684_v50  ;;  %v5693_v56 = vor.u32 %v5692_v33, %v5689_v59  ;;  %v5711_v8 = vshrl.u32 %v5620_v51, 16  ;;  %v5714_v14 = vshll.u32 %v5620_v51, 16  ;;  %v9798_v50 = vpop.f32.mrf.mxu1  ;;  %v9800_v16 = vpop.f32.mrf.mxu0  ;;  %v10608_v51 = vld [vmem:[#allocation18_spill] sm:$0xff]  ;;  %v10609_v59 = vld [vmem:[#allocation17_spill] sm:$0xff] }
 0x290   : > { %v7015_v25 = vcombine.low %v5675_v29, %v5685_v7  ;;  %v5703_v3 = vor.u32 %v5702_v17, %v5698_v46  ;;  %v5720_v42 = vshll.u32 %v5621_v45, 16  ;;  %v5724_v11 = vshrl.u32 %v5621_v45, 16  ;;  %10607 = vst [vmem:[#allocation37_spill] sm:$0xff] %v9800_v16  ;;  %v5625_v7 = vld [vmem:[#allocation2 + $0x5c] sm:$0x1] }
 0x291   : > { %7907 = vmatmul.mubr.bf16.gmra.mxu0 %v7006_v9  ;;  %v5694_v19 = vrot.slane %v5693_v56, 4  ;;  %v5713_v34 = vrot.slane %v5711_v8, 4  ;;  %v5716_v32 = vrot.slane %v5714_v14, 5  ;;  %v5730_v47 = vshll.u32 %v5622_v62, 16  ;;  %v10610_v56 = vld [vmem:[#allocation21_spill] sm:$0xff]  ;;  %v10611_v8 = vld [vmem:[#allocation26_spill] sm:$0xff] }
 0x292   : > { %7926 = vmatprep.mubr.bf16.mxu1 %v7015_v25  ;;  %v5704_v18 = vrot.slane %v5703_v3, 4  ;;  %v5722_v63 = vrot.slane %v5720_v42, 5  ;;  %v5726_v1 = vrot.slane %v5724_v11, 4  ;;  %v2675_v61 = vadd.f32 %v9493_v57, %v10606_v54  ;;  %v5623_v42 = vld [vmem:[#allocation2 + $0x54] sm:$0xf] }
 0x293   : > { %v9804_v33 = vadd.f32 %v10609_v59, %v10608_v51  ;;  %v5699_v9 = vsel %vm8630_vm7, %v5694_v19, %v5698_v46  ;;  %v5717_v45 = vor.u32 %v5716_v32, %v5713_v34  ;;  %v9810_v29 = vadd.f32 %v9495_v6, %v9447_v28  ;;  %v5624_v54 = vld [vmem:[#allocation2 + $0x58] sm:$0xf]  ;;  %v5626_v19 = vld [vmem:[#allocation2 + $0x64] sm:$0xf]  ;;  %v9825_v34 = vpop.f32.mrf.mxu1  ;;  %v5628_v59 = vld [vmem:[#allocation2 + $0x6c] sm:$0x1] }
 0x294   : > { %v5709_v57 = vsel %vm8630_vm7, %v5704_v18, %v5708_v27  ;;  %v5727_v11 = vor.u32 %v5726_v1, %v5722_v63  ;;  %v5732_v17 = vrot.slane %v5730_v47, 5  ;;  %v2678_v62 = vadd.f32 %v9505_v52, %v9461_v53 }
 0x295   : > { %v9818_v14 = vadd.f32 %v10611_v8, %v10610_v56  ;;  %v7016_v46 = vcombine.low %v5699_v9, %v5709_v57  ;;  %v5718_v25 = vrot.slane %v5717_v45, 4  ;;  %v9821_v28 = vadd.f32 %v9526_v38, %v2677_v12  ;;  %v9827_v53 = vpop.f32.mrf.mxu0  ;;  %v5627_v38 = vld [vmem:[#allocation2 + $0x68] sm:$0xf] }
 0x296   : > { %v5728_v6 = vrot.slane %v5727_v11, 4  ;;  %v2681_v27 = vadd.f32 %v9552_v48, %v9476_v22  ;;  %v5735_v1 = vshrl.u32 %v5623_v42, 16  ;;  %v5738_v3 = vshll.u32 %v5623_v42, 16 }
 0x297   : > { %7927 = vmatmul.mubr.bf16.vlgmr.msra.gmra.mxu1 %v7016_v46  ;;  %v5723_v52 = vsel %vm8630_vm7, %v5718_v25, %v5722_v63  ;;  %v5744_v32 = vshll.u32 %v5624_v54, 16  ;;  %v5748_v47 = vshrl.u32 %v5624_v54, 16  ;;  %v5754_v18 = vshll.u32 %v5625_v7, 16  ;;  %v9836_v54 = vpop.f32.mrf.mxu1  ;;  %v9838_v7 = vpop.f32.mrf.mxu0 }
 0x298   : > { %v5733_v12 = vsel %vm8630_vm7, %v5728_v6, %v5732_v17  ;;  %v5737_v51 = vrot.slane %v5735_v1, 4  ;;  %v5740_v22 = vrot.slane %v5738_v3, 5  ;;  %v9834_v48 = vadd.f32 %v9535_v44, %v2675_v61 }
 0x299   : > { %v7017_v9 = vcombine.low %v5723_v52, %v5733_v12  ;;  %v5746_v45 = vrot.slane %v5744_v32, 5  ;;  %v5750_v42 = vrot.slane %v5748_v47, 4  ;;  %v5756_v57 = vrot.slane %v5754_v18, 5  ;;  %v10612_v52 = vld [vmem:[#allocation27_spill] sm:$0xff]  ;;  %v10613_v32 = vld [vmem:[#allocation33_spill] sm:$0xff] }
 0x29a   : > { %v5741_v11 = vor.u32 %v5740_v22, %v5737_v51  ;;  %v5759_v56 = vshrl.u32 %v5626_v19, 16  ;;  %v5762_v63 = vshll.u32 %v5626_v19, 16  ;;  %v5768_v8 = vshll.u32 %v5627_v38, 16  ;;  %v5629_v51 = vld [vmem:[#allocation2 + $0x74] sm:$0xf]  ;;  %v10614_v22 = vld [vmem:[#allocation34_spill] sm:$0xff] }
 0x29b   : > { %7930 = vmatprep.mubr.bf16.mxu1 %v7017_v9  ;;  %v5751_v17 = vor.u32 %v5750_v42, %v5746_v45  ;;  %v5772_v46 = vshrl.u32 %v5627_v38, 16  ;;  %v5778_v25 = vshll.u32 %v5628_v59, 16  ;;  %v2679_v44 = vadd.f32 %v9570_v2, %v9501_v60  ;;  %v10615_v38 = vld [vmem:[#allocation40_spill] sm:$0xff] }
 0x29c   : > { %v5742_v61 = vrot.slane %v5741_v11, 4  ;;  %v5761_v6 = vrot.slane %v5759_v56, 4  ;;  %v5764_v1 = vrot.slane %v5762_v63, 5  ;;  %v5770_v3 = vrot.slane %v5768_v8, 5  ;;  %v5630_v42 = vld [vmem:[#allocation2 + $0x78] sm:$0xf]  ;;  %v9857_v56 = vpop.f32.mrf.mxu0 }
 0x29d   : > { %v9844_v47 = vadd.f32 %v10613_v32, %v10612_v52  ;;  %v5752_v19 = vrot.slane %v5751_v17, 4  ;;  %v5774_v18 = vrot.slane %v5772_v46, 4  ;;  %v9847_v12 = vadd.f32 %v9554_v37, %v2678_v62  ;;  %v5631_v17 = vld [vmem:[#allocation2 + $0x7c] sm:$0x1] }
 0x29e   : > { %v9851_v59 = vadd.f32 %v10615_v38, %v10614_v22  ;;  %v5765_v9 = vor.u32 %v5764_v1, %v5761_v6  ;;  %v5780_v60 = vrot.slane %v5778_v25, 5  ;;  %v2682_v2 = vadd.f32 %v9594_v4, %v9513_v39  ;;  %v9855_v11 = vpop.f32.mrf.mxu1  ;;  %v10617_v6 = vld [vmem:[#allocation43_spill] sm:$0xff]  ;;  %v5632_v38 = vld [vmem:[#allocation2 + $0x84] sm:$0xf] }
 0x29f   : > { %v5747_v63 = vsel %vm8630_vm7, %v5742_v61, %v5746_v45  ;;  %v5757_v37 = vsel %vm8630_vm7, %v5752_v19, %v5756_v57  ;;  %v5775_v62 = vor.u32 %v5774_v18, %v5770_v3  ;;  %v9864_v8 = vadd.f32 %v9602_v23, %v2681_v27  ;;  %v5633_v27 = vld [vmem:[#allocation2 + $0x88] sm:$0xf]  ;;  %v9875_v18 = vpop.f32.mrf.mxu0 }
 0x2a0   : > { %v7018_v46 = vcombine.low %v5747_v63, %v5757_v37  ;;  %v5766_v25 = vrot.slane %v5765_v9, 4  ;;  %v2685_v39 = vadd.f32 %v9645_v13, %v10617_v6  ;;  %v5783_v4 = vshrl.u32 %v5629_v51, 16  ;;  %v9873_v19 = vpop.f32.mrf.mxu1  ;;  %v5634_v63 = vld [vmem:[#allocation2 + $0x8c] sm:$0x1] }
 0x2a1   : > { %10616 = vst [vmem:[#allocation14_spill] sm:$0xff] %v9864_v8  ;;  %v5776_v1 = vrot.slane %v5775_v62, 4  ;;  %v5786_v52 = vshll.u32 %v5629_v51, 16  ;;  %v5792_v32 = vshll.u32 %v5630_v42, 16  ;;  %v5796_v22 = vshrl.u32 %v5630_v42, 16 }
 0x2a2   : > { %7931 = vmatmul.mubr.bf16.gmra.mxu1 %v7018_v46  ;;  %v5771_v45 = vsel %vm8630_vm7, %v5766_v25, %v5770_v3  ;;  %v5785_v57 = vrot.slane %v5783_v4, 4  ;;  %v5802_v61 = vshll.u32 %v5631_v17, 16  ;;  %v9871_v23 = vadd.f32 %v9610_v41, %v2679_v44 }
 0x2a3   : > { %v5781_v13 = vsel %vm8630_vm7, %v5776_v1, %v5780_v60  ;;  %v5788_v51 = vrot.slane %v5786_v52, 5  ;;  %v5794_v9 = vrot.slane %v5792_v32, 5  ;;  %v5798_v42 = vrot.slane %v5796_v22, 4  ;;  %v9881_v60 = vpop.f32.mrf.mxu1 }
 0x2a4   : > { %10618 = vst [vmem:[#allocation38_spill] sm:$0xff] %v9871_v23  ;;  %v7019_v37 = vcombine.low %v5771_v45, %v5781_v13  ;;  %v5804_v62 = vrot.slane %v5802_v61, 5  ;;  %v5807_v3 = vshrl.u32 %v5632_v38, 16  ;;  %v5810_v46 = vshll.u32 %v5632_v38, 16  ;;  %v10619_v23 = vld [vmem:[#allocation45_spill] sm:$0xff] }
 0x2a5   : > { %v5789_v17 = vor.u32 %v5788_v51, %v5785_v57  ;;  %v5799_v25 = vor.u32 %v5798_v42, %v5794_v9  ;;  %v5816_v41 = vshll.u32 %v5633_v27, 16  ;;  %v5820_v44 = vshrl.u32 %v5633_v27, 16  ;;  %v10620_v38 = vld [vmem:[#allocation41_spill] sm:$0xff]  ;;  %v10621_v57 = vld [vmem:[#allocation42_spill] sm:$0xff] }
 0x2a6   : > { %7934 = vmatprep.mubr.bf16.mxu1 %v7019_v37  ;;  %v5809_v6 = vrot.slane %v5807_v3, 4  ;;  %v5812_v4 = vrot.slane %v5810_v46, 5  ;;  %v5826_v16 = vshll.u32 %v5634_v63, 16  ;;  %v2683_v8 = vadd.f32 %v9656_v31, %v10619_v23  ;;  %v9883_v1 = vpop.f32.mrf.mxu0  ;;  %v10622_v51 = vld [vmem:[#allocation46_spill] sm:$0xff]  ;;  %v5635_v31 = vld [vmem:[#allocation2 + $0x94] sm:$0xf] }
 0x2a7   : > { %v5790_v52 = vrot.slane %v5789_v17, 4  ;;  %v5800_v32 = vrot.slane %v5799_v25, 4  ;;  %v5818_v22 = vrot.slane %v5816_v41, 5  ;;  %v5822_v45 = vrot.slane %v5820_v44, 4  ;;  %v5636_v46 = vld [vmem:[#allocation2 + $0x98] sm:$0xf] }
 0x2a8   : > { %v9887_v61 = vadd.f32 %v10621_v57, %v10620_v38  ;;  %v5813_v27 = vor.u32 %v5812_v4, %v5809_v6  ;;  %v9890_v13 = vadd.f32 %v9633_v35, %v2682_v2  ;;  %v2686_v42 = vadd.f32 %v9676_v26, %v10622_v51  ;;  %v5637_v17 = vld [vmem:[#allocation2 + $0x9c] sm:$0x1]  ;;  %v9903_v26 = vpop.f32.mrf.mxu1  ;;  %v9905_v6 = vpop.f32.mrf.mxu0 }
 0x2a9   : > { %v5795_v23 = vsel %vm8630_vm7, %v5790_v52, %v5794_v9  ;;  %v5805_v63 = vsel %vm8630_vm7, %v5800_v32, %v5804_v62  ;;  %v5823_v37 = vor.u32 %v5822_v45, %v5818_v22  ;;  %v5828_v3 = vrot.slane %v5826_v16, 5  ;;  %v10623_v25 = vld [vmem:[#allocation44_spill] sm:$0xff]  ;;  %v5638_v52 = vld [vmem:[#allocation2 + $0xa4] sm:$0xf] }
 0x2aa   : > { %v2676_v41 = vadd.f32 %v10623_v25, %v9637_v49  ;;  %v7020_v44 = vcombine.low %v5795_v23, %v5805_v63  ;;  %v5814_v35 = vrot.slane %v5813_v27, 4  ;;  %v9901_v2 = vadd.f32 %v9690_v5, %v2685_v39  ;;  %v5639_v5 = vld [vmem:[#allocation2 + $0xa8] sm:$0xf] }
 0x2ab   : > { %v5824_v9 = vrot.slane %v5823_v37, 4  ;;  %v2689_v62 = vadd.f32 %v9721_v55, %v9578_v21  ;;  %v5831_v4 = vshrl.u32 %v5635_v31, 16  ;;  %v5834_v16 = vshll.u32 %v5635_v31, 16  ;;  %v5640_v21 = vld [vmem:[#allocation2 + $0xac] sm:$0x1] }
 0x2ac   : > { %7935 = vmatmul.mubr.bf16.gmra.mxu1 %v7020_v44  ;;  %v5819_v49 = vsel %vm8630_vm7, %v5814_v35, %v5818_v22  ;;  %v5840_v32 = vshll.u32 %v5636_v46, 16  ;;  %v5844_v45 = vshrl.u32 %v5636_v46, 16  ;;  %v5850_v38 = vshll.u32 %v5637_v17, 16  ;;  %v9918_v22 = vpop.f32.mrf.mxu0 }
 0x2ad   : > { %v5829_v39 = vsel %vm8630_vm7, %v5824_v9, %v5828_v3  ;;  %v5833_v57 = vrot.slane %v5831_v4, 4  ;;  %v5836_v27 = vrot.slane %v5834_v16, 5  ;;  %v9914_v51 = vadd.f32 %v9702_v20, %v2683_v8 }
 0x2ae   : > { %v7021_v55 = vcombine.low %v5819_v49, %v5829_v39  ;;  %v5842_v31 = vrot.slane %v5840_v32, 5  ;;  %v5846_v23 = vrot.slane %v5844_v45, 4  ;;  %v5852_v63 = vrot.slane %v5850_v38, 5  ;;  %v9916_v37 = vpop.f32.mrf.mxu1 }
 0x2af   : > { %10624 = vst [vmem:[#allocation18_spill] sm:$0xff] %v9914_v51  ;;  %v5837_v46 = vor.u32 %v5836_v27, %v5833_v57  ;;  %v5855_v17 = vshrl.u32 %v5638_v52, 16  ;;  %v5858_v25 = vshll.u32 %v5638_v52, 16  ;;  %v5864_v44 = vshll.u32 %v5639_v5, 16  ;;  %v5641_v52 = vld [vmem:[#allocation2 + $0xb4] sm:$0xf] }
 0x2b0   : > { %7938 = vmatprep.mubr.bf16.mxu1 %v7021_v55  ;;  %v5847_v3 = vor.u32 %v5846_v23, %v5842_v31  ;;  %v5868_v35 = vshrl.u32 %v5639_v5, 16  ;;  %v5874_v9 = vshll.u32 %v5640_v21, 16  ;;  %v2687_v20 = vadd.f32 %v9739_v36, %v9600_v10  ;;  %v9928_v57 = vpop.f32.mrf.mxu1  ;;  %v9930_v5 = vpop.f32.mrf.mxu0  ;;  %v10626_v27 = vld [vmem:[#allocation48_spill] sm:$0xff]  ;;  %v10627_v55 = vld [vmem:[#allocation47_spill] sm:$0xff] }
 0x2b1   : > { %v5838_v8 = vrot.slane %v5837_v46, 4  ;;  %v5857_v4 = vrot.slane %v5855_v17, 4  ;;  %v5860_v16 = vrot.slane %v5858_v25, 5  ;;  %v5866_v49 = vrot.slane %v5864_v44, 5  ;;  %v5643_v17 = vld [vmem:[#allocation2 + $0xbc] sm:$0x1] }
 0x2b2   : > { %v9923_v32 = vadd.f32 %v9580_v58, %v2676_v41  ;;  %v5848_v45 = vrot.slane %v5847_v3, 4  ;;  %v5870_v38 = vrot.slane %v5868_v35, 4  ;;  %v9926_v39 = vadd.f32 %v9723_v15, %v2686_v42  ;;  %v5642_v58 = vld [vmem:[#allocation2 + $0xb8] sm:$0xf] }
 0x2b3   : > { %v2680_v10 = vadd.f32 %v10626_v27, %v9768_v24  ;;  %v5861_v36 = vor.u32 %v5860_v16, %v5857_v4  ;;  %v5876_v21 = vrot.slane %v5874_v9, 5  ;;  %v2690_v23 = vadd.f32 %v9756_v40, %v10627_v55  ;;  %v10629_v24 = vld [vmem:[#allocation49_spill] sm:$0xff] }
 0x2b4   : > { %10625 = vst [vmem:[#allocation17_spill] sm:$0xff] %v9926_v39  ;;  %v5843_v41 = vsel %vm8630_vm7, %v5838_v8, %v5842_v31  ;;  %v5853_v15 = vsel %vm8630_vm7, %v5848_v45, %v5852_v63  ;;  %v5871_v42 = vor.u32 %v5870_v38, %v5866_v49  ;;  %v9941_v46 = vadd.f32 %v9758_v30, %v2689_v62  ;;  %v5644_v27 = vld [vmem:[#allocation2 + $0xc4] sm:$0xf]  ;;  %v9945_v31 = vpop.f32.mrf.mxu1  ;;  %v10630_v45 = vld [vmem:[#allocation16_spill] sm:$0xff] }
 0x2b5   : > { %v7022_v25 = vcombine.low %v5843_v41, %v5853_v15  ;;  %v5862_v44 = vrot.slane %v5861_v36, 4  ;;  %v2693_v3 = vadd.f32 %v9790_v43, %v10629_v24  ;;  %v5879_v35 = vshrl.u32 %v5641_v52, 16  ;;  %v5645_v43 = vld [vmem:[#allocation2 + $0xc8] sm:$0xf]  ;;  %v5646_v41 = vld [vmem:[#allocation2 + $0xcc] sm:$0x1] }
 0x2b6   : > { %10628 = vst [vmem:[#allocation21_spill] sm:$0xff] %v9941_v46  ;;  %v5872_v9 = vrot.slane %v5871_v42, 4  ;;  %v5882_v40 = vshll.u32 %v5641_v52, 16  ;;  %v5888_v4 = vshll.u32 %v5642_v58, 16  ;;  %v5892_v16 = vshrl.u32 %v5642_v58, 16  ;;  %v9947_v8 = vpop.f32.mrf.mxu0 }
 0x2b7   : > { %7939 = vmatmul.mubr.bf16.gmra.mxu1 %v7022_v25  ;;  %v5867_v30 = vsel %vm8630_vm7, %v5862_v44, %v5866_v49  ;;  %v5881_v62 = vrot.slane %v5879_v35, 4  ;;  %v5898_v63 = vshll.u32 %v5643_v17, 16  ;;  %v9952_v38 = vadd.f32 %v10630_v45, %v2687_v20  ;;  %v9958_v20 = vpop.f32.mrf.mxu1 }
 0x2b8   : > { %v5877_v52 = vsel %vm8630_vm7, %v5872_v9, %v5876_v21  ;;  %v5884_v36 = vrot.slane %v5882_v40, 5  ;;  %v5890_v55 = vrot.slane %v5888_v4, 5  ;;  %v5894_v58 = vrot.slane %v5892_v16, 4  ;;  %v9956_v15 = vpop.f32.mrf.mxu0  ;;  %v10632_v9 = vld [vmem:[#allocation50_spill] sm:$0xff] }
 0x2b9   : > { %10631 = vst [vmem:[#allocation26_spill] sm:$0xff] %v9952_v38  ;;  %v7023_v42 = vcombine.low %v5867_v30, %v5877_v52  ;;  %v5900_v25 = vrot.slane %v5898_v63, 5  ;;  %v5903_v24 = vshrl.u32 %v5644_v27, 16  ;;  %v5906_v46 = vshll.u32 %v5644_v27, 16  ;;  %v10633_v27 = vld [vmem:[#allocation51_spill] sm:$0xff] }
 0x2ba   : > { %v5885_v49 = vor.u32 %v5884_v36, %v5881_v62  ;;  %v5895_v44 = vor.u32 %v5894_v58, %v5890_v55  ;;  %v5912_v17 = vshll.u32 %v5645_v43, 16  ;;  %v5916_v35 = vshrl.u32 %v5645_v43, 16  ;;  %v9962_v4 = vpop.f32.mrf.mxu0  ;;  %v10634_v43 = vld [vmem:[#allocation35_spill] sm:$0xff] }
 0x2bb   : > { %7942 = vmatprep.mubr.bf16.mxu1 %v7023_v42  ;;  %v5905_v45 = vrot.slane %v5903_v24, 4  ;;  %v5908_v38 = vrot.slane %v5906_v46, 5  ;;  %v5922_v21 = vshll.u32 %v5646_v41, 16  ;;  %v2691_v40 = vadd.f32 %v9798_v50, %v10632_v9  ;;  %v10636_v42 = vld [vmem:[#allocation24_spill] sm:$0xff]  ;;  %v5647_v41 = vld [vmem:[#allocation2 + $0xd4] sm:$0xf] }
 0x2bc   : > { %v5886_v16 = vrot.slane %v5885_v49, 4  ;;  %v5896_v30 = vrot.slane %v5895_v44, 4  ;;  %v5914_v63 = vrot.slane %v5912_v17, 5  ;;  %v5918_v52 = vrot.slane %v5916_v35, 4  ;;  %v5648_v17 = vld [vmem:[#allocation2 + $0xd8] sm:$0xf]  ;;  %v9983_v9 = vpop.f32.mrf.mxu0 }
 0x2bd   : > { %v9965_v62 = vadd.f32 %v10633_v27, %v2680_v10  ;;  %v5909_v36 = vor.u32 %v5908_v38, %v5905_v45  ;;  %v9968_v58 = vadd.f32 %v10634_v43, %v2690_v23  ;;  %v2694_v46 = vadd.f32 %v9825_v34, %v10636_v42  ;;  %v5649_v35 = vld [vmem:[#allocation2 + $0xdc] sm:$0x1] }
 0x2be   : > { %v5891_v50 = vsel %vm8630_vm7, %v5886_v16, %v5890_v55  ;;  %v5901_v24 = vsel %vm8630_vm7, %v5896_v30, %v5900_v25  ;;  %v5919_v49 = vor.u32 %v5918_v52, %v5914_v63  ;;  %v5924_v44 = vrot.slane %v5922_v21, 5  ;;  %v9976_v10 = vpop.f32.mrf.mxu1  ;;  %v10638_v16 = vld [vmem:[#allocation22_spill] sm:$0xff]  ;;  %v5650_v52 = vld [vmem:[#allocation2 + $0xe4] sm:$0xf] }
 0x2bf   : > { %10635 = vst [vmem:[#allocation27_spill] sm:$0xff] %v9968_v58  ;;  %v7024_v38 = vcombine.low %v5891_v50, %v5901_v24  ;;  %v5910_v45 = vrot.slane %v5909_v36, 4  ;;  %v2692_v23 = vadd.f32 %v9836_v54, %v9818_v14  ;;  %v9981_v34 = vadd.f32 %v9827_v53, %v2693_v3  ;;  %v5651_v53 = vld [vmem:[#allocation2 + $0xe8] sm:$0xf] }
 0x2c0   : > { %v5920_v55 = vrot.slane %v5919_v49, 4  ;;  %v2697_v25 = vadd.f32 %v9855_v11, %v10638_v16  ;;  %v5927_v30 = vshrl.u32 %v5647_v41, 16  ;;  %v5930_v21 = vshll.u32 %v5647_v41, 16  ;;  %v9987_v27 = vpop.f32.mrf.mxu1  ;;  %v5652_v41 = vld [vmem:[#allocation2 + $0xec] sm:$0x1] }
 0x2c1   : > { %10637 = vst [vmem:[#allocation33_spill] sm:$0xff] %v9981_v34  ;;  %7943 = vmatmul.mubr.bf16.gmra.mxu1 %v7024_v38  ;;  %v5915_v36 = vsel %vm8630_vm7, %v5910_v45, %v5914_v63  ;;  %v5936_v43 = vshll.u32 %v5648_v17, 16  ;;  %v5940_v14 = vshrl.u32 %v5648_v17, 16  ;;  %v5946_v54 = vshll.u32 %v5649_v35, 16 }
 0x2c2   : > { %v5925_v3 = vsel %vm8630_vm7, %v5920_v55, %v5924_v44  ;;  %v5929_v42 = vrot.slane %v5927_v30, 4  ;;  %v5932_v50 = vrot.slane %v5930_v21, 5  ;;  %v9994_v11 = vadd.f32 %v9838_v7, %v2691_v40  ;;  %v9996_v24 = vpop.f32.mrf.mxu1  ;;  %v10640_v40 = vld [vmem:[#allocation23_spill] sm:$0xff] }
 0x2c3   : > { %v7025_v49 = vcombine.low %v5915_v36, %v5925_v3  ;;  %v5938_v38 = vrot.slane %v5936_v43, 5  ;;  %v5942_v16 = vrot.slane %v5940_v14, 4  ;;  %v5948_v34 = vrot.slane %v5946_v54, 5  ;;  %v9998_v63 = vpop.f32.mrf.mxu0 }
 0x2c4   : > { %10639 = vst [vmem:[#allocation34_spill] sm:$0xff] %v9994_v11  ;;  %v5933_v17 = vor.u32 %v5932_v50, %v5929_v42  ;;  %v5951_v35 = vshrl.u32 %v5650_v52, 16  ;;  %v5954_v45 = vshll.u32 %v5650_v52, 16  ;;  %v5960_v58 = vshll.u32 %v5651_v53, 16  ;;  %v10000_v39 = vpop.f32.mrf.mxu1 }
 0x2c5   : > { %7946 = vmatprep.mubr.bf16.mxu1 %v7025_v49  ;;  %v5943_v44 = vor.u32 %v5942_v16, %v5938_v38  ;;  %v5964_v55 = vshrl.u32 %v5651_v53, 16  ;;  %v5970_v7 = vshll.u32 %v5652_v41, 16  ;;  %v2695_v30 = vadd.f32 %v9873_v19, %v10640_v40  ;;  %v10004_v21 = vpop.f32.mrf.mxu0  ;;  %v5653_v49 = vld [vmem:[#allocation2 + $0xf4] sm:$0xf]  ;;  %v10642_v16 = vld [vmem:[#allocation30_spill] sm:$0xff] }
 0x2c6   : > { %v5934_v36 = vrot.slane %v5933_v17, 4  ;;  %v5953_v43 = vrot.slane %v5951_v35, 4  ;;  %v5956_v14 = vrot.slane %v5954_v45, 5  ;;  %v5962_v54 = vrot.slane %v5960_v58, 5  ;;  %v10006_v3 = vpop.f32.mrf.mxu1  ;;  %v5654_v35 = vld [vmem:[#allocation2 + $0xf8] sm:$0xf] }
 0x2c7   : > { %v5944_v42 = vrot.slane %v5943_v44, 4  ;;  %v5966_v52 = vrot.slane %v5964_v55, 4  ;;  %v5972_v50 = vrot.slane %v5970_v7, 5  ;;  %v10009_v11 = vadd.f32 %v9857_v56, %v2694_v46  ;;  %v10011_v53 = vpop.f32.mrf.mxu0 }
 0x2c8   : > { %v5939_v19 = vsel %vm8630_vm7, %v5934_v36, %v5938_v38  ;;  %v5957_v41 = vor.u32 %v5956_v14, %v5953_v43  ;;  %v2698_v17 = vadd.f32 %v9881_v60, %v10642_v16  ;;  %v10018_v58 = vadd.f32 %v9875_v18, %v2692_v23  ;;  %v10020_v45 = vpop.f32.mrf.mxu1  ;;  %v5655_v38 = vld [vmem:[#allocation2 + $0xfc] sm:$0x1]  ;;  %v10645_v18 = vld [vmem:[#allocation25_spill] sm:$0xff] }
 0x2c9   : > { %10641 = vst [vmem:[#allocation40_spill] sm:$0xff] %v10009_v11  ;;  %v5949_v56 = vsel %vm8630_vm7, %v5944_v42, %v5948_v34  ;;  %v5967_v46 = vor.u32 %v5966_v52, %v5962_v54  ;;  %v2696_v44 = vadd.f32 %v9903_v26, %v9844_v47  ;;  %v10027_v55 = vadd.f32 %v9883_v1, %v2697_v25  ;;  %v10029_v7 = vpop.f32.mrf.mxu0  ;;  %v5656_v16 = vld [vmem:[#allocation2 + $0x104] sm:$0xf] }
 0x2ca   : > { %10643 = vst [vmem:[#allocation43_spill] sm:$0xff] %v10018_v58  ;;  %v7026_v60 = vcombine.low %v5939_v19, %v5949_v56  ;;  %v5958_v40 = vrot.slane %v5957_v41, 4  ;;  %v2701_v23 = vadd.f32 %v9916_v37, %v10645_v18  ;;  %v5975_v36 = vshrl.u32 %v5653_v49, 16  ;;  %v10033_v43 = vpop.f32.mrf.mxu1  ;;  %v5657_v19 = vld [vmem:[#allocation2 + $0x108] sm:$0xf] }
 0x2cb   : > { %10644 = vst [vmem:[#allocation45_spill] sm:$0xff] %v10027_v55  ;;  %v5968_v14 = vrot.slane %v5967_v46, 4  ;;  %v5978_v34 = vshll.u32 %v5653_v49, 16  ;;  %v5984_v42 = vshll.u32 %v5654_v35, 16  ;;  %v5988_v52 = vshrl.u32 %v5654_v35, 16 }
 0x2cc   : > { %7947 = vmatmul.mubr.bf16.gmra.mxu1 %v7026_v60  ;;  %v5963_v47 = vsel %vm8630_vm7, %v5958_v40, %v5962_v54  ;;  %v5977_v1 = vrot.slane %v5975_v36, 4  ;;  %v5994_v26 = vshll.u32 %v5655_v38, 16  ;;  %v10038_v25 = vadd.f32 %v9905_v6, %v2695_v30  ;;  %v10040_v41 = vpop.f32.mrf.mxu1  ;;  %v5658_v35 = vld [vmem:[#allocation2 + $0x10c] sm:$0x1] }
 0x2cd   : > { %v5973_v37 = vsel %vm8630_vm7, %v5968_v14, %v5972_v50  ;;  %v5980_v56 = vrot.slane %v5978_v34, 5  ;;  %v5986_v49 = vrot.slane %v5984_v42, 5  ;;  %v5990_v46 = vrot.slane %v5988_v52, 4  ;;  %v10044_v18 = vpop.f32.mrf.mxu0  ;;  %v10647_v42 = vld [vmem:[#allocation31_spill] sm:$0xff] }
 0x2ce   : > { %10646 = vst [vmem:[#allocation41_spill] sm:$0xff] %v10038_v25  ;;  %v7027_v60 = vcombine.low %v5963_v47, %v5973_v37  ;;  %v5996_v55 = vrot.slane %v5994_v26, 5  ;;  %v5999_v54 = vshrl.u32 %v5656_v16, 16  ;;  %v6002_v40 = vshll.u32 %v5656_v16, 16  ;;  %v10046_v38 = vpop.f32.mrf.mxu1 }
 0x2cf   : > { %v5981_v6 = vor.u32 %v5980_v56, %v5977_v1  ;;  %v5991_v30 = vor.u32 %v5990_v46, %v5986_v49  ;;  %v6008_v36 = vshll.u32 %v5657_v19, 16  ;;  %v6012_v25 = vshrl.u32 %v5657_v19, 16  ;;  %v10048_v58 = vpop.f32.mrf.mxu0  ;;  %v10648_v46 = vld [vmem:[#allocation32_spill] sm:$0xff] }
 0x2d0   : > { %7950 = vmatprep.mubr.bf16.mxu1 %v7027_v60  ;;  %v6001_v50 = vrot.slane %v5999_v54, 4  ;;  %v6004_v14 = vrot.slane %v6002_v40, 5  ;;  %v6018_v34 = vshll.u32 %v5658_v35, 16  ;;  %v2699_v52 = vadd.f32 %v9928_v57, %v10647_v42  ;;  %v10052_v11 = vpop.f32.mrf.mxu1  ;;  %v381_v35 = vld [vmem:[#allocation2 + $0x11c] sm:$0x1]  ;;  %v10649_v42 = vld [vmem:[#allocation39_spill] sm:$0xff] }
 0x2d1   : > { %v5982_v47 = vrot.slane %v5981_v6, 4  ;;  %v5992_v26 = vrot.slane %v5991_v30, 4  ;;  %v6010_v16 = vrot.slane %v6008_v36, 5  ;;  %v6014_v37 = vrot.slane %v6012_v25, 4  ;;  %v10054_v51 = vpop.f32.mrf.mxu0  ;;  %v5659_v54 = vld [vmem:[#allocation2 + $0x114] sm:$0xf] }
 0x2d2   : > { %v6005_v1 = vor.u32 %v6004_v14, %v6001_v50  ;;  %v6020_v56 = vrot.slane %v6018_v34, 5  ;;  %v10057_v19 = vadd.f32 %v9918_v22, %v2698_v17  ;;  %v2702_v60 = vadd.f32 %v9945_v31, %v10648_v46  ;;  %v10061_v40 = vpop.f32.mrf.mxu1  ;;  %v5660_v36 = vld [vmem:[#allocation2 + $0x118] sm:$0xf] }
 0x2d3   : > { %v5987_v57 = vsel %vm8630_vm7, %v5982_v47, %v5986_v49  ;;  %v5997_v25 = vsel %vm8630_vm7, %v5992_v26, %v5996_v55  ;;  %v6015_v6 = vor.u32 %v6014_v37, %v6010_v16  ;;  %v10068_v30 = vadd.f32 %v9930_v5, %v2696_v44  ;;  %v10070_v22 = vpop.f32.mrf.mxu0 }
 0x2d4   : > { %v7028_v17 = vcombine.low %v5987_v57, %v5997_v25  ;;  %v6006_v50 = vrot.slane %v6005_v1, 4  ;;  %v2700_v31 = vadd.f32 %v9958_v20, %v9851_v59  ;;  %v10075_v14 = vadd.f32 %v9947_v8, %v2701_v23  ;;  %v3643_v34 = vpop.f32.mrf.mxu1  ;;  %v10651_v57 = vld [vmem:[#allocation36_spill] sm:$0xff] }
 0x2d5   : > { %v6016_v49 = vrot.slane %v6015_v6, 4  ;;  %v2705_v55 = vadd.f32 %v9976_v10, %v10649_v42  ;;  %v382_v5 = vsel %vm8553_vm4, 0, %v381_v35  ;;  %v6023_v44 = vshrl.u32 %v5659_v54, 16  ;;  %v7788_v26 = vpop.f32.mrf.mxu0 }
 0x2d6   : > { %7951 = vmatmul.mubr.bf16.gmra.mxu1 %v7028_v17  ;;  %v6011_v37 = vsel %vm8630_vm7, %v6006_v50, %v6010_v16  ;;  %383 = vst [vmem:[#allocation2 + $0x11c] sm:$0x1] %v382_v5  ;;  %v6026_v1 = vshll.u32 %v5659_v54, 16  ;;  %v6032_v59 = vshll.u32 %v5660_v36, 16  ;;  %v6036_v20 = vshrl.u32 %v5660_v36, 16  ;;  %v7744_v8 = vpop.f32.mrf.mxu1 }
 0x2d7   : > { %v6021_v23 = vsel %vm8630_vm7, %v6016_v49, %v6020_v56  ;;  %v6025_v46 = vrot.slane %v6023_v44, 4  ;;  %v10086_v10 = vadd.f32 %v9956_v15, %v2699_v52  ;;  %v2703_v35 = vadd.f32 %v9987_v27, %v10651_v57  ;;  %v4394_v25 = vpop.f32.mrf.mxu0  ;;  %v10656_v44 = vld [vmem:[#allocation20_spill] sm:$0xff] }
 0x2d8   : > { %v7029_v6 = vcombine.low %v6011_v37, %v6021_v23  ;;  %v6028_v17 = vrot.slane %v6026_v1, 5  ;;  %v6034_v42 = vrot.slane %v6032_v59, 5  ;;  %v6038_v16 = vrot.slane %v6036_v20, 4  ;;  %v3656_v50 = vpop.f32.mrf.mxu1  ;;  %v10657_v20 = vld [vmem:[#allocation29_spill] sm:$0xff] }
 0x2d9   : > { %v10091_v54 = vadd.f32 %v9962_v4, %v2702_v60  ;;  %v2706_v36 = vadd.f32 %v9996_v24, %v9810_v29  ;;  %v10096_v56 = vadd.f32 %v9983_v9, %v2700_v31  ;;  %v2704_v15 = vadd.f32 %v10000_v39, %v9887_v61  ;;  %v10100_v52 = vpop.f32.mrf.mxu0 }
 0x2da   : > { %7954 = vmatprep.mubr.bf16.mxu1 %v7029_v6  ;;  %v6029_v27 = vor.u32 %v6028_v17, %v6025_v46  ;;  %v6039_v49 = vor.u32 %v6038_v16, %v6034_v42  ;;  %v10103_v47 = vadd.f32 %v9998_v63, %v2705_v55  ;;  %v3753_v4 = vadd.f32 %v10006_v3, %v9821_v28  ;;  %v7745_v60 = vpop.f32.mrf.mxu1  ;;  %v10652_v63 = vld [vmem:[#allocation28_spill] sm:$0xff]  ;;  %v10658_v6 = vld [vmem:[#allocation18_spill] sm:$0xff]  ;;  %v10659_v16 = vld [vmem:[#allocation15_spill] sm:$0xff] }
 0x2db   : > { %v10108_v29 = vadd.f32 %v10004_v21, %v2703_v35  ;;  %v3751_v9 = vadd.f32 %v10020_v45, %v9834_v48  ;;  %v10113_v61 = vadd.f32 %v10011_v53, %v2706_v36  ;;  %v10117_v39 = vadd.f32 %v10033_v43, %v9847_v12  ;;  %v10119_v24 = vpop.f32.mrf.mxu0  ;;  %v10653_v12 = vld [vmem:[#allocation14_spill] sm:$0xff] }
 0x2dc   : > { %v2684_v31 = vadd.f32 %v10652_v63, %v9804_v33  ;;  %v6030_v28 = vrot.slane %v6029_v27, 4  ;;  %v10124_v3 = vadd.f32 %v10029_v7, %v2704_v15  ;;  %v10128_v21 = vadd.f32 %v10040_v41, %v9923_v32  ;;  %v3659_v48 = vpop.f32.mrf.mxu1  ;;  %v10654_v33 = vld [vmem:[#allocation38_spill] sm:$0xff]  ;;  %v10655_v7 = vld [vmem:[#allocation19_spill] sm:$0xff]  ;;  %v10660_v15 = vld [vmem:[#allocation17_spill] sm:$0xff] }
 0x2dd   : > { %v5661_v53 = vld [vmem:[#allocation2 + $0x11c] sm:$0x1]  ;;  %v10131_v45 = vadd.f32 %v10044_v18, %v3753_v4  ;;  %v3757_v43 = vadd.f32 %v10046_v38, %v10653_v12  ;;  %v10136_v55 = vadd.f32 %v10048_v58, %v3751_v9  ;;  %v3755_v5 = vadd.f32 %v10052_v11, %v10654_v33  ;;  %v10663_v9 = vld [vmem:[#allocation37_spill] sm:$0xff] }
 0x2de   : > { %v1875_v37 = vadd.f32 %v10656_v44, %v10655_v7  ;;  %v6040_v1 = vrot.slane %v6039_v49, 4  ;;  %v6042_v32 = vshll.u32 %v5661_v53, 16  ;;  %v10144_v41 = vadd.f32 %v10061_v40, %v9890_v13  ;;  %v7748_v59 = vpop.f32.mrf.mxu1 }
 0x2df   : > { %v7792_v18 = vpop.f32.mrf.mxu0  ;;  %v3406_v23 = vadd.f32 %v10657_v20, %v2684_v31  ;;  %v10148_v38 = vadd.f32 %v3643_v34, %v9965_v62  ;;  %v10150_v58 = vadd.f32 %v7788_v26, %v3757_v43  ;;  %v3761_v11 = vadd.f32 %v7744_v8, %v9901_v2  ;;  %v10661_v26 = vld [vmem:[#allocation21_spill] sm:$0xff] }
 0x2e0   : > { %v6035_v46 = vsel %vm8630_vm7, %v6030_v28, %v6034_v42  ;;  %v6044_v57 = vrot.slane %v6042_v32, 5  ;;  %v10155_v35 = vadd.f32 %v4394_v25, %v3755_v5  ;;  %v3759_v13 = vadd.f32 %v3656_v50, %v10658_v6  ;;  %v3672_v17 = vpop.f32.mrf.mxu1  ;;  %v10662_v25 = vld [vmem:[#allocation26_spill] sm:$0xff]  ;;  %v10665_v5 = vld [vmem:[#allocation33_spill] sm:$0xff] }
 0x2e1   : > { %v4410_v40 = vpop.f32.mrf.mxu0  ;;  %v2688_v36 = vadd.f32 %v10659_v16, %v1875_v37  ;;  %v3762_v27 = vadd.f32 %v7745_v60, %v10660_v15  ;;  %v3760_v62 = vadd.f32 %v3659_v48, %v3406_v23  ;;  %v10160_v34 = vadd.f32 %v7792_v18, %v3761_v11  ;;  %v10664_v60 = vld [vmem:[#allocation27_spill] sm:$0xff]  ;;  %v10666_v32 = vld [vmem:[#allocation34_spill] sm:$0xff]  ;;  %v10667_v11 = vld [vmem:[#allocation40_spill] sm:$0xff] }
 0x2e2   : > { %v6045_v2 = vsel %vm8630_vm7, %v6040_v1, %v6044_v57  ;;  %v3765_v8 = vadd.f32 %v7748_v59, %v10661_v26  ;;  %v10165_v42 = vadd.f32 %v4410_v40, %v3759_v13  ;;  %v3763_v49 = vadd.f32 %v3672_v17, %v10662_v25  ;;  %v7749_v50 = vpop.f32.mrf.mxu1  ;;  %v10668_v40 = vld [vmem:[#allocation43_spill] sm:$0xff]  ;;  %v10670_v25 = vld [vmem:[#allocation41_spill] sm:$0xff] }
 0x2e3   : > { %v7793_v4 = vpop.f32.mrf.mxu0  ;;  %v3410_v63 = vadd.f32 %v10663_v9, %v2688_v36  ;;  %v7030_v31 = vcombine.low %v6035_v46, %v6045_v2  ;;  %v3766_v48 = vadd.f32 %v7749_v50, %v10664_v60 }
 0x2e4   : > { %v10169_v28 = vadd.f32 %v7793_v4, %v3762_v27  ;;  %v3675_v12 = vpop.f32.mrf.mxu1  ;;  %v10669_v27 = vld [vmem:[#allocation45_spill] sm:$0xff] }
 0x2e5   : > { %v4413_v53 = vpop.f32.mrf.mxu0  ;;  %7955 = vmatmul.mubr.bf16.gmra.mxu1 %v7030_v31  ;;  %v3764_v43 = vadd.f32 %v3675_v12, %v3410_v63 }
 0x2e6   : > { %v10172_v0 = vadd.f32 %v4413_v53, %v3760_v62  ;;  %v7752_v33 = vpop.f32.mrf.mxu1 }
 0x2e7   : > { %v3769_v7 = vadd.f32 %v7752_v33, %v10665_v5 }
 0x2e8   : > { %v7796_v44 = vpop.f32.mrf.mxu0  ;;  %v3688_v37 = vpop.f32.mrf.mxu1 }
 0x2e9   : > { %v10175_v1 = vadd.f32 %v7796_v44, %v3765_v8  ;;  %v3767_v18 = vadd.f32 %v3688_v37, %v10666_v32 }
 0x2ea   : > { %v4426_v59 = vpop.f32.mrf.mxu0  ;;  %v7753_v20 = vpop.f32.mrf.mxu1 }
 0x2eb   : > { %v10178_v23 = vadd.f32 %v4426_v59, %v3763_v49  ;;  %v3770_v46 = vadd.f32 %v7753_v20, %v10667_v11 }
 0x2ec   : > { %v7797_v57 = vpop.f32.mrf.mxu0  ;;  %v3691_v6 = vpop.f32.mrf.mxu1 }
 0x2ed   : > { %v10181_v13 = vadd.f32 %v7797_v57, %v3766_v48  ;;  %v3768_v17 = vadd.f32 %v3691_v6, %v10668_v40 }
 0x2ee   : > { %v4429_v16 = vpop.f32.mrf.mxu0  ;;  %v7756_v36 = vpop.f32.mrf.mxu1 }
 0x2ef   : > { %v10184_v15 = vadd.f32 %v4429_v16, %v3764_v43  ;;  %v3773_v62 = vadd.f32 %v7756_v36, %v10669_v27 }
 0x2f0   : > { %v7800_v2 = vpop.f32.mrf.mxu0  ;;  %v3704_v26 = vpop.f32.mrf.mxu1 }
 0x2f1   : > { %v10187_v8 = vadd.f32 %v7800_v2, %v3769_v7  ;;  %v3771_v49 = vadd.f32 %v3704_v26, %v10670_v25 }
 0x2f2   : > { %v4442_v4 = vpop.f32.mrf.mxu0  ;;  %v7757_v50 = vpop.f32.mrf.mxu1 }
 0x2f3   : > { %v10190_v9 = vadd.f32 %v4442_v4, %v3767_v18  ;;  %v3774_v63 = vadd.f32 %v7757_v50, %v10057_v19 }
 0x2f4   : > { %v7801_v31 = vpop.f32.mrf.mxu0  ;;  %v3707_v60 = vpop.f32.mrf.mxu1 }
 0x2f5   : > { %v10193_v48 = vadd.f32 %v7801_v31, %v3770_v46  ;;  %v3772_v53 = vadd.f32 %v3707_v60, %v10068_v30 }
 0x2f6   : > { %v4445_v12 = vpop.f32.mrf.mxu0  ;;  %v7760_v43 = vpop.f32.mrf.mxu1 }
 0x2f7   : > { %v10196_v33 = vadd.f32 %v4445_v12, %v3768_v17  ;;  %v3777_v5 = vadd.f32 %v7760_v43, %v10075_v14 }
 0x2f8   : > { %v3720_v7 = vpop.f32.mrf.mxu1 }
 0x2f9   : > { %v7804_v44 = vpop.f32.mrf.mxu0  ;;  %v3775_v37 = vadd.f32 %v3720_v7, %v10086_v10 }
 0x2fa   : > { %v10200_v32 = vadd.f32 %v7804_v44, %v3773_v62  ;;  %v7761_v18 = vpop.f32.mrf.mxu1 }
 0x2fb   : > { %v4458_v19 = vpop.f32.mrf.mxu0  ;;  %v3778_v59 = vadd.f32 %v7761_v18, %v10091_v54 }
 0x2fc   : > { %v10203_v20 = vadd.f32 %v4458_v19, %v3771_v49  ;;  %v3723_v11 = vpop.f32.mrf.mxu1 }
 0x2fd   : > { %v7805_v30 = vpop.f32.mrf.mxu0  ;;  %v3776_v46 = vadd.f32 %v3723_v11, %v10096_v56 }
 0x2fe   : > { %v10206_v57 = vadd.f32 %v7805_v30, %v3774_v63  ;;  %v7764_v6 = vpop.f32.mrf.mxu1 }
 0x2ff   : > { %v4461_v14 = vpop.f32.mrf.mxu0  ;;  %v3781_v40 = vadd.f32 %v7764_v6, %v10103_v47 }
 0x300   : > { %v10209_v17 = vadd.f32 %v4461_v14, %v3772_v53  ;;  %v3736_v10 = vpop.f32.mrf.mxu1 }
 0x301   : > { %v3779_v16 = vadd.f32 %v3736_v10, %v10108_v29 }
 0x302   : > { %v7808_v36 = vpop.f32.mrf.mxu0  ;;  %v7765_v27 = vpop.f32.mrf.mxu1 }
 0x303   : > { %v10212_v54 = vadd.f32 %v7808_v36, %v3777_v5  ;;  %v3782_v62 = vadd.f32 %v7765_v27, %v10113_v61 }
 0x304   : > { %v4474_v2 = vpop.f32.mrf.mxu0  ;;  %v3739_v26 = vpop.f32.mrf.mxu1 }
 0x305   : > { %v10215_v56 = vadd.f32 %v4474_v2, %v3775_v37  ;;  %v3780_v25 = vadd.f32 %v3739_v26, %v10124_v3 }
 0x306   : > { %v7809_v49 = vpop.f32.mrf.mxu0 }
 0x307   : > { %v10218_v4 = vadd.f32 %v7809_v49, %v3778_v59 }
 0x308   : > { %v4477_v47 = vpop.f32.mrf.mxu0 }
 0x309   : > { %v10220_v50 = vadd.f32 %v4477_v47, %v3776_v46 }
 0x310   : > { %v7832_v63 = vpop.f32.mrf.mxu1 }
 0x311   : > { %v10223_v29 = vadd.f32 %v7832_v63, %v10131_v45  ;;  %v7812_v31 = vpop.f32.mrf.mxu0 }
 0x312   : > { %v5101_v60 = vpop.f32.mrf.mxu1  ;;  %v10225_v53 = vadd.f32 %v7812_v31, %v3781_v40 }
 0x313   : > { %v10228_v61 = vadd.f32 %v5101_v60, %v10136_v55  ;;  %v4490_v12 = vpop.f32.mrf.mxu0 }
 0x314   : > { %v10230_v43 = vpop.f32.mrf.mxu1  ;;  %v10232_v3 = vadd.f32 %v4490_v12, %v3779_v16 }
 0x315   : > { %v7813_v5 = vpop.f32.mrf.mxu0 }
 0x316   : > { %v10234_v7 = vpop.f32.mrf.mxu1  ;;  %v10236_v44 = vadd.f32 %v7813_v5, %v3782_v62 }
 0x317   : > { %v4493_v37 = vpop.f32.mrf.mxu0 }
 0x318   : > { %v10238_v45 = vadd.f32 %v4493_v37, %v3780_v25 }
 0x319   : > { %v7880_v27 = vpop.f32.mrf.mxu0 }
 0x31a   : > { %v7836_v18 = vpop.f32.mrf.mxu1 }
 0x31b   : > { %v10241_v19 = vadd.f32 %v7836_v18, %v10150_v58 }
 0x31c   : > { %v5117_v59 = vpop.f32.mrf.mxu1 }
 0x31d   : > { %v10244_v55 = vadd.f32 %v5117_v59, %v10155_v35 }
 0x31e   : > { %v10246_v11 = vpop.f32.mrf.mxu1 }
 0x320   : > { %v10248_v30 = vpop.f32.mrf.mxu1 }
 0x322   : > { %v7840_v46 = vpop.f32.mrf.mxu1 }
 0x323   : > { %v10251_v6 = vadd.f32 %v7840_v46, %v10160_v34 }
 0x324   : > { %v5133_v14 = vpop.f32.mrf.mxu1 }
 0x325   : > { %v10254_v40 = vadd.f32 %v5133_v14, %v10165_v42  ;;  %v5455_v42 = vpop.f32.mrf.mxu0 }
 0x326   : > { %v7841_v10 = vpop.f32.mrf.mxu1 }
 0x327   : > { %v10257_v58 = vadd.f32 %v7841_v10, %v10169_v28  ;;  %v7881_v47 = vpop.f32.mrf.mxu0 }
 0x328   : > { %v5136_v16 = vpop.f32.mrf.mxu1 }
 0x329   : > { %v10260_v35 = vadd.f32 %v5136_v16, %v10172_v0  ;;  %v5458_v60 = vpop.f32.mrf.mxu0 }
 0x32a   : > { %v7844_v36 = vpop.f32.mrf.mxu1 }
 0x32b   : > { %v10263_v62 = vadd.f32 %v7844_v36, %v10175_v1 }
 0x32c   : > { %v5149_v2 = vpop.f32.mrf.mxu1 }
 0x32d   : > { %v10266_v34 = vadd.f32 %v5149_v2, %v10178_v23 }
 0x32e   : > { %v7845_v26 = vpop.f32.mrf.mxu1 }
 0x32f   : > { %v10269_v25 = vadd.f32 %v7845_v26, %v10181_v13 }
 0x330   : > { %v5152_v28 = vpop.f32.mrf.mxu1 }
 0x331   : > { %v10272_v49 = vadd.f32 %v5152_v28, %v10184_v15  ;;  %v7884_v15 = vpop.f32.mrf.mxu0 }
 0x332   : > { %v7848_v0 = vpop.f32.mrf.mxu1 }
 0x333   : > { %v10275_v63 = vadd.f32 %v7848_v0, %v10187_v8 }
 0x334   : > { %v5165_v1 = vpop.f32.mrf.mxu1 }
 0x335   : > { %v10278_v31 = vadd.f32 %v5165_v1, %v10190_v9  ;;  %v5471_v9 = vpop.f32.mrf.mxu0 }
 0x336   : > { %v7849_v23 = vpop.f32.mrf.mxu1 }
 0x337   : > { %v10281_v12 = vadd.f32 %v7849_v23, %v10193_v48 }
 0x338   : > { %v5168_v13 = vpop.f32.mrf.mxu1 }
 0x339   : > { %v10284_v5 = vadd.f32 %v5168_v13, %v10196_v33  ;;  %v10298_v33 = vpop.f32.mrf.mxu0 }
 0x33a   : > { %v7852_v37 = vpop.f32.mrf.mxu1 }
 0x33b   : > { %v10287_v18 = vadd.f32 %v7852_v37, %v10200_v32 }
 0x33c   : > { %v5181_v8 = vpop.f32.mrf.mxu1 }
 0x33d   : > { %v10290_v59 = vadd.f32 %v5181_v8, %v10203_v20  ;;  %v5474_v20 = vpop.f32.mrf.mxu0 }
 0x33e   : > { %v7853_v46 = vpop.f32.mrf.mxu1 }
 0x33f   : > { %v10293_v14 = vadd.f32 %v7853_v46, %v10206_v57 }
 0x340   : > { %v5184_v48 = vpop.f32.mrf.mxu1 }
 0x341   : > { %v10296_v10 = vadd.f32 %v5184_v48, %v10209_v17  ;;  %v10312_v17 = vpop.f32.mrf.mxu0  ;;  %v5584_v48 = vadd.f32 %v7880_v27, %v10223_v29 }
 0x343   : > { %v7856_v16 = vpop.f32.mrf.mxu1  ;;  %v10317_v13 = vpop.f32.mrf.mxu0 }
 0x344   : > { %v10301_v36 = vadd.f32 %v7856_v16, %v10212_v54 }
 0x345   : > { %v5197_v32 = vpop.f32.mrf.mxu1  ;;  %v10325_v46 = vpop.f32.mrf.mxu0 }
 0x346   : > { %v10304_v2 = vadd.f32 %v5197_v32, %v10215_v56 }
 0x347   : > { %v7857_v26 = vpop.f32.mrf.mxu1  ;;  %v10333_v16 = vpop.f32.mrf.mxu0 }
 0x348   : > { %v10307_v28 = vadd.f32 %v7857_v26, %v10218_v4  ;;  %v5582_v26 = vadd.f32 %v5455_v42, %v10228_v61 }
 0x349   : > { %v5200_v57 = vpop.f32.mrf.mxu1  ;;  %v10345_v27 = vpop.f32.mrf.mxu0 }
 0x34a   : > { %v10310_v0 = vadd.f32 %v5200_v57, %v10220_v50 }
 0x34c   : > { %v7860_v1 = vpop.f32.mrf.mxu1 }
 0x34d   : > { %v10315_v23 = vadd.f32 %v7860_v1, %v10225_v53  ;;  %v4508_v53 = vadd.f32 %v10054_v51, %v10117_v39 }
 0x34e   : > { %v5213_v54 = vpop.f32.mrf.mxu1 }
 0x34f   : > { %v10320_v56 = vadd.f32 %v5213_v54, %v10232_v3  ;;  %v4506_v3 = vadd.f32 %v10070_v22, %v10128_v21 }
 0x350   : > { %v7861_v37 = vpop.f32.mrf.mxu1 }
 0x351   : > { %v10323_v4 = vadd.f32 %v7861_v37, %v10236_v44  ;;  %v5231_v44 = vadd.f32 %v10230_v43, %v4508_v53  ;;  %v5229_v51 = vadd.f32 %v10234_v7, %v4506_v3  ;;  %v10350_v53 = vpop.f32.mrf.mxu0 }
 0x352   : > { %v5216_v8 = vpop.f32.mrf.mxu1 }
 0x353   : > { %v10328_v50 = vadd.f32 %v5216_v8, %v10238_v45  ;;  %v10342_v45 = vld [vmem:[%s10494_s4] ss:$0 sm:$0xff]  ;;  %v5585_v39 = vadd.f32 %v7881_v47, %v5231_v44  ;;  %v5583_v37 = vadd.f32 %v5458_v60, %v5229_v51  ;;  %v5588_v60 = vadd.f32 %v7884_v15, %v10241_v19 }
 0x357   : > { %v7928_v32 = vpop.f32.mrf.mxu1 }
 0x358   : > { %v6338_v57 = vadd.f32 %v7928_v32, %v5584_v48  ;;  %v4512_v32 = vadd.f32 %v10100_v52, %v10144_v41 }
 0x359   : > { %v6209_v1 = vpop.f32.mrf.mxu1 }
 0x35a   : > { %v6336_v29 = vadd.f32 %v6209_v1, %v5582_v26  ;;  %v6377_v22 = vadd.f32 %v10342_v45, %v6338_v57  ;;  %v4510_v1 = vadd.f32 %v10119_v24, %v10148_v38  ;;  %v5235_v51 = vadd.f32 %v10246_v11, %v4512_v32 }
 0x35b   : > { %v7929_v54 = vpop.f32.mrf.mxu1 }
 0x35c   : > { %v6339_v21 = vadd.f32 %v7929_v54, %v5585_v39  ;;  %v6375_v61 = vadd.f32 %v10342_v45, %v6336_v29  ;;  %v6409_v48 = vmax.f32 %v6377_v22, 0.0  ;;  %v5586_v39 = vadd.f32 %v5471_v9, %v10244_v55  ;;  %v7893_v29 = vpop.f32.mrf.mxu0 }
 0x35d   : > { %v6212_v43 = vpop.f32.mrf.mxu1  ;;  %v5233_v19 = vadd.f32 %v10248_v30, %v4510_v1  ;;  %v5589_v15 = vadd.f32 %v10298_v33, %v5235_v51  ;;  %v5592_v30 = vadd.f32 %v10312_v17, %v10251_v6  ;;  %v5591_v51 = vadd.f32 %v10333_v16, %v10260_v35 }
 0x35e   : > { %v6378_v42 = vadd.f32 %v10342_v45, %v6339_v21  ;;  %v6337_v8 = vadd.f32 %v6212_v43, %v5583_v37  ;;  %v6407_v3 = vmax.f32 %v6375_v61, 0.0  ;;  %v5506_v11 = vpop.f32.mrf.mxu0  ;;  %v5596_v35 = vadd.f32 %v10345_v27, %v10263_v62 }
 0x35f   : > { %v5587_v38 = vadd.f32 %v5474_v20, %v5233_v19  ;;  %v5595_v62 = vadd.f32 %v5506_v11, %v10272_v49 }
 0x360   : > { %v6410_v7 = vmax.f32 %v6378_v42, 0.0  ;;  %v6376_v47 = vadd.f32 %v10342_v45, %v6337_v8  ;;  %v7896_v42 = vpop.f32.mrf.mxu0 }
 0x362   : > { %v7151_v44 = vpack.c.bf16 %v6410_v7, %v6409_v48  ;;  %v6408_v26 = vmax.f32 %v6376_v47, 0.0  ;;  %v7932_v57 = vpop.f32.mrf.mxu1  ;;  %v5590_v48 = vadd.f32 %v10317_v13, %v10254_v40 }
 0x363   : > { %v6342_v54 = vadd.f32 %v7932_v57, %v5588_v60  ;;  %v5519_v57 = vpop.f32.mrf.mxu0 }
 0x364   : > { %7223 = vst [vmem:[%s10362_s12 + $0x8] sm:$0xff] %v7151_v44   ;;  %v7146_v52 = vpack.c.bf16 %v6408_v26, %v6407_v3  ;;  %v6225_v41 = vpop.f32.mrf.mxu1  ;;  %v5593_v26 = vadd.f32 %v10325_v46, %v10257_v58  ;;  %v5598_v49 = vadd.f32 %v5519_v57, %v10278_v31 }
 0x365   : > { %v6340_v37 = vadd.f32 %v6225_v41, %v5586_v39  ;;  %v6381_v55 = vadd.f32 %v10342_v45, %v6342_v54  ;;  %v7897_v54 = vpop.f32.mrf.mxu0 }
 0x366   : > { %7147 = vst [vmem:[%s10362_s12] sm:$0xff] %v7146_v52   ;;  %v7933_v24 = vpop.f32.mrf.mxu1 }
 0x367   : > { %v6343_v9 = vadd.f32 %v7933_v24, %v5589_v15  ;;  %v6379_v21 = vadd.f32 %v10342_v45, %v6340_v37  ;;  %v6413_v33 = vmax.f32 %v6381_v55, 0.0  ;;  %v5522_v16 = vpop.f32.mrf.mxu0 }
 0x368   : > { %v6228_v22 = vpop.f32.mrf.mxu1 }
 0x369   : > { %v6382_v43 = vadd.f32 %v10342_v45, %v6343_v9  ;;  %v6341_v61 = vadd.f32 %v6228_v22, %v5587_v38  ;;  %v6411_v47 = vmax.f32 %v6379_v21, 0.0  ;;  %v5594_v9 = vadd.f32 %v10350_v53, %v10266_v34 }
 0x36b   : > { %v6414_v8 = vmax.f32 %v6382_v43, 0.0  ;;  %v6380_v20 = vadd.f32 %v10342_v45, %v6341_v61  ;;  %v5597_v61 = vadd.f32 %v7893_v29, %v10269_v25 }
 0x36c   : > { %v7936_v7 = vpop.f32.mrf.mxu1 }
 0x36d   : > { %v7161_v32 = vpack.c.bf16 %v6414_v8, %v6413_v33  ;;  %v6412_v60 = vmax.f32 %v6380_v20, 0.0  ;;  %v6346_v3 = vadd.f32 %v7936_v7, %v5592_v30  ;;  %v7900_v33 = vpop.f32.mrf.mxu0 }
 0x36e   : > { %v6241_v44 = vpop.f32.mrf.mxu1 }
 0x36f   : > { %7225 = vst [vmem:[%s10362_s12 + $0x18] sm:$0xff] %v7161_v32   ;;  %v7156_v6 = vpack.c.bf16 %v6412_v60, %v6411_v47  ;;  %v6344_v17 = vadd.f32 %v6241_v44, %v5590_v48  ;;  %v6385_v40 = vadd.f32 %v10342_v45, %v6346_v3  ;;  %v5535_v47 = vpop.f32.mrf.mxu0  ;;  %v5600_v32 = vadd.f32 %v7896_v42, %v10275_v63 }
 0x370   : > { %v7937_v1 = vpop.f32.mrf.mxu1  ;;  %v5599_v42 = vadd.f32 %v5522_v16, %v10284_v5 }
 0x371   : > { %7224 = vst [vmem:[%s10362_s12 + $0x10] sm:$0xff] %v7156_v6   ;;  %v6347_v13 = vadd.f32 %v7937_v1, %v5593_v26  ;;  %v6383_v52 = vadd.f32 %v10342_v45, %v6344_v17  ;;  %v6417_v46 = vmax.f32 %v6385_v40, 0.0  ;;  %v7901_v17 = vpop.f32.mrf.mxu0 }
 0x372   : > { %v6244_v39 = vpop.f32.mrf.mxu1 }
 0x373   : > { %v6386_v41 = vadd.f32 %v10342_v45, %v6347_v13  ;;  %v6345_v58 = vadd.f32 %v6244_v39, %v5591_v51  ;;  %v6415_v37 = vmax.f32 %v6383_v52, 0.0  ;;  %v5601_v51 = vadd.f32 %v7897_v54, %v10281_v12  ;;  %v5538_v31 = vpop.f32.mrf.mxu0 }
 0x375   : > { %v6418_v19 = vmax.f32 %v6386_v41, 0.0  ;;  %v6384_v15 = vadd.f32 %v10342_v45, %v6345_v58  ;;  %v7904_v5 = vpop.f32.mrf.mxu0 }
 0x377   : > { %v7171_v24 = vpack.c.bf16 %v6418_v19, %v6417_v46  ;;  %v6416_v38 = vmax.f32 %v6384_v15, 0.0  ;;  %v7940_v55 = vpop.f32.mrf.mxu1  ;;  %v5604_v15 = vadd.f32 %v7900_v33, %v10287_v18 }
 0x378   : > { %v6350_v22 = vadd.f32 %v7940_v55, %v5596_v35 }
 0x379   : > { %7227 = vst [vmem:[%s10362_s12 + $0x28] sm:$0xff] %v7171_v24   ;;  %v7166_v21 = vpack.c.bf16 %v6416_v38, %v6415_v37  ;;  %v6257_v43 = vpop.f32.mrf.mxu1  ;;  %v5602_v38 = vadd.f32 %v5535_v47, %v10290_v59 }
 0x37a   : > { %v6348_v30 = vadd.f32 %v6257_v43, %v5594_v9  ;;  %v6389_v27 = vadd.f32 %v10342_v45, %v6350_v22  ;;  %v5551_v43 = vpop.f32.mrf.mxu0 }
 0x37b   : > { %7226 = vst [vmem:[%s10362_s12 + $0x20] sm:$0xff] %v7166_v21   ;;  %v7941_v8 = vpop.f32.mrf.mxu1  ;;  %v5605_v21 = vadd.f32 %v7901_v17, %v10293_v14 }
 0x37c   : > { %v6351_v20 = vadd.f32 %v7941_v8, %v5597_v61  ;;  %v6387_v7 = vadd.f32 %v10342_v45, %v6348_v30  ;;  %v6421_v25 = vmax.f32 %v6389_v27, 0.0  ;;  %v5603_v8 = vadd.f32 %v5538_v31, %v10296_v10  ;;  %v7905_v27 = vpop.f32.mrf.mxu0 }
 0x37d   : > { %v6260_v48 = vpop.f32.mrf.mxu1  ;;  %v5606_v10 = vadd.f32 %v5551_v43, %v10304_v2 }
 0x37e   : > { %v6390_v34 = vadd.f32 %v10342_v45, %v6351_v20  ;;  %v6349_v53 = vadd.f32 %v6260_v48, %v5595_v62  ;;  %v6419_v3 = vmax.f32 %v6387_v7, 0.0  ;;  %v5608_v7 = vadd.f32 %v7904_v5, %v10301_v36 }
 0x380   : > { %v6422_v29 = vmax.f32 %v6390_v34, 0.0  ;;  %v6388_v60 = vadd.f32 %v10342_v45, %v6349_v53 }
 0x381   : > { %v7944_v11 = vpop.f32.mrf.mxu1 }
 0x382   : > { %v7181_v44 = vpack.c.bf16 %v6422_v29, %v6421_v25  ;;  %v6420_v26 = vmax.f32 %v6388_v60, 0.0  ;;  %v6354_v6 = vadd.f32 %v7944_v11, %v5600_v32  ;;  %v5554_v32 = vpop.f32.mrf.mxu0 }
 0x383   : > { %v6273_v1 = vpop.f32.mrf.mxu1 }
 0x384   : > { %7229 = vst [vmem:[%s10362_s12 + $0x38] sm:$0xff] %v7181_v44   ;;  %v7176_v40 = vpack.c.bf16 %v6420_v26, %v6419_v3  ;;  %v6352_v13 = vadd.f32 %v6273_v1, %v5598_v49  ;;  %v6393_v39 = vadd.f32 %v10342_v45, %v6354_v6  ;;  %v5609_v3 = vadd.f32 %v7905_v27, %v10307_v28  ;;  %v7908_v17 = vpop.f32.mrf.mxu0 }
 0x385   : > { %v7945_v63 = vpop.f32.mrf.mxu1  ;;  %v5607_v6 = vadd.f32 %v5554_v32, %v10310_v0 }
 0x386   : > { %7228 = vst [vmem:[%s10362_s12 + $0x30] sm:$0xff] %v7176_v40   ;;  %v6355_v52 = vadd.f32 %v7945_v63, %v5601_v51  ;;  %v6391_v41 = vadd.f32 %v10342_v45, %v6352_v13  ;;  %v6425_v19 = vmax.f32 %v6393_v39, 0.0  ;;  %v5567_v28 = vpop.f32.mrf.mxu0 }
 0x387   : > { %v6276_v57 = vpop.f32.mrf.mxu1 }
 0x388   : > { %v6394_v58 = vadd.f32 %v10342_v45, %v6355_v52  ;;  %v6353_v46 = vadd.f32 %v6276_v57, %v5599_v42  ;;  %v6423_v35 = vmax.f32 %v6391_v41, 0.0  ;;  %v7909_v41 = vpop.f32.mrf.mxu0 }
 0x38a   : > { %v6426_v12 = vmax.f32 %v6394_v58, 0.0  ;;  %v6392_v54 = vadd.f32 %v10342_v45, %v6353_v46  ;;  %v5612_v46 = vadd.f32 %v7908_v17, %v10315_v23 }
 0x38c   : > { %v7191_v16 = vpack.c.bf16 %v6426_v12, %v6425_v19  ;;  %v6424_v37 = vmax.f32 %v6392_v54, 0.0  ;;  %v7948_v24 = vpop.f32.mrf.mxu1  ;;  %v5610_v12 = vadd.f32 %v5567_v28, %v10320_v56 }
 0x38d   : > { %v6358_v55 = vadd.f32 %v7948_v24, %v5604_v15  ;;  %v5570_v15 = vpop.f32.mrf.mxu0 }
 0x38e   : > { %7231 = vst [vmem:[%s10362_s12 + $0x48] sm:$0xff] %v7191_v16   ;;  %v7186_v9 = vpack.c.bf16 %v6424_v37, %v6423_v35  ;;  %v6289_v22 = vpop.f32.mrf.mxu1  ;;  %v5613_v35 = vadd.f32 %v7909_v41, %v10323_v4  ;;  %v5611_v24 = vadd.f32 %v5570_v15, %v10328_v50 }
 0x38f   : > { %v6356_v61 = vadd.f32 %v6289_v22, %v5602_v38  ;;  %v6397_v18 = vadd.f32 %v10342_v45, %v6358_v55 }
 0x390   : > { %7230 = vst [vmem:[%s10362_s12 + $0x40] sm:$0xff] %v7186_v9   ;;  %v7949_v30 = vpop.f32.mrf.mxu1 }
 0x391   : > { %v6359_v33 = vadd.f32 %v7949_v30, %v5605_v21  ;;  %v6395_v20 = vadd.f32 %v10342_v45, %v6356_v61  ;;  %v6429_v14 = vmax.f32 %v6397_v18, 0.0 }
 0x392   : > { %v6292_v62 = vpop.f32.mrf.mxu1 }
 0x393   : > { %v6398_v59 = vadd.f32 %v10342_v45, %v6359_v33  ;;  %v6357_v48 = vadd.f32 %v6292_v62, %v5603_v8  ;;  %v6427_v25 = vmax.f32 %v6395_v20, 0.0 }
 0x395   : > { %v6430_v34 = vmax.f32 %v6398_v59, 0.0  ;;  %v6396_v53 = vadd.f32 %v10342_v45, %v6357_v48 }
 0x396   : > { %v7952_v47 = vpop.f32.mrf.mxu1 }
 0x397   : > { %v7201_v29 = vpack.c.bf16 %v6430_v34, %v6429_v14  ;;  %v6428_v60 = vmax.f32 %v6396_v53, 0.0  ;;  %v6362_v49 = vadd.f32 %v7952_v47, %v5608_v7 }
 0x398   : > { %v6305_v11 = vpop.f32.mrf.mxu1 }
 0x399   : > { %7233 = vst [vmem:[%s10362_s12 + $0x58] sm:$0xff] %v7201_v29   ;;  %v7196_v44 = vpack.c.bf16 %v6428_v60, %v6427_v25  ;;  %v6360_v26 = vadd.f32 %v6305_v11, %v5606_v10  ;;  %v6401_v2 = vadd.f32 %v10342_v45, %v6362_v49 }
 0x39a   : > { %v7953_v36 = vpop.f32.mrf.mxu1 }
 0x39b   : > { %7232 = vst [vmem:[%s10362_s12 + $0x50] sm:$0xff] %v7196_v44   ;;  %v6363_v1 = vadd.f32 %v7953_v36, %v5609_v3  ;;  %v6399_v40 = vadd.f32 %v10342_v45, %v6360_v26  ;;  %v6433_v42 = vmax.f32 %v6401_v2, 0.0 }
 0x39c   : > { %v6308_v51 = vpop.f32.mrf.mxu1 }
 0x39d   : > { %v6402_v13 = vadd.f32 %v10342_v45, %v6363_v1  ;;  %v6361_v63 = vadd.f32 %v6308_v51, %v5607_v6  ;;  %v6431_v31 = vmax.f32 %v6399_v40, 0.0 }
 0x39f   : > { %v6434_v39 = vmax.f32 %v6402_v13, 0.0  ;;  %v6400_v52 = vadd.f32 %v10342_v45, %v6361_v63 }
 0x3a1   : > { %v7211_v0 = vpack.c.bf16 %v6434_v39, %v6433_v42  ;;  %v6432_v57 = vmax.f32 %v6400_v52, 0.0 }
 0x3a3   : > { %7235 = vst [vmem:[%s10362_s12 + $0x68] sm:$0xff] %v7211_v0   ;;  %v7206_v58 = vpack.c.bf16 %v6432_v57, %v6431_v31 }
 0x3a5   : > { %7234 = vst [vmem:[%s10362_s12 + $0x60] sm:$0xff] %v7206_v58   ;;  %v7956_v19 = vpop.f32.mrf.mxu1 }
 0x3a6   : > { %v6366_v54 = vadd.f32 %v7956_v19, %v5612_v46 }
 0x3a7   : > { %v6321_v5 = vpop.f32.mrf.mxu1 }
 0x3a8   : > { %v6364_v16 = vadd.f32 %v6321_v5, %v5610_v12  ;;  %v6405_v38 = vadd.f32 %v10342_v45, %v6366_v54 }
 0x3a9   : > { %v7957_v37 = vpop.f32.mrf.mxu1 }
 0x3aa   : > { %v6367_v55 = vadd.f32 %v7957_v37, %v5613_v35  ;;  %v6403_v9 = vadd.f32 %v10342_v45, %v6364_v16  ;;  %v6437_v21 = vmax.f32 %v6405_v38, 0.0 }
 0x3ab   : > { %v6324_v23 = vpop.f32.mrf.mxu1 }
 0x3ac   : > { %v6406_v56 = vadd.f32 %v10342_v45, %v6367_v55  ;;  %v6365_v22 = vadd.f32 %v6324_v23, %v5611_v24  ;;  %v6435_v50 = vmax.f32 %v6403_v9, 0.0 }
 0x3ae   : > { %v6438_v43 = vmax.f32 %v6406_v56, 0.0  ;;  %v6404_v4 = vadd.f32 %v10342_v45, %v6365_v22 }
 0x3b0   : > { %v7221_v61 = vpack.c.bf16 %v6438_v43, %v6437_v21  ;;  %v6436_v30 = vmax.f32 %v6404_v4, 0.0 }
 0x3b2   : > { %7237 = vst [vmem:[%s10362_s12 + $0x78] sm:$0xff] %v7221_v61   ;;  %v7216_v8 = vpack.c.bf16 %v6436_v30, %v6435_v50 }
 0x3b4   : > { %7236 = vst [vmem:[%s10362_s12 + $0x70] sm:$0xff] %v7216_v8  }
 0x3b5   : > { %8278 = shalt.err (!%p8275_p3)
}
 0x3b6   : > { %s8279_s13 = scalar_lea.hbm %s10443_s11, 2048  ;;  %s8283_s9 = scalar_lea.hbm %s10495_s5, 4096 }
 0x3b7   : > { %p8280_p11 = scmp.ne.s32.totalorder %s10443_s11, %s8279_s13  ;;  %p8284_p4 = scmp.lt.s32.totalorder %s10443_s11, %s10495_s5 }
 0x3b8   : > { %p8285_p6 = scmp.lt.s32.totalorder %s8283_s9, %s8279_s13 }
 0x3b9   : > { %p8281_p9 = pnand %p8280_p11, %p10671_p2 }
 0x3ba   : > { %p8286_p8 = por %p8285_p6, %p8284_p4 }
 0x3bb   : > { %p8282_p1 = pneg %p8281_p9 }
 0x3bd   : > { %p8287_p5 = pnand %p8286_p8, %p8282_p1 }
 0x3bf   : > { %8290 = shalt.err (!%p8287_p5)
}
 0x3c0   : > { %s8342_s14 = smov 64   ;;  %s8343_s7 = smov 4  }
 0x3c1   : > { %7968 = dma.vmem_to_hbm [thread:$0]  (%p10671_p2), %s10445_s6, 2048, %s10443_s11, %s6600_s17, %s8342_s14, %s8342_s14, %s8343_s7  }
 0x3c2 PF: > { %s6628_s28 = sand.u32 1, %s8321_s18   ;;  %p10672_p7 = scmp.ne.s32.totalorder %s10507_s25, 0 }
 0x3c3   : > { %p10673_p12 = scmp.ge.s32.totalorder %s8333_s21, 2  ;;  %s6629_s16 = scalar_lea.sflag [#allocation5], %s6628_s28 }
 0x3c5   : > { %p7982_p13 = pnand %p10673_p12, %p10672_p7 }
 0x3c7   : > { %p7983_p0 = pneg %p7982_p13 }
 0x3c9   : > { %8316 = dma.done.wait (%p7983_p0), %s6629_s16, 2048  }
 0x3ca   : > { %8318 = vsyncadd (%p7983_p0), %s6629_s16, 4294965248  ;;  %p19_p10 = scmp.ge.s32.totalorder %s8452_s15, 4   ;;  %s10674_s18 = smov %s8325_s19 }
 0x3cb   : > { %s10675_s19 = smov %s8329_s20  ;;  %s10676_s20 = smov %s8468_s27 }
 0x3cc   : > { %s10677_s21 = smov %s8452_s15  ;;  %21 = sbr.rel (!%p19_p10) target bundleno = 6 (0x6), region = 103 }
 0x3d1   :  { %6634 = vsyncpa [#allocation4], 1 }
 0x3d2   :  { %6636 = vsyncpa [#allocation4 + $0x1], 1 }
 0x3d3   :  { %6637 = vsyncpa [#allocation7], 1 }
 0x3d4   :  { %6638 = vsyncpa [#allocation5], 1 }
 0x3d5   :  { %6640 = vsyncpa [#allocation5 + $0x1], 1 }

</bundles_post_ra>
